<compile_context>
chip_gen: v7x
topology: tpu7x:2x2x1
jax: 0.10.0
libtpu: 0.0.40
codegen_flags: <defaults>
</compile_context>

<pallas_src>
import math

import jax
import jax.numpy as jnp
from jax.experimental import pallas as pl
from jax.experimental.pallas import tpu as pltpu


# ----------------------------- module constants ---------------------------------
LAYERS = 12
STACKS = 4
LAYERS_PER_STACK = LAYERS // STACKS                  # 3
KERNEL_SIZE = 3
DILATIONS = tuple(2 ** (l % LAYERS_PER_STACK) for l in range(LAYERS))   # 1,2,4 x 4
SQRT_HALF = math.sqrt(0.5)
FC1_IN = 256                                         # nn.Linear(256, 512) hard-coded
FC1_OUT = 512
BN_EPS = 1e-5
PAD_ROWS = 8                                         # zero prefix >= max causal shift (8)


# ---------------------------------------------------------------------------------
# Kernel 1: 12 causal dilated residual conv layers + final_fc1 (+ReLU).
# Grid streams one stack (3 layers) of bf16 weights per step; the activation sequence
# lives in a persistent VMEM scratch with an 8-row zero prefix that supplies the causal
# padding for shifted reads.
# ---------------------------------------------------------------------------------
def conv_fc1_kernel(x0_ref, tpos_ref, convw_ref, convb_ref, fc1w_ref, fc1b_ref,
                    hid_ref, xp_ref):
    stack = pl.program_id(0)
    BSp, E = x0_ref.shape

    # Stack 0: place the padded input sequence after the zero prefix.
    @pl.when(stack == 0)
    def _():
        xp_ref[pl.ds(0, PAD_ROWS), :] = jnp.zeros((PAD_ROWS, E), jnp.float32)
        xp_ref[pl.ds(PAD_ROWS, BSp), :] = x0_ref[...]

    # Hoisted causal masks: one compare per distinct shift per grid step (not per tap).
    tpos = tpos_ref[...]                               # (BSp, 1) int32, position in seq
    masks = {sh: tpos >= sh for sh in (1, 2, 4, 8)}

    def tap(sh):
        # Row (b, t) reads row (b, t - sh); rows with t < sh are zeroed by the mask,
        # which also blocks any cross-sequence reads through the flattened layout.
        v = xp_ref[pl.ds(PAD_ROWS - sh, BSp), :]
        return jnp.where(masks[sh], v, 0.0)

    # Three layers per grid step -> dilations 1, 2, 4 are static inside the body.
    for j, d in enumerate((1, 2, 4)):
        x = xp_ref[pl.ds(PAD_ROWS, BSp), :]
        # Fused 3-tap conv: one (BSp, 3E) x (3E, E) MXU matmul (bf16 in, f32 accumulate).
        taps = jnp.concatenate([tap(2 * d), tap(d), x], axis=-1)
        acc = convb_ref[j] + jnp.dot(taps.astype(jnp.bfloat16), convw_ref[j],
                                     preferred_element_type=jnp.float32)
        xp_ref[pl.ds(PAD_ROWS, BSp), :] = jnp.maximum((acc + x) * SQRT_HALF, 0.0)

    # Last stack: SequenceWise final_fc1 (256 -> 512) + ReLU.
    @pl.when(stack == pl.num_programs(0) - 1)
    def _():
        x = xp_ref[pl.ds(PAD_ROWS, BSp), :]
        h = jnp.dot(x.astype(jnp.bfloat16), fc1w_ref[...],
                    preferred_element_type=jnp.float32) + fc1b_ref[...]
        hid_ref[...] = jnp.maximum(h, 0.0)


def conv_stack_fc1(x0, tpos, conv_w, conv_b, fc1_w, fc1_b):
    BSp, E = x0.shape
    flops = 2 * BSp * (KERNEL_SIZE * E) * E * LAYERS + 2 * BSp * E * FC1_OUT
    bytes_accessed = (conv_w.size * 2 + fc1_w.size * 2          # bf16 weights
                      + x0.size * 4 + BSp * FC1_OUT * 4)        # f32 activations

    return pl.pallas_call(
        conv_fc1_kernel,
        out_shape=jax.ShapeDtypeStruct((BSp, FC1_OUT), jnp.float32),
        grid_spec=pltpu.PrefetchScalarGridSpec(
            num_scalar_prefetch=0,
            grid=(STACKS,),
            in_specs=[
                pl.BlockSpec((BSp, E), lambda s: (0, 0)),                       # x0 (resident)
                pl.BlockSpec((BSp, 1), lambda s: (0, 0)),                       # tpos
                pl.BlockSpec((LAYERS_PER_STACK, KERNEL_SIZE * E, E),
                             lambda s: (s, 0, 0)),                              # conv_w stream
                pl.BlockSpec((LAYERS_PER_STACK, 1, E), lambda s: (s, 0, 0)),    # conv_b stream
                pl.BlockSpec((E, FC1_OUT), lambda s: (0, 0)),                   # fc1_w
                pl.BlockSpec((1, FC1_OUT), lambda s: (0, 0)),                   # fc1_b
            ],
            out_specs=pl.BlockSpec((BSp, FC1_OUT), lambda s: (0, 0)),
            scratch_shapes=[pltpu.VMEM((PAD_ROWS + BSp, E), jnp.float32)],
        ),
        compiler_params=pltpu.CompilerParams(
            dimension_semantics=("arbitrary",)),       # layer stacks are sequential
        cost_estimate=pl.CostEstimate(flops=flops, transcendentals=0,
                                      bytes_accessed=bytes_accessed),
    )(x0, tpos, conv_w, conv_b, fc1_w, fc1_b)


# ---------------------------------------------------------------------------------
# Kernel 2: vocab projection (SequenceWise final_fc2) as a lane-dense tiled matmul.
# ---------------------------------------------------------------------------------
def fc2_kernel(hid_ref, w_ref, b_ref, o_ref):
    o_ref[...] = (jnp.dot(hid_ref[...].astype(jnp.bfloat16), w_ref[...],
                          preferred_element_type=jnp.float32) + b_ref[...])


def vocab_projection(hid, w, b, *, tile_v=512):
    assert tile_v % 128 == 0
    R, H = hid.shape
    V = w.shape[1]
    v_pad = ((V + tile_v - 1) // tile_v) * tile_v
    if v_pad != V:                                   # pad vocab to a lane-dense multiple
        w = jnp.pad(w, ((0, 0), (0, v_pad - V)))
        b = jnp.pad(b, ((0, v_pad - V),))
    b2 = b.reshape(1, v_pad)

    flops = 2 * R * H * v_pad
    bytes_accessed = w.size * 2 + hid.size * 4 + R * v_pad * 4

    return pl.pallas_call(
        fc2_kernel,
        out_shape=jax.ShapeDtypeStruct((R, v_pad), jnp.float32),
        grid_spec=pltpu.PrefetchScalarGridSpec(
            num_scalar_prefetch=0,
            grid=(v_pad // tile_v,),
            in_specs=[
                pl.BlockSpec((R, H), lambda v: (0, 0)),          # hid resident across tiles
                pl.BlockSpec((H, tile_v), lambda v: (0, v)),     # only the weight tile streams
                pl.BlockSpec((1, tile_v), lambda v: (0, v)),
            ],
            out_specs=pl.BlockSpec((R, tile_v), lambda v: (0, v)),
        ),
        compiler_params=pltpu.CompilerParams(
            dimension_semantics=("parallel",)),
        cost_estimate=pl.CostEstimate(flops=flops, transcendentals=0,
                                      bytes_accessed=bytes_accessed),
    )(hid, w, b2)


# ---------------------------------------------------------------------------------
# Full forward.  The tiny image_linear+BN and the dynamic embedding gather stay in XLA.
# ---------------------------------------------------------------------------------
def caption_cnn_forward(params, features, captions, lengths):
    del lengths                                      # unused in the PyTorch forward
    B = features.shape[0]
    T = captions.shape[1]
    S = T + 1
    E = params["embed"].shape[1]
    V = params["fc2_w"].shape[1]

    # image_linear + BatchNorm1d (training-mode batch statistics, eps=1e-5).
    y = features @ params["img_w"] + params["img_b"]
    mean = jnp.mean(y, axis=0, keepdims=True)
    var = jnp.mean((y - mean) ** 2, axis=0, keepdims=True)       # biased var (PyTorch BN)
    feat = (params["bn_gamma"] * (y - mean) * jax.lax.rsqrt(var + BN_EPS)
            + params["bn_beta"])

    # Embedding gather (dynamic) + image feature placed at t = 0.
    emb = jnp.take(params["embed"], captions, axis=0)                        # (B, T, E)
    x0 = jnp.concatenate([feat[:, None, :], emb], axis=1)                    # (B, S, E)

    # Pad the time axis to a multiple of 8 so every sequence starts on an 8-sublane
    # boundary and all kernel loads/stores are unmasked; padded rows are sliced off.
    s_pad = ((S + 7) // 8) * 8
    x0 = jnp.pad(x0, ((0, 0), (0, s_pad - S), (0, 0))).reshape(B * s_pad, E)
    tpos = (jnp.arange(B * s_pad, dtype=jnp.int32) % s_pad).reshape(B * s_pad, 1)

    hid = conv_stack_fc1(x0, tpos, params["conv_w"], params["conv_b"],
                         params["fc1_w"], params["fc1_b"])                   # (B*s_pad, 512)
    logits = vocab_projection(hid, params["fc2_w"], params["fc2_b"])         # (B*s_pad, Vpad)
    return logits.reshape(B, s_pad, -1)[:, :S, :V]                           # (B, S, V)


# ---------------------------------------------------------------------------------
# Pure-JAX reference (f32 math, same bf16-rounded weight values) for a correctness check
# ---------------------------------------------------------------------------------
def reference_forward(params, features, captions, lengths):
    del lengths
    hi = jax.lax.Precision.HIGHEST
    y = features @ params["img_w"] + params["img_b"]
    mean = jnp.mean(y, axis=0, keepdims=True)
    var = jnp.mean((y - mean) ** 2, axis=0, keepdims=True)
    feat = params["bn_gamma"] * (y - mean) / jnp.sqrt(var + BN_EPS) + params["bn_beta"]
    emb = params["embed"][captions]
    x = jnp.concatenate([feat[:, None, :], emb], axis=1)                     # (B, S, E)
    B, S, E = x.shape
    conv_w = params["conv_w"].astype(jnp.float32).reshape(LAYERS, KERNEL_SIZE, E, E)
    for l, d in enumerate(DILATIONS):
        acc = jnp.zeros_like(x) + params["conv_b"][l]
        for j in range(KERNEL_SIZE):
            s = (KERNEL_SIZE - 1 - j) * d
            if s == 0:
                tap = x
            elif s >= S:
                tap = jnp.zeros_like(x)
            else:
                tap = jnp.concatenate(
                    [jnp.zeros((B, s, E), x.dtype), x[:, :S - s, :]], axis=1)
            acc = acc + jnp.einsum("bse,eo->bso", tap, conv_w[l, j], precision=hi)
        x = jax.nn.relu((acc + x) * SQRT_HALF)
    h = jax.nn.relu(jnp.einsum("bse,eh->bsh", x, params["fc1_w"].astype(jnp.float32),
                               precision=hi) + params["fc1_b"])
    return (jnp.einsum("bsh,hv->bsv", h, params["fc2_w"].astype(jnp.float32),
                       precision=hi) + params["fc2_b"])


# ---------------------------------------------------------------------------------
# Parameter init + run
# ---------------------------------------------------------------------------------
def make_params(key, feature_size, embed_size, vocab_size):
    assert embed_size == FC1_IN, "final_fc1 is hard-coded as Linear(256, 512)"
    ks = jax.random.split(key, 9)
    n = lambda k, shape, std: jax.random.normal(k, shape, jnp.float32) * std
    E = embed_size
    return {
        "embed":    n(ks[0], (vocab_size, E), 0.1),
        "img_w":    n(ks[1], (feature_size, E), feature_size ** -0.5),
        "img_b":    n(ks[2], (E,), 0.01),
        "bn_gamma": jnp.ones((E,), jnp.float32),
        "bn_beta":  jnp.zeros((E,), jnp.float32),
        # conv_w[l] = 3 effective taps stacked along rows [shift 2d | shift d | shift 0],
        # i.e. (3*E_in, E_out); matmul weights stored bf16 (weight DMA dominates).
        "conv_w":   n(ks[3], (LAYERS, KERNEL_SIZE * E, E),
                      (KERNEL_SIZE * E) ** -0.5).astype(jnp.bfloat16),
        "conv_b":   n(ks[4], (LAYERS, 1, E), 0.01),
        "fc1_w":    n(ks[5], (FC1_IN, FC1_OUT), FC1_IN ** -0.5).astype(jnp.bfloat16),
        "fc1_b":    n(ks[6], (1, FC1_OUT), 0.01),
        "fc2_w":    n(ks[7], (FC1_OUT, vocab_size), FC1_OUT ** -0.5).astype(jnp.bfloat16),
        "fc2_b":    n(ks[8], (vocab_size,), 0.01),
    }


if __name__ == "__main__":
    B, FEAT, E, V, T = 2, 16, 256, 1000, 8          # E=256 required by final_fc1 (256->512)

    key = jax.random.PRNGKey(0)
    kp, kf, kc = jax.random.split(key, 3)
    params = make_params(kp, FEAT, E, V)

    features = jax.random.normal(kf, (B, FEAT), jnp.float32)
    captions = jax.random.randint(kc, (B, T), 0, V, dtype=jnp.int32)
    lengths = jnp.full((B,), T, jnp.int32)          # unused by forward (matches PyTorch)

    fwd = jax.jit(caption_cnn_forward)
    out = jax.block_until_ready(fwd(params, features, captions, lengths))
    assert out.shape == (B, T + 1, V), out.shape    # forward returns full x (no trailing slice)

    ref = jax.block_until_ready(reference_forward(params, features, captions, lengths))
    err = float(jnp.max(jnp.abs(out - ref)))
    # bf16 MXU inputs vs f32 reference (same bf16-rounded weights): small rounding drift.
    assert jnp.allclose(out, ref, atol=1e-1, rtol=5e-2), f"max abs err {err}"

    print("KERNEL_OK")
</pallas_src>

<mosaic_0001>
module attributes {stable_mosaic.version = 11 : i64} {
  func.func @conv_fc1_kernel(%arg0: i32, %arg1: memref<32x256xf32, #tpu.memory_space<vmem>>, %arg2: memref<32x1xi32, #tpu.memory_space<vmem>>, %arg3: memref<3x768x256xbf16, #tpu.memory_space<vmem>>, %arg4: memref<3x1x256xf32, #tpu.memory_space<vmem>>, %arg5: memref<256x512xbf16, #tpu.memory_space<vmem>>, %arg6: memref<1x512xf32, #tpu.memory_space<vmem>>, %arg7: memref<32x512xf32, #tpu.memory_space<vmem>>, %arg8: memref<40x256xf32, #tpu.memory_space<vmem>>) attributes {dimension_semantics = [#tpu.dimension_semantics<arbitrary>], iteration_bounds = array<i64: 4>, scalar_prefetch = 0 : i64, scratch_operands = 1 : i64, tpu.core_type = #tpu.core_type<tc>, window_params = [{pipeline_mode = #tpu.pipeline_mode<synchronous>, transform_indices = @transform_0, window_bounds = array<i64: 32, 256>}, {pipeline_mode = #tpu.pipeline_mode<synchronous>, transform_indices = @transform_1, window_bounds = array<i64: 32, 1>}, {transform_indices = @transform_2, window_bounds = array<i64: 3, 768, 256>}, {transform_indices = @transform_3, window_bounds = array<i64: 3, 1, 256>}, {pipeline_mode = #tpu.pipeline_mode<synchronous>, transform_indices = @transform_4, window_bounds = array<i64: 256, 512>}, {pipeline_mode = #tpu.pipeline_mode<synchronous>, transform_indices = @transform_5, window_bounds = array<i64: 1, 512>}, {pipeline_mode = #tpu.pipeline_mode<synchronous>, transform_indices = @transform_6, window_bounds = array<i64: 32, 512>}]} {
    %c0_i32 = arith.constant 0 : i32
    %0 = arith.cmpi eq, %arg0, %c0_i32 : i32
    %1 = arith.extui %0 : i1 to i32
    %c0_i32_0 = arith.constant 0 : i32
    %2 = arith.cmpi ne, %1, %c0_i32_0 : i32
    scf.if %2 {
      %cst_53 = arith.constant 0.000000e+00 : f32
      %93 = vector.broadcast %cst_53 : f32 to vector<8x256xf32>
      %c0_54 = arith.constant 0 : index
      %c0_55 = arith.constant 0 : index
      %94 = vector.load %arg8[%c0_54, %c0_55] : memref<40x256xf32, #tpu.memory_space<vmem>>, vector<8x256xf32>
      tpu.vector_store %arg8[%c0_54, %c0_55], %93 {strides = array<i32>} : memref<40x256xf32, #tpu.memory_space<vmem>>, vector<8x256xf32>,
      %c0_56 = arith.constant 0 : index
      %c0_57 = arith.constant 0 : index
      %95 = vector.load %arg1[%c0_56, %c0_57] : memref<32x256xf32, #tpu.memory_space<vmem>>, vector<32x256xf32>
      %c8_58 = arith.constant 8 : index
      %c0_59 = arith.constant 0 : index
      %96 = vector.load %arg8[%c8_58, %c0_59] : memref<40x256xf32, #tpu.memory_space<vmem>>, vector<32x256xf32>
      tpu.vector_store %arg8[%c8_58, %c0_59], %95 {strides = array<i32>} : memref<40x256xf32, #tpu.memory_space<vmem>>, vector<32x256xf32>,
    } else {
    }
    %c0 = arith.constant 0 : index
    %c0_1 = arith.constant 0 : index
    %3 = vector.load %arg2[%c0, %c0_1] : memref<32x1xi32, #tpu.memory_space<vmem>>, vector<32x1xi32>
    %c1_i32 = arith.constant 1 : i32
    %4 = vector.broadcast %c1_i32 : i32 to vector<32x1xi32>
    %5 = arith.cmpi sge, %3, %4 : vector<32x1xi32>
    %c2_i32 = arith.constant 2 : i32
    %6 = vector.broadcast %c2_i32 : i32 to vector<32x1xi32>
    %7 = arith.cmpi sge, %3, %6 : vector<32x1xi32>
    %c4_i32 = arith.constant 4 : i32
    %8 = vector.broadcast %c4_i32 : i32 to vector<32x1xi32>
    %9 = arith.cmpi sge, %3, %8 : vector<32x1xi32>
    %c8_i32 = arith.constant 8 : i32
    %10 = vector.broadcast %c8_i32 : i32 to vector<32x1xi32>
    %11 = arith.cmpi sge, %3, %10 : vector<32x1xi32>
    %c8 = arith.constant 8 : index
    %c0_2 = arith.constant 0 : index
    %12 = vector.load %arg8[%c8, %c0_2] : memref<40x256xf32, #tpu.memory_space<vmem>>, vector<32x256xf32>
    %c6 = arith.constant 6 : index
    %c0_3 = arith.constant 0 : index
    %13 = vector.load %arg8[%c6, %c0_3] : memref<40x256xf32, #tpu.memory_space<vmem>>, vector<32x256xf32>
    %cst = arith.constant 0.000000e+00 : f32
    %14 = vector.shape_cast %7 : vector<32x1xi1> to vector<32x1xi1>
    %15 = vector.broadcast %14 : vector<32x1xi1> to vector<32x256xi1>
    %16 = vector.broadcast %cst : f32 to vector<32x256xf32>
    %17 = arith.select %15, %13, %16 : vector<32x256xi1>, vector<32x256xf32>
    %c7 = arith.constant 7 : index
    %c0_4 = arith.constant 0 : index
    %18 = vector.load %arg8[%c7, %c0_4] : memref<40x256xf32, #tpu.memory_space<vmem>>, vector<32x256xf32>
    %cst_5 = arith.constant 0.000000e+00 : f32
    %19 = vector.shape_cast %5 : vector<32x1xi1> to vector<32x1xi1>
    %20 = vector.broadcast %19 : vector<32x1xi1> to vector<32x256xi1>
    %21 = vector.broadcast %cst_5 : f32 to vector<32x256xf32>
    %22 = arith.select %20, %18, %21 : vector<32x256xi1>, vector<32x256xf32>
    %23 = tpu.concatenate %17, %22, %12 in 1 : vector<32x256xf32>, vector<32x256xf32>, vector<32x256xf32> -> vector<32x768xf32>
    %c0_6 = arith.constant 0 : index
    %c0_7 = arith.constant 0 : index
    %c0_8 = arith.constant 0 : index
    %24 = vector.load %arg4[%c0_6, %c0_7, %c0_8] : memref<3x1x256xf32, #tpu.memory_space<vmem>>, vector<1x1x256xf32>
    %25 = vector.shape_cast %24 : vector<1x1x256xf32> to vector<1x256xf32>
    %26 = arith.truncf %23 : vector<32x768xf32> to vector<32x768xbf16>
    %c0_9 = arith.constant 0 : index
    %c0_10 = arith.constant 0 : index
    %c0_11 = arith.constant 0 : index
    %27 = vector.load %arg3[%c0_9, %c0_10, %c0_11] : memref<3x768x256xbf16, #tpu.memory_space<vmem>>, vector<1x768x256xbf16>
    %28 = vector.shape_cast %27 : vector<1x768x256xbf16> to vector<768x256xbf16>
    %cst_12 = arith.constant dense<0.000000e+00> : vector<32x256xf32>
    %29 = tpu.matmul %26, %28, %cst_12 {dimension_numbers = #tpu.dot_dimension_numbers<[1], [0], [0], [1], [0, 0, 1, 1], [], []>} : vector<32x768xbf16>, vector<768x256xbf16>, vector<32x256xf32> -> vector<32x256xf32>
    %30 = vector.broadcast %25 : vector<1x256xf32> to vector<32x256xf32>
    %31 = arith.addf %30, %29 : vector<32x256xf32>
    %32 = arith.addf %31, %12 : vector<32x256xf32>
    %cst_13 = arith.constant 0.707106769 : f32
    %33 = vector.broadcast %cst_13 : f32 to vector<32x256xf32>
    %34 = arith.mulf %32, %33 : vector<32x256xf32>
    %cst_14 = arith.constant 0.000000e+00 : f32
    %35 = vector.broadcast %cst_14 : f32 to vector<32x256xf32>
    %36 = arith.maximumf %34, %35 : vector<32x256xf32>
    %c8_15 = arith.constant 8 : index
    %c0_16 = arith.constant 0 : index
    %37 = vector.load %arg8[%c8_15, %c0_16] : memref<40x256xf32, #tpu.memory_space<vmem>>, vector<32x256xf32>
    tpu.vector_store %arg8[%c8_15, %c0_16], %36 {strides = array<i32>} : memref<40x256xf32, #tpu.memory_space<vmem>>, vector<32x256xf32>,
    %c8_17 = arith.constant 8 : index
    %c0_18 = arith.constant 0 : index
    %38 = vector.load %arg8[%c8_17, %c0_18] : memref<40x256xf32, #tpu.memory_space<vmem>>, vector<32x256xf32>
    %c4 = arith.constant 4 : index
    %c0_19 = arith.constant 0 : index
    %39 = vector.load %arg8[%c4, %c0_19] : memref<40x256xf32, #tpu.memory_space<vmem>>, vector<32x256xf32>
    %cst_20 = arith.constant 0.000000e+00 : f32
    %40 = vector.shape_cast %9 : vector<32x1xi1> to vector<32x1xi1>
    %41 = vector.broadcast %40 : vector<32x1xi1> to vector<32x256xi1>
    %42 = vector.broadcast %cst_20 : f32 to vector<32x256xf32>
    %43 = arith.select %41, %39, %42 : vector<32x256xi1>, vector<32x256xf32>
    %c6_21 = arith.constant 6 : index
    %c0_22 = arith.constant 0 : index
    %44 = vector.load %arg8[%c6_21, %c0_22] : memref<40x256xf32, #tpu.memory_space<vmem>>, vector<32x256xf32>
    %cst_23 = arith.constant 0.000000e+00 : f32
    %45 = vector.shape_cast %7 : vector<32x1xi1> to vector<32x1xi1>
    %46 = vector.broadcast %45 : vector<32x1xi1> to vector<32x256xi1>
    %47 = vector.broadcast %cst_23 : f32 to vector<32x256xf32>
    %48 = arith.select %46, %44, %47 : vector<32x256xi1>, vector<32x256xf32>
    %49 = tpu.concatenate %43, %48, %38 in 1 : vector<32x256xf32>, vector<32x256xf32>, vector<32x256xf32> -> vector<32x768xf32>
    %c1 = arith.constant 1 : index
    %c0_24 = arith.constant 0 : index
    %c0_25 = arith.constant 0 : index
    %50 = vector.load %arg4[%c1, %c0_24, %c0_25] : memref<3x1x256xf32, #tpu.memory_space<vmem>>, vector<1x1x256xf32>
    %51 = vector.shape_cast %50 : vector<1x1x256xf32> to vector<1x256xf32>
    %52 = arith.truncf %49 : vector<32x768xf32> to vector<32x768xbf16>
    %c1_26 = arith.constant 1 : index
    %c0_27 = arith.constant 0 : index
    %c0_28 = arith.constant 0 : index
    %53 = vector.load %arg3[%c1_26, %c0_27, %c0_28] : memref<3x768x256xbf16, #tpu.memory_space<vmem>>, vector<1x768x256xbf16>
    %54 = vector.shape_cast %53 : vector<1x768x256xbf16> to vector<768x256xbf16>
    %cst_29 = arith.constant dense<0.000000e+00> : vector<32x256xf32>
    %55 = tpu.matmul %52, %54, %cst_29 {dimension_numbers = #tpu.dot_dimension_numbers<[1], [0], [0], [1], [0, 0, 1, 1], [], []>} : vector<32x768xbf16>, vector<768x256xbf16>, vector<32x256xf32> -> vector<32x256xf32>
    %56 = vector.broadcast %51 : vector<1x256xf32> to vector<32x256xf32>
    %57 = arith.addf %56, %55 : vector<32x256xf32>
    %58 = arith.addf %57, %38 : vector<32x256xf32>
    %cst_30 = arith.constant 0.707106769 : f32
    %59 = vector.broadcast %cst_30 : f32 to vector<32x256xf32>
    %60 = arith.mulf %58, %59 : vector<32x256xf32>
    %cst_31 = arith.constant 0.000000e+00 : f32
    %61 = vector.broadcast %cst_31 : f32 to vector<32x256xf32>
    %62 = arith.maximumf %60, %61 : vector<32x256xf32>
    %c8_32 = arith.constant 8 : index
    %c0_33 = arith.constant 0 : index
    %63 = vector.load %arg8[%c8_32, %c0_33] : memref<40x256xf32, #tpu.memory_space<vmem>>, vector<32x256xf32>
    tpu.vector_store %arg8[%c8_32, %c0_33], %62 {strides = array<i32>} : memref<40x256xf32, #tpu.memory_space<vmem>>, vector<32x256xf32>,
    %c8_34 = arith.constant 8 : index
    %c0_35 = arith.constant 0 : index
    %64 = vector.load %arg8[%c8_34, %c0_35] : memref<40x256xf32, #tpu.memory_space<vmem>>, vector<32x256xf32>
    %c0_36 = arith.constant 0 : index
    %c0_37 = arith.constant 0 : index
    %65 = vector.load %arg8[%c0_36, %c0_37] : memref<40x256xf32, #tpu.memory_space<vmem>>, vector<32x256xf32>
    %cst_38 = arith.constant 0.000000e+00 : f32
    %66 = vector.shape_cast %11 : vector<32x1xi1> to vector<32x1xi1>
    %67 = vector.broadcast %66 : vector<32x1xi1> to vector<32x256xi1>
    %68 = vector.broadcast %cst_38 : f32 to vector<32x256xf32>
    %69 = arith.select %67, %65, %68 : vector<32x256xi1>, vector<32x256xf32>
    %c4_39 = arith.constant 4 : index
    %c0_40 = arith.constant 0 : index
    %70 = vector.load %arg8[%c4_39, %c0_40] : memref<40x256xf32, #tpu.memory_space<vmem>>, vector<32x256xf32>
    %cst_41 = arith.constant 0.000000e+00 : f32
    %71 = vector.shape_cast %9 : vector<32x1xi1> to vector<32x1xi1>
    %72 = vector.broadcast %71 : vector<32x1xi1> to vector<32x256xi1>
    %73 = vector.broadcast %cst_41 : f32 to vector<32x256xf32>
    %74 = arith.select %72, %70, %73 : vector<32x256xi1>, vector<32x256xf32>
    %75 = tpu.concatenate %69, %74, %64 in 1 : vector<32x256xf32>, vector<32x256xf32>, vector<32x256xf32> -> vector<32x768xf32>
    %c2 = arith.constant 2 : index
    %c0_42 = arith.constant 0 : index
    %c0_43 = arith.constant 0 : index
    %76 = vector.load %arg4[%c2, %c0_42, %c0_43] : memref<3x1x256xf32, #tpu.memory_space<vmem>>, vector<1x1x256xf32>
    %77 = vector.shape_cast %76 : vector<1x1x256xf32> to vector<1x256xf32>
    %78 = arith.truncf %75 : vector<32x768xf32> to vector<32x768xbf16>
    %c2_44 = arith.constant 2 : index
    %c0_45 = arith.constant 0 : index
    %c0_46 = arith.constant 0 : index
    %79 = vector.load %arg3[%c2_44, %c0_45, %c0_46] : memref<3x768x256xbf16, #tpu.memory_space<vmem>>, vector<1x768x256xbf16>
    %80 = vector.shape_cast %79 : vector<1x768x256xbf16> to vector<768x256xbf16>
    %cst_47 = arith.constant dense<0.000000e+00> : vector<32x256xf32>
    %81 = tpu.matmul %78, %80, %cst_47 {dimension_numbers = #tpu.dot_dimension_numbers<[1], [0], [0], [1], [0, 0, 1, 1], [], []>} : vector<32x768xbf16>, vector<768x256xbf16>, vector<32x256xf32> -> vector<32x256xf32>
    %82 = vector.broadcast %77 : vector<1x256xf32> to vector<32x256xf32>
    %83 = arith.addf %82, %81 : vector<32x256xf32>
    %84 = arith.addf %83, %64 : vector<32x256xf32>
    %cst_48 = arith.constant 0.707106769 : f32
    %85 = vector.broadcast %cst_48 : f32 to vector<32x256xf32>
    %86 = arith.mulf %84, %85 : vector<32x256xf32>
    %cst_49 = arith.constant 0.000000e+00 : f32
    %87 = vector.broadcast %cst_49 : f32 to vector<32x256xf32>
    %88 = arith.maximumf %86, %87 : vector<32x256xf32>
    %c8_50 = arith.constant 8 : index
    %c0_51 = arith.constant 0 : index
    %89 = vector.load %arg8[%c8_50, %c0_51] : memref<40x256xf32, #tpu.memory_space<vmem>>, vector<32x256xf32>
    tpu.vector_store %arg8[%c8_50, %c0_51], %88 {strides = array<i32>} : memref<40x256xf32, #tpu.memory_space<vmem>>, vector<32x256xf32>,
    %c3_i32 = arith.constant 3 : i32
    %90 = arith.cmpi eq, %arg0, %c3_i32 : i32
    %91 = arith.extui %90 : i1 to i32
    %c0_i32_52 = arith.constant 0 : i32
    %92 = arith.cmpi ne, %91, %c0_i32_52 : i32
    scf.if %92 {
      %c8_53 = arith.constant 8 : index
      %c0_54 = arith.constant 0 : index
      %93 = vector.load %arg8[%c8_53, %c0_54] : memref<40x256xf32, #tpu.memory_space<vmem>>, vector<32x256xf32>
      %94 = arith.truncf %93 : vector<32x256xf32> to vector<32x256xbf16>
      %c0_55 = arith.constant 0 : index
      %c0_56 = arith.constant 0 : index
      %95 = vector.load %arg5[%c0_55, %c0_56] : memref<256x512xbf16, #tpu.memory_space<vmem>>, vector<256x512xbf16>
      %cst_57 = arith.constant dense<0.000000e+00> : vector<32x512xf32>
      %96 = tpu.matmul %94, %95, %cst_57 {dimension_numbers = #tpu.dot_dimension_numbers<[1], [0], [0], [1], [0, 0, 1, 1], [], []>} : vector<32x256xbf16>, vector<256x512xbf16>, vector<32x512xf32> -> vector<32x512xf32>
      %c0_58 = arith.constant 0 : index
      %c0_59 = arith.constant 0 : index
      %97 = vector.load %arg6[%c0_58, %c0_59] : memref<1x512xf32, #tpu.memory_space<vmem>>, vector<1x512xf32>
      %98 = vector.broadcast %97 : vector<1x512xf32> to vector<32x512xf32>
      %99 = arith.addf %96, %98 : vector<32x512xf32>
      %cst_60 = arith.constant 0.000000e+00 : f32
      %100 = vector.broadcast %cst_60 : f32 to vector<32x512xf32>
      %101 = arith.maximumf %99, %100 : vector<32x512xf32>
      %c0_61 = arith.constant 0 : index
      %c0_62 = arith.constant 0 : index
      %102 = vector.load %arg7[%c0_61, %c0_62] : memref<32x512xf32, #tpu.memory_space<vmem>>, vector<32x512xf32>
      tpu.vector_store %arg7[%c0_61, %c0_62], %101 {strides = array<i32>} : memref<32x512xf32, #tpu.memory_space<vmem>>, vector<32x512xf32>,
    } else {
    }
    return
  }
  func.func @transform_0(%arg0: i32) -> (i32, i32) {
    %c0_i32 = arith.constant 0 : i32
    %c0_i32_0 = arith.constant 0 : i32
    %c0_i32_1 = arith.constant 0 : i32
    return %c0_i32, %c0_i32_0 : i32, i32
  }
  func.func @transform_1(%arg0: i32) -> (i32, i32) {
    %c0_i32 = arith.constant 0 : i32
    %c0_i32_0 = arith.constant 0 : i32
    %c0_i32_1 = arith.constant 0 : i32
    return %c0_i32, %c0_i32_0 : i32, i32
  }
  func.func @transform_2(%arg0: i32) -> (i32, i32, i32) {
    %c0_i32 = arith.constant 0 : i32
    %c0_i32_0 = arith.constant 0 : i32
    %c0_i32_1 = arith.constant 0 : i32
    return %arg0, %c0_i32, %c0_i32_0 : i32, i32, i32
  }
  func.func @transform_3(%arg0: i32) -> (i32, i32, i32) {
    %c0_i32 = arith.constant 0 : i32
    %c0_i32_0 = arith.constant 0 : i32
    %c0_i32_1 = arith.constant 0 : i32
    return %arg0, %c0_i32, %c0_i32_0 : i32, i32, i32
  }
  func.func @transform_4(%arg0: i32) -> (i32, i32) {
    %c0_i32 = arith.constant 0 : i32
    %c0_i32_0 = arith.constant 0 : i32
    %c0_i32_1 = arith.constant 0 : i32
    return %c0_i32, %c0_i32_0 : i32, i32
  }
  func.func @transform_5(%arg0: i32) -> (i32, i32) {
    %c0_i32 = arith.constant 0 : i32
    %c0_i32_0 = arith.constant 0 : i32
    %c0_i32_1 = arith.constant 0 : i32
    return %c0_i32, %c0_i32_0 : i32, i32
  }
  func.func @transform_6(%arg0: i32) -> (i32, i32) {
    %c0_i32 = arith.constant 0 : i32
    %c0_i32_0 = arith.constant 0 : i32
    %c0_i32_1 = arith.constant 0 : i32
    return %c0_i32, %c0_i32_0 : i32, i32
  }
}

module attributes {stable_mosaic.version = 11 : i64} {
  func.func @fc2_kernel(%arg0: i32, %arg1: memref<32x512xf32, #tpu.memory_space<vmem>>, %arg2: memref<512x512xbf16, #tpu.memory_space<vmem>>, %arg3: memref<1x512xf32, #tpu.memory_space<vmem>>, %arg4: memref<32x512xf32, #tpu.memory_space<vmem>>) attributes {dimension_semantics = [#tpu.dimension_semantics<parallel>], iteration_bounds = array<i64: 2>, scalar_prefetch = 0 : i64, scratch_operands = 0 : i64, tpu.core_type = #tpu.core_type<tc>, window_params = [{pipeline_mode = #tpu.pipeline_mode<synchronous>, transform_indices = @transform_0, window_bounds = array<i64: 32, 512>}, {transform_indices = @transform_1, window_bounds = array<i64: 512, 512>}, {transform_indices = @transform_2, window_bounds = array<i64: 1, 512>}, {transform_indices = @transform_3, window_bounds = array<i64: 32, 512>}]} {
    %c0 = arith.constant 0 : index
    %c0_0 = arith.constant 0 : index
    %0 = vector.load %arg1[%c0, %c0_0] : memref<32x512xf32, #tpu.memory_space<vmem>>, vector<32x512xf32>
    %1 = arith.truncf %0 : vector<32x512xf32> to vector<32x512xbf16>
    %c0_1 = arith.constant 0 : index
    %c0_2 = arith.constant 0 : index
    %2 = vector.load %arg2[%c0_1, %c0_2] : memref<512x512xbf16, #tpu.memory_space<vmem>>, vector<512x512xbf16>
    %cst = arith.constant dense<0.000000e+00> : vector<32x512xf32>
    %3 = tpu.matmul %1, %2, %cst {dimension_numbers = #tpu.dot_dimension_numbers<[1], [0], [0], [1], [0, 0, 1, 1], [], []>} : vector<32x512xbf16>, vector<512x512xbf16>, vector<32x512xf32> -> vector<32x512xf32>
    %c0_3 = arith.constant 0 : index
    %c0_4 = arith.constant 0 : index
    %4 = vector.load %arg3[%c0_3, %c0_4] : memref<1x512xf32, #tpu.memory_space<vmem>>, vector<1x512xf32>
    %5 = vector.broadcast %4 : vector<1x512xf32> to vector<32x512xf32>
    %6 = arith.addf %3, %5 : vector<32x512xf32>
    %c0_5 = arith.constant 0 : index
    %c0_6 = arith.constant 0 : index
    %7 = vector.load %arg4[%c0_5, %c0_6] : memref<32x512xf32, #tpu.memory_space<vmem>>, vector<32x512xf32>
    tpu.vector_store %arg4[%c0_5, %c0_6], %6 {strides = array<i32>} : memref<32x512xf32, #tpu.memory_space<vmem>>, vector<32x512xf32>,
    return
  }
  func.func @transform_0(%arg0: i32) -> (i32, i32) {
    %c0_i32 = arith.constant 0 : i32
    %c0_i32_0 = arith.constant 0 : i32
    %c0_i32_1 = arith.constant 0 : i32
    return %c0_i32, %c0_i32_0 : i32, i32
  }
  func.func @transform_1(%arg0: i32) -> (i32, i32) {
    %c0_i32 = arith.constant 0 : i32
    %c0_i32_0 = arith.constant 0 : i32
    return %c0_i32, %arg0 : i32, i32
  }
  func.func @transform_2(%arg0: i32) -> (i32, i32) {
    %c0_i32 = arith.constant 0 : i32
    %c0_i32_0 = arith.constant 0 : i32
    return %c0_i32, %arg0 : i32, i32
  }
  func.func @transform_3(%arg0: i32) -> (i32, i32) {
    %c0_i32 = arith.constant 0 : i32
    %c0_i32_0 = arith.constant 0 : i32
    return %c0_i32, %arg0 : i32, i32
  }
}

</mosaic_0001>

<bundles_post_ra>
// kernel: caption_cnn_forward.3
= control target key start
LH: loop header
LB: loop body
LE: loop exit
PB: predicated region body
PF: predicated region fallthrough
CT: control target
= control target key end

     0   :  { %s2062_s12 = smov 0   ;;  %s2064_s13 = smov 0   ;;  %s2602_s0 = inlined_call_operand.vmem [shape: f32[32,512], index: 0, kind: input, shape index: {}]   ;;  %s2603_s1 = inlined_call_operand.vmem [shape: bf16[512,1024], index: 1, kind: input, shape index: {}]   ;;  %s2604_s2 = inlined_call_operand.vmem [shape: f32[1,1024], index: 2, kind: input, shape index: {}]   ;;  %s2605_s3 = inlined_call_operand.vmem [shape: f32[32,1024], index: 3, kind: output, shape index: {}]  }
   0x1   :  { %s2066_s14 = smov 0  }
   0x2 LB: > { %s2078_s15 = sadd.s32 4294967295, %s2040_s14   ;;  %s2081_s16 = sadd.s32 1, %s2040_s14   ;;  %s2040_s14 = sphi %s2066_s14, %s2609_s14   ;;  %s2036_s13 = sphi %s2064_s13, %s2608_s13   ;;  %s2032_s12 = sphi %s2062_s12, %s2607_s12  }
   0x3   : > { %s38_s17 = ssub.s32 %s2040_s14, %s2081_s16  ;;  %s41_s18 = sadd.s32 1, %s2036_s13 }
   0x4   : > { %p39_p0 = scmp.eq.s32.totalorder %s38_s17, 0  ;;  %p48_p1 = scmp.ne.s32.totalorder %s2036_s13, %s2032_s12 }
   0x5   : > { %p49_p2 = scmp.eq.s32.totalorder %s2040_s14, 0  ;;  %p104_p3 = scmp.eq.s32.totalorder %s2078_s15, 1 }
   0x6   : > { %s2091_s19 = scalar_select %p39_p0, %s2036_s13, %s41_s18  }
   0x7   : > { %p50_p4 = por %p49_p2, %p48_p1  ;;  %p2093_p5 = por %p104_p3, %p48_p1 }
   0x8   : > { %p1627_p6 = scmp.ge.s32.totalorder %s2040_s14, 2 }
   0xa   : > { %129 = sbr.rel (%p1627_p6) target bundleno = 85 (0x55), region = 20 }
  0x11   : > { %132 = sbr.rel (!%p50_p4) target bundleno = 85 (0x55), region = 24  ;;  %s134_s21 = sand.u32 (%p50_p4), 1, %s2036_s13  }
  0x12   : > { %s1768_s22 = sshll.u32 (%p50_p4), %s2040_s14, 4  ;;  %s1628_s23 = sshll.u32 (%p50_p4), %s134_s21, 10 }
  0x13   : > { %s2103_s26 = scalar_lea.vmem (%p50_p4), %s2603_s1, %s1768_s22  ;;  %s2108_s27 = scalar_lea.vmem (%p50_p4), [#allocation2], %s1628_s23 }
  0x14   : > { %v152_v0 = vld [vmem:[%s2103_s26] sm:$0xff] (%p50_p4)  ;;  %v154_v1 = vld [vmem:[%s2103_s26 + $0x8] sm:$0xff] (%p50_p4) }
  0x15   : > { %v156_v2 = vld [vmem:[%s2103_s26 + $0x20] sm:$0xff] (%p50_p4)  ;;  %153 = vst [vmem:[%s2108_s27] sm:$0xff] (%p50_p4), %v152_v0  ;;  %155 = vst [vmem:[%s2108_s27 + $0x8] sm:$0xff] (%p50_p4), %v154_v1  ;;  %v158_v3 = vld [vmem:[%s2103_s26 + $0x28] sm:$0xff] (%p50_p4) }
  0x16   : > { %157 = vst [vmem:[%s2108_s27 + $0x10] sm:$0xff] (%p50_p4), %v156_v2  ;;  %v160_v4 = vld [vmem:[%s2103_s26 + $0x40] sm:$0xff] (%p50_p4)  ;;  %v162_v5 = vld [vmem:[%s2103_s26 + $0x48] sm:$0xff] (%p50_p4)  ;;  %159 = vst [vmem:[%s2108_s27 + $0x18] sm:$0xff] (%p50_p4), %v158_v3 }
  0x17   : > { %161 = vst [vmem:[%s2108_s27 + $0x20] sm:$0xff] (%p50_p4), %v160_v4  ;;  %163 = vst [vmem:[%s2108_s27 + $0x28] sm:$0xff] (%p50_p4), %v162_v5  ;;  %v164_v6 = vld [vmem:[%s2103_s26 + $0x60] sm:$0xff] (%p50_p4)  ;;  %v166_v7 = vld [vmem:[%s2103_s26 + $0x68] sm:$0xff] (%p50_p4) }
  0x18   : > { %v168_v8 = vld [vmem:[%s2103_s26 + $0x80] sm:$0xff]  ;;  %165 = vst [vmem:[%s2108_s27 + $0x30] sm:$0xff] %v164_v6  ;;  %167 = vst [vmem:[%s2108_s27 + $0x38] sm:$0xff] %v166_v7  ;;  %v170_v9 = vld [vmem:[%s2103_s26 + $0x88] sm:$0xff] }
  0x19   : > { %169 = vst [vmem:[%s2108_s27 + $0x40] sm:$0xff] %v168_v8  ;;  %v172_v10 = vld [vmem:[%s2103_s26 + $0xa0] sm:$0xff]  ;;  %v174_v11 = vld [vmem:[%s2103_s26 + $0xa8] sm:$0xff]  ;;  %171 = vst [vmem:[%s2108_s27 + $0x48] sm:$0xff] %v170_v9 }
  0x1a   : > { %173 = vst [vmem:[%s2108_s27 + $0x50] sm:$0xff] %v172_v10  ;;  %175 = vst [vmem:[%s2108_s27 + $0x58] sm:$0xff] %v174_v11  ;;  %v176_v12 = vld [vmem:[%s2103_s26 + $0xc0] sm:$0xff]  ;;  %v178_v13 = vld [vmem:[%s2103_s26 + $0xc8] sm:$0xff] }
  0x1b   : > { %v180_v14 = vld [vmem:[%s2103_s26 + $0xe0] sm:$0xff]  ;;  %177 = vst [vmem:[%s2108_s27 + $0x60] sm:$0xff] %v176_v12  ;;  %179 = vst [vmem:[%s2108_s27 + $0x68] sm:$0xff] %v178_v13  ;;  %v182_v15 = vld [vmem:[%s2103_s26 + $0xe8] sm:$0xff] }
  0x1c   : > { %181 = vst [vmem:[%s2108_s27 + $0x70] sm:$0xff] %v180_v14  ;;  %v184_v16 = vld [vmem:[%s2103_s26 + $0x100] sm:$0xff]  ;;  %v186_v17 = vld [vmem:[%s2103_s26 + $0x108] sm:$0xff]  ;;  %183 = vst [vmem:[%s2108_s27 + $0x78] sm:$0xff] %v182_v15 }
  0x1d   : > { %185 = vst [vmem:[%s2108_s27 + $0x80] sm:$0xff] %v184_v16  ;;  %187 = vst [vmem:[%s2108_s27 + $0x88] sm:$0xff] %v186_v17  ;;  %v188_v18 = vld [vmem:[%s2103_s26 + $0x120] sm:$0xff]  ;;  %v190_v19 = vld [vmem:[%s2103_s26 + $0x128] sm:$0xff] }
  0x1e   : > { %v192_v20 = vld [vmem:[%s2103_s26 + $0x140] sm:$0xff]  ;;  %189 = vst [vmem:[%s2108_s27 + $0x90] sm:$0xff] %v188_v18  ;;  %191 = vst [vmem:[%s2108_s27 + $0x98] sm:$0xff] %v190_v19  ;;  %v194_v21 = vld [vmem:[%s2103_s26 + $0x148] sm:$0xff] }
  0x1f   : > { %193 = vst [vmem:[%s2108_s27 + $0xa0] sm:$0xff] %v192_v20  ;;  %v196_v22 = vld [vmem:[%s2103_s26 + $0x160] sm:$0xff]  ;;  %v198_v23 = vld [vmem:[%s2103_s26 + $0x168] sm:$0xff]  ;;  %195 = vst [vmem:[%s2108_s27 + $0xa8] sm:$0xff] %v194_v21 }
  0x20   : > { %197 = vst [vmem:[%s2108_s27 + $0xb0] sm:$0xff] %v196_v22  ;;  %199 = vst [vmem:[%s2108_s27 + $0xb8] sm:$0xff] %v198_v23  ;;  %v200_v24 = vld [vmem:[%s2103_s26 + $0x180] sm:$0xff]  ;;  %v202_v25 = vld [vmem:[%s2103_s26 + $0x188] sm:$0xff] }
  0x21   : > { %v204_v26 = vld [vmem:[%s2103_s26 + $0x1a0] sm:$0xff]  ;;  %201 = vst [vmem:[%s2108_s27 + $0xc0] sm:$0xff] %v200_v24  ;;  %203 = vst [vmem:[%s2108_s27 + $0xc8] sm:$0xff] %v202_v25  ;;  %v206_v27 = vld [vmem:[%s2103_s26 + $0x1a8] sm:$0xff] }
  0x22   : > { %205 = vst [vmem:[%s2108_s27 + $0xd0] sm:$0xff] %v204_v26  ;;  %v208_v28 = vld [vmem:[%s2103_s26 + $0x1c0] sm:$0xff]  ;;  %v210_v29 = vld [vmem:[%s2103_s26 + $0x1c8] sm:$0xff]  ;;  %207 = vst [vmem:[%s2108_s27 + $0xd8] sm:$0xff] %v206_v27 }
  0x23   : > { %209 = vst [vmem:[%s2108_s27 + $0xe0] sm:$0xff] %v208_v28  ;;  %211 = vst [vmem:[%s2108_s27 + $0xe8] sm:$0xff] %v210_v29  ;;  %v212_v30 = vld [vmem:[%s2103_s26 + $0x1e0] sm:$0xff]  ;;  %v214_v31 = vld [vmem:[%s2103_s26 + $0x1e8] sm:$0xff] }
  0x24   : > { %v216_v32 = vld [vmem:[%s2103_s26 + $0x200] sm:$0xff]  ;;  %213 = vst [vmem:[%s2108_s27 + $0xf0] sm:$0xff] %v212_v30  ;;  %215 = vst [vmem:[%s2108_s27 + $0xf8] sm:$0xff] %v214_v31  ;;  %v218_v33 = vld [vmem:[%s2103_s26 + $0x208] sm:$0xff] }
  0x25   : > { %217 = vst [vmem:[%s2108_s27 + $0x100] sm:$0xff] %v216_v32  ;;  %v220_v34 = vld [vmem:[%s2103_s26 + $0x220] sm:$0xff]  ;;  %v222_v35 = vld [vmem:[%s2103_s26 + $0x228] sm:$0xff]  ;;  %219 = vst [vmem:[%s2108_s27 + $0x108] sm:$0xff] %v218_v33 }
  0x26   : > { %221 = vst [vmem:[%s2108_s27 + $0x110] sm:$0xff] %v220_v34  ;;  %223 = vst [vmem:[%s2108_s27 + $0x118] sm:$0xff] %v222_v35  ;;  %v224_v36 = vld [vmem:[%s2103_s26 + $0x240] sm:$0xff]  ;;  %v226_v37 = vld [vmem:[%s2103_s26 + $0x248] sm:$0xff] }
  0x27   : > { %v228_v38 = vld [vmem:[%s2103_s26 + $0x260] sm:$0xff]  ;;  %225 = vst [vmem:[%s2108_s27 + $0x120] sm:$0xff] %v224_v36  ;;  %227 = vst [vmem:[%s2108_s27 + $0x128] sm:$0xff] %v226_v37  ;;  %v230_v39 = vld [vmem:[%s2103_s26 + $0x268] sm:$0xff] }
  0x28   : > { %229 = vst [vmem:[%s2108_s27 + $0x130] sm:$0xff] %v228_v38  ;;  %v232_v40 = vld [vmem:[%s2103_s26 + $0x280] sm:$0xff]  ;;  %v234_v41 = vld [vmem:[%s2103_s26 + $0x288] sm:$0xff]  ;;  %231 = vst [vmem:[%s2108_s27 + $0x138] sm:$0xff] %v230_v39 }
  0x29   : > { %233 = vst [vmem:[%s2108_s27 + $0x140] sm:$0xff] %v232_v40  ;;  %235 = vst [vmem:[%s2108_s27 + $0x148] sm:$0xff] %v234_v41  ;;  %v236_v42 = vld [vmem:[%s2103_s26 + $0x2a0] sm:$0xff]  ;;  %v238_v43 = vld [vmem:[%s2103_s26 + $0x2a8] sm:$0xff] }
  0x2a   : > { %v240_v44 = vld [vmem:[%s2103_s26 + $0x2c0] sm:$0xff]  ;;  %237 = vst [vmem:[%s2108_s27 + $0x150] sm:$0xff] %v236_v42  ;;  %239 = vst [vmem:[%s2108_s27 + $0x158] sm:$0xff] %v238_v43  ;;  %v242_v45 = vld [vmem:[%s2103_s26 + $0x2c8] sm:$0xff] }
  0x2b   : > { %241 = vst [vmem:[%s2108_s27 + $0x160] sm:$0xff] %v240_v44  ;;  %v244_v46 = vld [vmem:[%s2103_s26 + $0x2e0] sm:$0xff]  ;;  %v246_v47 = vld [vmem:[%s2103_s26 + $0x2e8] sm:$0xff]  ;;  %243 = vst [vmem:[%s2108_s27 + $0x168] sm:$0xff] %v242_v45 }
  0x2c   : > { %245 = vst [vmem:[%s2108_s27 + $0x170] sm:$0xff] %v244_v46  ;;  %247 = vst [vmem:[%s2108_s27 + $0x178] sm:$0xff] %v246_v47  ;;  %v248_v48 = vld [vmem:[%s2103_s26 + $0x300] sm:$0xff]  ;;  %v250_v49 = vld [vmem:[%s2103_s26 + $0x308] sm:$0xff] }
  0x2d   : > { %v252_v50 = vld [vmem:[%s2103_s26 + $0x320] sm:$0xff]  ;;  %249 = vst [vmem:[%s2108_s27 + $0x180] sm:$0xff] %v248_v48  ;;  %251 = vst [vmem:[%s2108_s27 + $0x188] sm:$0xff] %v250_v49  ;;  %v254_v51 = vld [vmem:[%s2103_s26 + $0x328] sm:$0xff] }
  0x2e   : > { %253 = vst [vmem:[%s2108_s27 + $0x190] sm:$0xff] %v252_v50  ;;  %v256_v52 = vld [vmem:[%s2103_s26 + $0x340] sm:$0xff]  ;;  %v258_v53 = vld [vmem:[%s2103_s26 + $0x348] sm:$0xff]  ;;  %255 = vst [vmem:[%s2108_s27 + $0x198] sm:$0xff] %v254_v51 }
  0x2f   : > { %257 = vst [vmem:[%s2108_s27 + $0x1a0] sm:$0xff] %v256_v52  ;;  %259 = vst [vmem:[%s2108_s27 + $0x1a8] sm:$0xff] %v258_v53  ;;  %v260_v54 = vld [vmem:[%s2103_s26 + $0x360] sm:$0xff]  ;;  %v262_v55 = vld [vmem:[%s2103_s26 + $0x368] sm:$0xff] }
  0x30   : > { %v264_v56 = vld [vmem:[%s2103_s26 + $0x380] sm:$0xff]  ;;  %261 = vst [vmem:[%s2108_s27 + $0x1b0] sm:$0xff] %v260_v54  ;;  %263 = vst [vmem:[%s2108_s27 + $0x1b8] sm:$0xff] %v262_v55  ;;  %v266_v57 = vld [vmem:[%s2103_s26 + $0x388] sm:$0xff] }
  0x31   : > { %265 = vst [vmem:[%s2108_s27 + $0x1c0] sm:$0xff] %v264_v56  ;;  %v268_v58 = vld [vmem:[%s2103_s26 + $0x3a0] sm:$0xff]  ;;  %v270_v59 = vld [vmem:[%s2103_s26 + $0x3a8] sm:$0xff]  ;;  %267 = vst [vmem:[%s2108_s27 + $0x1c8] sm:$0xff] %v266_v57 }
  0x32   : > { %269 = vst [vmem:[%s2108_s27 + $0x1d0] sm:$0xff] %v268_v58  ;;  %271 = vst [vmem:[%s2108_s27 + $0x1d8] sm:$0xff] %v270_v59  ;;  %v272_v60 = vld [vmem:[%s2103_s26 + $0x3c0] sm:$0xff]  ;;  %v274_v61 = vld [vmem:[%s2103_s26 + $0x3c8] sm:$0xff] }
  0x33   : > { %v276_v62 = vld [vmem:[%s2103_s26 + $0x3e0] sm:$0xff]  ;;  %273 = vst [vmem:[%s2108_s27 + $0x1e0] sm:$0xff] %v272_v60  ;;  %275 = vst [vmem:[%s2108_s27 + $0x1e8] sm:$0xff] %v274_v61  ;;  %v278_v63 = vld [vmem:[%s2103_s26 + $0x3e8] sm:$0xff] }
  0x34   : > { %277 = vst [vmem:[%s2108_s27 + $0x1f0] sm:$0xff] %v276_v62  ;;  %v280_v0 = vld [vmem:[%s2103_s26 + $0x400] sm:$0xff]  ;;  %v282_v1 = vld [vmem:[%s2103_s26 + $0x408] sm:$0xff]  ;;  %279 = vst [vmem:[%s2108_s27 + $0x1f8] sm:$0xff] %v278_v63 }
  0x35   : > { %281 = vst [vmem:[%s2108_s27 + $0x200] sm:$0xff] %v280_v0  ;;  %283 = vst [vmem:[%s2108_s27 + $0x208] sm:$0xff] %v282_v1  ;;  %v284_v2 = vld [vmem:[%s2103_s26 + $0x420] sm:$0xff]  ;;  %v286_v3 = vld [vmem:[%s2103_s26 + $0x428] sm:$0xff] }
  0x36   : > { %v288_v4 = vld [vmem:[%s2103_s26 + $0x440] sm:$0xff]  ;;  %285 = vst [vmem:[%s2108_s27 + $0x210] sm:$0xff] %v284_v2  ;;  %287 = vst [vmem:[%s2108_s27 + $0x218] sm:$0xff] %v286_v3  ;;  %v290_v5 = vld [vmem:[%s2103_s26 + $0x448] sm:$0xff] }
  0x37   : > { %289 = vst [vmem:[%s2108_s27 + $0x220] sm:$0xff] %v288_v4  ;;  %v292_v6 = vld [vmem:[%s2103_s26 + $0x460] sm:$0xff]  ;;  %v294_v7 = vld [vmem:[%s2103_s26 + $0x468] sm:$0xff]  ;;  %291 = vst [vmem:[%s2108_s27 + $0x228] sm:$0xff] %v290_v5 }
  0x38   : > { %293 = vst [vmem:[%s2108_s27 + $0x230] sm:$0xff] %v292_v6  ;;  %295 = vst [vmem:[%s2108_s27 + $0x238] sm:$0xff] %v294_v7  ;;  %v296_v8 = vld [vmem:[%s2103_s26 + $0x480] sm:$0xff]  ;;  %v298_v9 = vld [vmem:[%s2103_s26 + $0x488] sm:$0xff] }
  0x39   : > { %v300_v10 = vld [vmem:[%s2103_s26 + $0x4a0] sm:$0xff]  ;;  %297 = vst [vmem:[%s2108_s27 + $0x240] sm:$0xff] %v296_v8  ;;  %299 = vst [vmem:[%s2108_s27 + $0x248] sm:$0xff] %v298_v9  ;;  %v302_v11 = vld [vmem:[%s2103_s26 + $0x4a8] sm:$0xff] }
  0x3a   : > { %301 = vst [vmem:[%s2108_s27 + $0x250] sm:$0xff] %v300_v10  ;;  %v304_v12 = vld [vmem:[%s2103_s26 + $0x4c0] sm:$0xff]  ;;  %v306_v13 = vld [vmem:[%s2103_s26 + $0x4c8] sm:$0xff]  ;;  %303 = vst [vmem:[%s2108_s27 + $0x258] sm:$0xff] %v302_v11 }
  0x3b   : > { %305 = vst [vmem:[%s2108_s27 + $0x260] sm:$0xff] %v304_v12  ;;  %307 = vst [vmem:[%s2108_s27 + $0x268] sm:$0xff] %v306_v13  ;;  %v308_v14 = vld [vmem:[%s2103_s26 + $0x4e0] sm:$0xff]  ;;  %v310_v15 = vld [vmem:[%s2103_s26 + $0x4e8] sm:$0xff] }
  0x3c   : > { %v312_v16 = vld [vmem:[%s2103_s26 + $0x500] sm:$0xff]  ;;  %309 = vst [vmem:[%s2108_s27 + $0x270] sm:$0xff] %v308_v14  ;;  %311 = vst [vmem:[%s2108_s27 + $0x278] sm:$0xff] %v310_v15  ;;  %v314_v17 = vld [vmem:[%s2103_s26 + $0x508] sm:$0xff] }
  0x3d   : > { %313 = vst [vmem:[%s2108_s27 + $0x280] sm:$0xff] %v312_v16  ;;  %v316_v18 = vld [vmem:[%s2103_s26 + $0x520] sm:$0xff]  ;;  %v318_v19 = vld [vmem:[%s2103_s26 + $0x528] sm:$0xff]  ;;  %315 = vst [vmem:[%s2108_s27 + $0x288] sm:$0xff] %v314_v17 }
  0x3e   : > { %317 = vst [vmem:[%s2108_s27 + $0x290] sm:$0xff] %v316_v18  ;;  %319 = vst [vmem:[%s2108_s27 + $0x298] sm:$0xff] %v318_v19  ;;  %v320_v20 = vld [vmem:[%s2103_s26 + $0x540] sm:$0xff]  ;;  %v322_v21 = vld [vmem:[%s2103_s26 + $0x548] sm:$0xff] }
  0x3f   : > { %v324_v22 = vld [vmem:[%s2103_s26 + $0x560] sm:$0xff]  ;;  %321 = vst [vmem:[%s2108_s27 + $0x2a0] sm:$0xff] %v320_v20  ;;  %323 = vst [vmem:[%s2108_s27 + $0x2a8] sm:$0xff] %v322_v21  ;;  %v326_v23 = vld [vmem:[%s2103_s26 + $0x568] sm:$0xff] }
  0x40   : > { %325 = vst [vmem:[%s2108_s27 + $0x2b0] sm:$0xff] %v324_v22  ;;  %v328_v24 = vld [vmem:[%s2103_s26 + $0x580] sm:$0xff]  ;;  %v330_v25 = vld [vmem:[%s2103_s26 + $0x588] sm:$0xff]  ;;  %327 = vst [vmem:[%s2108_s27 + $0x2b8] sm:$0xff] %v326_v23 }
  0x41   : > { %329 = vst [vmem:[%s2108_s27 + $0x2c0] sm:$0xff] %v328_v24  ;;  %331 = vst [vmem:[%s2108_s27 + $0x2c8] sm:$0xff] %v330_v25  ;;  %v332_v26 = vld [vmem:[%s2103_s26 + $0x5a0] sm:$0xff]  ;;  %v334_v27 = vld [vmem:[%s2103_s26 + $0x5a8] sm:$0xff] }
  0x42   : > { %v336_v28 = vld [vmem:[%s2103_s26 + $0x5c0] sm:$0xff]  ;;  %333 = vst [vmem:[%s2108_s27 + $0x2d0] sm:$0xff] %v332_v26  ;;  %335 = vst [vmem:[%s2108_s27 + $0x2d8] sm:$0xff] %v334_v27  ;;  %v338_v29 = vld [vmem:[%s2103_s26 + $0x5c8] sm:$0xff] }
  0x43   : > { %337 = vst [vmem:[%s2108_s27 + $0x2e0] sm:$0xff] %v336_v28  ;;  %v340_v30 = vld [vmem:[%s2103_s26 + $0x5e0] sm:$0xff]  ;;  %v342_v31 = vld [vmem:[%s2103_s26 + $0x5e8] sm:$0xff]  ;;  %339 = vst [vmem:[%s2108_s27 + $0x2e8] sm:$0xff] %v338_v29 }
  0x44   : > { %341 = vst [vmem:[%s2108_s27 + $0x2f0] sm:$0xff] %v340_v30  ;;  %343 = vst [vmem:[%s2108_s27 + $0x2f8] sm:$0xff] %v342_v31  ;;  %v344_v32 = vld [vmem:[%s2103_s26 + $0x600] sm:$0xff]  ;;  %v346_v33 = vld [vmem:[%s2103_s26 + $0x608] sm:$0xff] }
  0x45   : > { %v348_v34 = vld [vmem:[%s2103_s26 + $0x620] sm:$0xff]  ;;  %345 = vst [vmem:[%s2108_s27 + $0x300] sm:$0xff] %v344_v32  ;;  %347 = vst [vmem:[%s2108_s27 + $0x308] sm:$0xff] %v346_v33  ;;  %v350_v35 = vld [vmem:[%s2103_s26 + $0x628] sm:$0xff] }
  0x46   : > { %349 = vst [vmem:[%s2108_s27 + $0x310] sm:$0xff] %v348_v34  ;;  %v352_v36 = vld [vmem:[%s2103_s26 + $0x640] sm:$0xff]  ;;  %v354_v37 = vld [vmem:[%s2103_s26 + $0x648] sm:$0xff]  ;;  %351 = vst [vmem:[%s2108_s27 + $0x318] sm:$0xff] %v350_v35 }
  0x47   : > { %353 = vst [vmem:[%s2108_s27 + $0x320] sm:$0xff] %v352_v36  ;;  %355 = vst [vmem:[%s2108_s27 + $0x328] sm:$0xff] %v354_v37  ;;  %v356_v38 = vld [vmem:[%s2103_s26 + $0x660] sm:$0xff]  ;;  %v358_v39 = vld [vmem:[%s2103_s26 + $0x668] sm:$0xff] }
  0x48   : > { %v360_v40 = vld [vmem:[%s2103_s26 + $0x680] sm:$0xff]  ;;  %357 = vst [vmem:[%s2108_s27 + $0x330] sm:$0xff] %v356_v38  ;;  %359 = vst [vmem:[%s2108_s27 + $0x338] sm:$0xff] %v358_v39  ;;  %v362_v41 = vld [vmem:[%s2103_s26 + $0x688] sm:$0xff] }
  0x49   : > { %361 = vst [vmem:[%s2108_s27 + $0x340] sm:$0xff] %v360_v40  ;;  %v364_v42 = vld [vmem:[%s2103_s26 + $0x6a0] sm:$0xff]  ;;  %v366_v43 = vld [vmem:[%s2103_s26 + $0x6a8] sm:$0xff]  ;;  %363 = vst [vmem:[%s2108_s27 + $0x348] sm:$0xff] %v362_v41 }
  0x4a   : > { %365 = vst [vmem:[%s2108_s27 + $0x350] sm:$0xff] %v364_v42  ;;  %367 = vst [vmem:[%s2108_s27 + $0x358] sm:$0xff] %v366_v43  ;;  %v368_v44 = vld [vmem:[%s2103_s26 + $0x6c0] sm:$0xff]  ;;  %v370_v45 = vld [vmem:[%s2103_s26 + $0x6c8] sm:$0xff] }
  0x4b   : > { %v372_v46 = vld [vmem:[%s2103_s26 + $0x6e0] sm:$0xff]  ;;  %369 = vst [vmem:[%s2108_s27 + $0x360] sm:$0xff] %v368_v44  ;;  %371 = vst [vmem:[%s2108_s27 + $0x368] sm:$0xff] %v370_v45  ;;  %v374_v47 = vld [vmem:[%s2103_s26 + $0x6e8] sm:$0xff] }
  0x4c   : > { %373 = vst [vmem:[%s2108_s27 + $0x370] sm:$0xff] %v372_v46  ;;  %v376_v48 = vld [vmem:[%s2103_s26 + $0x700] sm:$0xff]  ;;  %v378_v49 = vld [vmem:[%s2103_s26 + $0x708] sm:$0xff]  ;;  %375 = vst [vmem:[%s2108_s27 + $0x378] sm:$0xff] %v374_v47 }
  0x4d   : > { %377 = vst [vmem:[%s2108_s27 + $0x380] sm:$0xff] %v376_v48  ;;  %379 = vst [vmem:[%s2108_s27 + $0x388] sm:$0xff] %v378_v49  ;;  %v380_v50 = vld [vmem:[%s2103_s26 + $0x720] sm:$0xff]  ;;  %v382_v51 = vld [vmem:[%s2103_s26 + $0x728] sm:$0xff] }
  0x4e   : > { %v384_v52 = vld [vmem:[%s2103_s26 + $0x740] sm:$0xff]  ;;  %381 = vst [vmem:[%s2108_s27 + $0x390] sm:$0xff] %v380_v50  ;;  %383 = vst [vmem:[%s2108_s27 + $0x398] sm:$0xff] %v382_v51  ;;  %v386_v53 = vld [vmem:[%s2103_s26 + $0x748] sm:$0xff] }
  0x4f   : > { %385 = vst [vmem:[%s2108_s27 + $0x3a0] sm:$0xff] %v384_v52  ;;  %v388_v54 = vld [vmem:[%s2103_s26 + $0x760] sm:$0xff]  ;;  %v390_v55 = vld [vmem:[%s2103_s26 + $0x768] sm:$0xff]  ;;  %387 = vst [vmem:[%s2108_s27 + $0x3a8] sm:$0xff] %v386_v53 }
  0x50   : > { %389 = vst [vmem:[%s2108_s27 + $0x3b0] sm:$0xff] %v388_v54  ;;  %391 = vst [vmem:[%s2108_s27 + $0x3b8] sm:$0xff] %v390_v55  ;;  %v392_v56 = vld [vmem:[%s2103_s26 + $0x780] sm:$0xff]  ;;  %v394_v57 = vld [vmem:[%s2103_s26 + $0x788] sm:$0xff] }
  0x51   : > { %v396_v58 = vld [vmem:[%s2103_s26 + $0x7a0] sm:$0xff]  ;;  %393 = vst [vmem:[%s2108_s27 + $0x3c0] sm:$0xff] %v392_v56  ;;  %395 = vst [vmem:[%s2108_s27 + $0x3c8] sm:$0xff] %v394_v57  ;;  %v398_v59 = vld [vmem:[%s2103_s26 + $0x7a8] sm:$0xff] }
  0x52   : > { %397 = vst [vmem:[%s2108_s27 + $0x3d0] sm:$0xff] %v396_v58  ;;  %v400_v60 = vld [vmem:[%s2103_s26 + $0x7c0] sm:$0xff]  ;;  %v402_v61 = vld [vmem:[%s2103_s26 + $0x7c8] sm:$0xff]  ;;  %399 = vst [vmem:[%s2108_s27 + $0x3d8] sm:$0xff] %v398_v59 }
  0x53   : > { %401 = vst [vmem:[%s2108_s27 + $0x3e0] sm:$0xff] %v400_v60  ;;  %403 = vst [vmem:[%s2108_s27 + $0x3e8] sm:$0xff] %v402_v61  ;;  %v404_v62 = vld [vmem:[%s2103_s26 + $0x7e0] sm:$0xff]  ;;  %v406_v63 = vld [vmem:[%s2103_s26 + $0x7e8] sm:$0xff] }
  0x54   : > { %405 = vst [vmem:[%s2108_s27 + $0x3f0] sm:$0xff] %v404_v62  ;;  %407 = vst [vmem:[%s2108_s27 + $0x3f8] sm:$0xff] %v406_v63 }
  0x55 PF: > { %p1631_p7 = scmp.ge.s32.totalorder %s2040_s14, 1  ;;  %p420_p8 = scmp.lt.s32.totalorder %s2040_s14, 3 }
  0x57   : > { %p421_p9 = pnand %p1631_p7, %p420_p8 }
  0x58   : > { %s427_s28 = sand.u32 (!%p421_p9), 1, %s2032_s12   ;;  %v461_v0 = vld [vmem:[%s2602_s0 + $0x8] sm:$0xff] (!%p421_p9)  ;;  %s1634_s22 = sshll.u32 (!%p421_p9), %s2078_s15, 2 }
  0x59   : > { %424 = sbr.rel (%p421_p9) target bundleno = 455 (0x1c7), region = 51  ;;  %v465_v1 = vld [vmem:[%s2602_s0 + $0x28] sm:$0xff] (!%p421_p9)  ;;  %s1632_s6 = sshll.u32 (!%p421_p9), %s427_s28, 10 }
  0x5a   : > { %v477_v2 = vpack.c.bf16 (!%p421_p9), %v465_v1, %v461_v0  ;;  %s2374_s7 = scalar_lea.vmem (!%p421_p9), [#allocation2], %s1632_s6  ;;  %v460_v1 = vld [vmem:[%s2602_s0] sm:$0xff] (!%p421_p9)  ;;  %p455_p10 = scmp.lt.s32.totalorder (!%p421_p9), %s1634_s22, 7 }
  0x5b   : > { %v1826_v3 = vld [vmem:[%s2374_s7 + $0x4] ss:$16 sps:$4 sm:$0xff] (!%p421_p9)   ;;  %v1828_v4 = vld [vmem:[%s2374_s7 + $0xc] ss:$16 sps:$4 sm:$0xff] (!%p421_p9)   ;;  %v1830_v5 = vld [vmem:[%s2374_s7] ss:$16 sps:$4 sm:$0xff] (!%p421_p9)  }
  0x5c   : > { %1306 = vmatprep.mubr.bf16.mxu0 (!%p421_p9), %v477_v2  ;;  %1412 = vmatprep.mubr.bf16.mxu1 (!%p421_p9), %v477_v2  ;;  %v1831_v6 = vld [vmem:[%s2374_s7 + $0x8] ss:$16 sps:$4 sm:$0xff] (!%p421_p9)   ;;  %v1832_v7 = vld [vmem:[%s2374_s7 + $0x24] ss:$16 sps:$4 sm:$0xff] (!%p421_p9)   ;;  %v1834_v8 = vld [vmem:[%s2374_s7 + $0x2c] ss:$16 sps:$4 sm:$0xff] (!%p421_p9)  }
  0x5d   : > { %1274 = vmatprep.subr.bf16.mxu0 (!%p421_p9), %v1826_v3  ;;  %1380 = vmatprep.subr.bf16.mxu1 (!%p421_p9), %v1828_v4  ;;  %v1836_v9 = vld [vmem:[%s2374_s7 + $0x20] ss:$16 sps:$4 sm:$0xff] (!%p421_p9)   ;;  %v1837_v10 = vld [vmem:[%s2374_s7 + $0x28] ss:$16 sps:$4 sm:$0xff] (!%p421_p9)   ;;  %v1838_v11 = vld [vmem:[%s2374_s7 + $0x44] ss:$16 sps:$4 sm:$0xff] (!%p421_p9)  }
  0x5e   : > { %1275 = vmatpush1.bf16.msra.mxu0 (!%p421_p9), %v1830_v5  ;;  %1381 = vmatpush1.bf16.msra.mxu1 (!%p421_p9), %v1831_v6  ;;  %v1840_v12 = vld [vmem:[%s2374_s7 + $0x4c] ss:$16 sps:$4 sm:$0xff] (!%p421_p9)   ;;  %v1842_v13 = vld [vmem:[%s2374_s7 + $0x40] ss:$16 sps:$4 sm:$0xff] (!%p421_p9)   ;;  %v1843_v14 = vld [vmem:[%s2374_s7 + $0x48] ss:$16 sps:$4 sm:$0xff] (!%p421_p9)  }
  0x5f   : > { %1276 = vmatprep.subr.bf16.mxu0 (!%p421_p9), %v1832_v7  ;;  %1382 = vmatprep.subr.bf16.mxu1 (!%p421_p9), %v1834_v8  ;;  %v1844_v15 = vld [vmem:[%s2374_s7 + $0x64] ss:$16 sps:$4 sm:$0xff] (!%p421_p9)   ;;  %v1846_v16 = vld [vmem:[%s2374_s7 + $0x6c] ss:$16 sps:$4 sm:$0xff] (!%p421_p9)   ;;  %v1848_v17 = vld [vmem:[%s2374_s7 + $0x60] ss:$16 sps:$4 sm:$0xff] (!%p421_p9)  }
  0x60   : > { %v1849_v18 = vld [vmem:[%s2374_s7 + $0x68] ss:$16 sps:$4 sm:$0xff]   ;;  %v1850_v19 = vld [vmem:[%s2374_s7 + $0x84] ss:$16 sps:$4 sm:$0xff]   ;;  %v1852_v20 = vld [vmem:[%s2374_s7 + $0x8c] ss:$16 sps:$4 sm:$0xff]  }
  0x61   : > { %v1854_v21 = vld [vmem:[%s2374_s7 + $0x80] ss:$16 sps:$4 sm:$0xff]   ;;  %v1855_v22 = vld [vmem:[%s2374_s7 + $0x88] ss:$16 sps:$4 sm:$0xff]   ;;  %v1856_v23 = vld [vmem:[%s2374_s7 + $0xa4] ss:$16 sps:$4 sm:$0xff]  }
  0x62   : > { %1277 = vmatpush1.bf16.msra.mxu0 %v1836_v9  ;;  %1383 = vmatpush1.bf16.msra.mxu1 %v1837_v10  ;;  %v1858_v24 = vld [vmem:[%s2374_s7 + $0xac] ss:$16 sps:$4 sm:$0xff]   ;;  %v1860_v25 = vld [vmem:[%s2374_s7 + $0xa0] ss:$16 sps:$4 sm:$0xff]   ;;  %v1861_v26 = vld [vmem:[%s2374_s7 + $0xa8] ss:$16 sps:$4 sm:$0xff]  }
  0x63   : > { %1278 = vmatprep.subr.bf16.mxu0 %v1838_v11  ;;  %1384 = vmatprep.subr.bf16.mxu1 %v1840_v12  ;;  %v1862_v27 = vld [vmem:[%s2374_s7 + $0xc4] ss:$16 sps:$4 sm:$0xff]   ;;  %v1864_v28 = vld [vmem:[%s2374_s7 + $0xcc] ss:$16 sps:$4 sm:$0xff]   ;;  %v1866_v29 = vld [vmem:[%s2374_s7 + $0xc0] ss:$16 sps:$4 sm:$0xff]  }
  0x64   : > { %v1867_v30 = vld [vmem:[%s2374_s7 + $0xc8] ss:$16 sps:$4 sm:$0xff]   ;;  %v1868_v31 = vld [vmem:[%s2374_s7 + $0xe4] ss:$16 sps:$4 sm:$0xff]   ;;  %v1870_v32 = vld [vmem:[%s2374_s7 + $0xec] ss:$16 sps:$4 sm:$0xff]  }
  0x65   : > { %v1872_v33 = vld [vmem:[%s2374_s7 + $0xe0] ss:$16 sps:$4 sm:$0xff]   ;;  %v1873_v34 = vld [vmem:[%s2374_s7 + $0xe8] ss:$16 sps:$4 sm:$0xff]   ;;  %v1874_v35 = vld [vmem:[%s2374_s7 + $0x104] ss:$16 sps:$4 sm:$0xff]  }
  0x66   : > { %1279 = vmatpush1.bf16.msra.mxu0 %v1842_v13  ;;  %1385 = vmatpush1.bf16.msra.mxu1 %v1843_v14  ;;  %v1876_v36 = vld [vmem:[%s2374_s7 + $0x10c] ss:$16 sps:$4 sm:$0xff]   ;;  %v1878_v37 = vld [vmem:[%s2374_s7 + $0x100] ss:$16 sps:$4 sm:$0xff]   ;;  %v1879_v38 = vld [vmem:[%s2374_s7 + $0x108] ss:$16 sps:$4 sm:$0xff]  }
  0x67   : > { %1280 = vmatprep.subr.bf16.mxu0 %v1844_v15  ;;  %1386 = vmatprep.subr.bf16.mxu1 %v1846_v16  ;;  %v1880_v39 = vld [vmem:[%s2374_s7 + $0x124] ss:$16 sps:$4 sm:$0xff]   ;;  %v1882_v40 = vld [vmem:[%s2374_s7 + $0x12c] ss:$16 sps:$4 sm:$0xff]   ;;  %v1884_v41 = vld [vmem:[%s2374_s7 + $0x120] ss:$16 sps:$4 sm:$0xff]  }
  0x68   : > { %v1885_v42 = vld [vmem:[%s2374_s7 + $0x128] ss:$16 sps:$4 sm:$0xff]   ;;  %v1886_v43 = vld [vmem:[%s2374_s7 + $0x144] ss:$16 sps:$4 sm:$0xff]   ;;  %v1888_v44 = vld [vmem:[%s2374_s7 + $0x14c] ss:$16 sps:$4 sm:$0xff]  }
  0x69   : > { %v1890_v45 = vld [vmem:[%s2374_s7 + $0x140] ss:$16 sps:$4 sm:$0xff]   ;;  %v1891_v46 = vld [vmem:[%s2374_s7 + $0x148] ss:$16 sps:$4 sm:$0xff]   ;;  %v1892_v47 = vld [vmem:[%s2374_s7 + $0x164] ss:$16 sps:$4 sm:$0xff]  }
  0x6a   : > { %1281 = vmatpush1.bf16.msra.mxu0 %v1848_v17  ;;  %1387 = vmatpush1.bf16.msra.mxu1 %v1849_v18  ;;  %v1894_v48 = vld [vmem:[%s2374_s7 + $0x16c] ss:$16 sps:$4 sm:$0xff]   ;;  %v1896_v49 = vld [vmem:[%s2374_s7 + $0x160] ss:$16 sps:$4 sm:$0xff]   ;;  %v1897_v50 = vld [vmem:[%s2374_s7 + $0x168] ss:$16 sps:$4 sm:$0xff]  }
  0x6b   : > { %1282 = vmatprep.subr.bf16.mxu0 %v1850_v19  ;;  %1388 = vmatprep.subr.bf16.mxu1 %v1852_v20  ;;  %v1898_v51 = vld [vmem:[%s2374_s7 + $0x184] ss:$16 sps:$4 sm:$0xff]   ;;  %v1900_v52 = vld [vmem:[%s2374_s7 + $0x18c] ss:$16 sps:$4 sm:$0xff]   ;;  %v1902_v53 = vld [vmem:[%s2374_s7 + $0x180] ss:$16 sps:$4 sm:$0xff]  }
  0x6c   : > { %v1903_v54 = vld [vmem:[%s2374_s7 + $0x188] ss:$16 sps:$4 sm:$0xff]   ;;  %v1904_v55 = vld [vmem:[%s2374_s7 + $0x1a4] ss:$16 sps:$4 sm:$0xff]   ;;  %v1906_v56 = vld [vmem:[%s2374_s7 + $0x1ac] ss:$16 sps:$4 sm:$0xff]  }
  0x6d   : > { %v1908_v57 = vld [vmem:[%s2374_s7 + $0x1a0] ss:$16 sps:$4 sm:$0xff]   ;;  %v1909_v58 = vld [vmem:[%s2374_s7 + $0x1a8] ss:$16 sps:$4 sm:$0xff]   ;;  %v1910_v59 = vld [vmem:[%s2374_s7 + $0x1c4] ss:$16 sps:$4 sm:$0xff]  }
  0x6e   : > { %1283 = vmatpush1.bf16.msra.mxu0 %v1854_v21  ;;  %1389 = vmatpush1.bf16.msra.mxu1 %v1855_v22  ;;  %v1912_v60 = vld [vmem:[%s2374_s7 + $0x1cc] ss:$16 sps:$4 sm:$0xff]   ;;  %v1914_v61 = vld [vmem:[%s2374_s7 + $0x1c0] ss:$16 sps:$4 sm:$0xff]   ;;  %v1915_v62 = vld [vmem:[%s2374_s7 + $0x1c8] ss:$16 sps:$4 sm:$0xff]  }
  0x6f   : > { %1284 = vmatprep.subr.bf16.mxu0 %v1856_v23  ;;  %1390 = vmatprep.subr.bf16.mxu1 %v1858_v24  ;;  %v1916_v63 = vld [vmem:[%s2374_s7 + $0x1e4] ss:$16 sps:$4 sm:$0xff]   ;;  %v1918_v0 = vld [vmem:[%s2374_s7 + $0x1ec] ss:$16 sps:$4 sm:$0xff]   ;;  %v1920_v3 = vld [vmem:[%s2374_s7 + $0x1e0] ss:$16 sps:$4 sm:$0xff]  }
  0x70   : > { %v464_v2 = vld [vmem:[%s2602_s0 + $0x20] sm:$0xff]  ;;  %v1921_v4 = vld [vmem:[%s2374_s7 + $0x1e8] ss:$16 sps:$4 sm:$0xff]   ;;  %v1927_v6 = vld [vmem:[%s2374_s7 + $0x20c] ss:$16 sps:$4 sm:$0xff]   ;;  %s2611_s22 = smov (!%p455_p10, %s1634_s22), 7 }
  0x71   : > { %v1924_v5 = vld [vmem:[%s2374_s7 + $0x204] ss:$16 sps:$4 sm:$0xff]   ;;  %v469_v7 = vld [vmem:[%s2602_s0 + $0x48] sm:$0xff]  ;;  %v1922_v9 = vld [vmem:[%s2374_s7 + $0x200] ss:$16 sps:$4 sm:$0xff]   ;;  %v476_v11 = vpack.c.bf16 %v464_v2, %v460_v1  ;;  %s457_s25 = scalar_lea.vmem %s2604_s2, %s2611_s22  ;;  %s1633_s26 = sshll.u32 %s427_s28, 7 }
  0x72   : > { %1285 = vmatpush1.bf16.msra.mxu0 %v1860_v25  ;;  %1391 = vmatpush1.bf16.msra.mxu1 %v1861_v26  ;;  %v473_v8 = vld [vmem:[%s2602_s0 + $0x68] sm:$0xff]  ;;  %v1930_v12 = vld [vmem:[%s2374_s7 + $0x224] ss:$16 sps:$4 sm:$0xff]   ;;  %v1928_v17 = vld [vmem:[%s2374_s7 + $0x220] ss:$16 sps:$4 sm:$0xff]   ;;  %s2552_s27 = scalar_lea.vmem [#allocation3], %s1633_s26 }
  0x73   : > { %1286 = vmatprep.subr.bf16.mxu0 %v1862_v27  ;;  %1392 = vmatprep.subr.bf16.mxu1 %v1864_v28  ;;  %v1925_v10 = vld [vmem:[%s2374_s7 + $0x208] ss:$16 sps:$4 sm:$0xff]   ;;  %v1933_v13 = vld [vmem:[%s2374_s7 + $0x22c] ss:$16 sps:$4 sm:$0xff]   ;;  %v481_v14 = vpack.c.bf16 %v473_v8, %v469_v7  ;;  %v468_v15 = vld [vmem:[%s2602_s0 + $0x40] sm:$0xff]  ;;  %s1769_s12 = sshll.u32 (%p2093_p5), %s2078_s15, 5 }
  0x74   : > { %v472_v16 = vld [vmem:[%s2602_s0 + $0x60] sm:$0xff]  ;;  %v1931_v18 = vld [vmem:[%s2374_s7 + $0x228] ss:$16 sps:$4 sm:$0xff]   ;;  %v1939_v20 = vld [vmem:[%s2374_s7 + $0x24c] ss:$16 sps:$4 sm:$0xff]   ;;  %s1511_s30 = scalar_lea.vmem (%p2093_p5), %s2605_s3, %s1769_s12 }
  0x75   : > { %v1936_v19 = vld [vmem:[%s2374_s7 + $0x244] ss:$16 sps:$4 sm:$0xff]   ;;  %v1934_v21 = vld [vmem:[%s2374_s7 + $0x240] ss:$16 sps:$4 sm:$0xff]   ;;  %v1937_v22 = vld [vmem:[%s2374_s7 + $0x248] ss:$16 sps:$4 sm:$0xff]   ;;  %v480_v23 = vpack.c.bf16 %v472_v16, %v468_v15 }
  0x76   : > { %1287 = vmatpush1.bf16.msra.mxu0 %v1866_v29  ;;  %1393 = vmatpush1.bf16.msra.mxu1 %v1867_v30  ;;  %v1942_v24 = vld [vmem:[%s2374_s7 + $0x264] ss:$16 sps:$4 sm:$0xff]   ;;  %v1945_v25 = vld [vmem:[%s2374_s7 + $0x26c] ss:$16 sps:$4 sm:$0xff]   ;;  %v1940_v26 = vld [vmem:[%s2374_s7 + $0x260] ss:$16 sps:$4 sm:$0xff]  }
  0x77   : > { %1288 = vmatprep.subr.bf16.mxu0 %v1868_v31  ;;  %1394 = vmatprep.subr.bf16.mxu1 %v1870_v32  ;;  %v1943_v27 = vld [vmem:[%s2374_s7 + $0x268] ss:$16 sps:$4 sm:$0xff]   ;;  %v1948_v28 = vld [vmem:[%s2374_s7 + $0x284] ss:$16 sps:$4 sm:$0xff]   ;;  %v1951_v29 = vld [vmem:[%s2374_s7 + $0x28c] ss:$16 sps:$4 sm:$0xff]  }
  0x78   : > { %v1946_v30 = vld [vmem:[%s2374_s7 + $0x280] ss:$16 sps:$4 sm:$0xff]   ;;  %v1949_v31 = vld [vmem:[%s2374_s7 + $0x288] ss:$16 sps:$4 sm:$0xff]   ;;  %v1954_v32 = vld [vmem:[%s2374_s7 + $0x2a4] ss:$16 sps:$4 sm:$0xff]  }
  0x79   : > { %v1994_v1 = vld [vmem:[%s2374_s7 + $0x380] ss:$16 sps:$4 sm:$0xff]   ;;  %v1997_v2 = vld [vmem:[%s2374_s7 + $0x388] ss:$16 sps:$4 sm:$0xff]   ;;  %v2008_v7 = vld [vmem:[%s2374_s7 + $0x3c4] ss:$16 sps:$4 sm:$0xff]  }
  0x7a   : > { %1289 = vmatpush1.bf16.msra.mxu0 %v1872_v33  ;;  %1395 = vmatpush1.bf16.msra.mxu1 %v1873_v34  ;;  %v1957_v33 = vld [vmem:[%s2374_s7 + $0x2ac] ss:$16 sps:$4 sm:$0xff]   ;;  %v1952_v34 = vld [vmem:[%s2374_s7 + $0x2a0] ss:$16 sps:$4 sm:$0xff]  }
  0x7b   : > { %1290 = vmatprep.subr.bf16.mxu0 %v1874_v35  ;;  %1396 = vmatprep.subr.bf16.mxu1 %v1876_v36  ;;  %v463_v35 = vld [vmem:[%s2602_s0 + $0x18] sm:$0xff]  ;;  %v462_v15 = vld [vmem:[%s2602_s0 + $0x10] sm:$0xff] }
  0x7c   : > { %v1955_v36 = vld [vmem:[%s2374_s7 + $0x2a8] ss:$16 sps:$4 sm:$0xff]   ;;  %v2011_v8 = vld [vmem:[%s2374_s7 + $0x3cc] ss:$16 sps:$4 sm:$0xff]   ;;  %v466_v16 = vld [vmem:[%s2602_s0 + $0x30] sm:$0xff] }
  0x7e   : > { %1291 = vmatpush1.bf16.msra.mxu0 %v1878_v37  ;;  %1397 = vmatpush1.bf16.msra.mxu1 %v1879_v38  ;;  %v1960_v37 = vld [vmem:[%s2374_s7 + $0x2c4] ss:$16 sps:$4 sm:$0xff]   ;;  %v1963_v38 = vld [vmem:[%s2374_s7 + $0x2cc] ss:$16 sps:$4 sm:$0xff]  }
  0x7f   : > { %1292 = vmatprep.subr.bf16.mxu0 %v1880_v39  ;;  %1398 = vmatprep.subr.bf16.mxu1 %v1882_v40  ;;  %v467_v39 = vld [vmem:[%s2602_s0 + $0x38] sm:$0xff] }
  0x80   : > { %v479_v40 = vpack.c.bf16 %v467_v39, %v463_v35 }
  0x82   : > { %1293 = vmatpush1.bf16.msra.mxu0 %v1884_v41  ;;  %1399 = vmatpush1.bf16.msra.mxu1 %v1885_v42  ;;  %v1958_v41 = vld [vmem:[%s2374_s7 + $0x2c0] ss:$16 sps:$4 sm:$0xff]   ;;  %v1961_v42 = vld [vmem:[%s2374_s7 + $0x2c8] ss:$16 sps:$4 sm:$0xff]  }
  0x83   : > { %1294 = vmatprep.subr.bf16.mxu0 %v1886_v43  ;;  %1400 = vmatprep.subr.bf16.mxu1 %v1888_v44  ;;  %v1966_v43 = vld [vmem:[%s2374_s7 + $0x2e4] ss:$16 sps:$4 sm:$0xff]   ;;  %v1969_v44 = vld [vmem:[%s2374_s7 + $0x2ec] ss:$16 sps:$4 sm:$0xff]  }
  0x86   : > { %1295 = vmatpush1.bf16.msra.mxu0 %v1890_v45  ;;  %1401 = vmatpush1.bf16.msra.mxu1 %v1891_v46  ;;  %v1964_v45 = vld [vmem:[%s2374_s7 + $0x2e0] ss:$16 sps:$4 sm:$0xff]   ;;  %v1967_v46 = vld [vmem:[%s2374_s7 + $0x2e8] ss:$16 sps:$4 sm:$0xff]  }
  0x87   : > { %1296 = vmatprep.subr.bf16.mxu0 %v1892_v47  ;;  %1402 = vmatprep.subr.bf16.mxu1 %v1894_v48  ;;  %v1972_v47 = vld [vmem:[%s2374_s7 + $0x304] ss:$16 sps:$4 sm:$0xff]   ;;  %v1975_v48 = vld [vmem:[%s2374_s7 + $0x30c] ss:$16 sps:$4 sm:$0xff]  }
  0x8a   : > { %1297 = vmatpush1.bf16.msra.mxu0 %v1896_v49  ;;  %1403 = vmatpush1.bf16.msra.mxu1 %v1897_v50  ;;  %v1970_v49 = vld [vmem:[%s2374_s7 + $0x300] ss:$16 sps:$4 sm:$0xff]   ;;  %v1973_v50 = vld [vmem:[%s2374_s7 + $0x308] ss:$16 sps:$4 sm:$0xff]  }
  0x8b   : > { %1298 = vmatprep.subr.bf16.mxu0 %v1898_v51  ;;  %1404 = vmatprep.subr.bf16.mxu1 %v1900_v52  ;;  %v1978_v51 = vld [vmem:[%s2374_s7 + $0x324] ss:$16 sps:$4 sm:$0xff]   ;;  %v1981_v52 = vld [vmem:[%s2374_s7 + $0x32c] ss:$16 sps:$4 sm:$0xff]  }
  0x8e   : > { %1299 = vmatpush1.bf16.msra.mxu0 %v1902_v53  ;;  %1405 = vmatpush1.bf16.msra.mxu1 %v1903_v54  ;;  %v1976_v53 = vld [vmem:[%s2374_s7 + $0x320] ss:$16 sps:$4 sm:$0xff]   ;;  %v1979_v54 = vld [vmem:[%s2374_s7 + $0x328] ss:$16 sps:$4 sm:$0xff]  }
  0x8f   : > { %1300 = vmatprep.subr.bf16.mxu0 %v1904_v55  ;;  %1406 = vmatprep.subr.bf16.mxu1 %v1906_v56  ;;  %v1984_v55 = vld [vmem:[%s2374_s7 + $0x344] ss:$16 sps:$4 sm:$0xff]   ;;  %v1987_v56 = vld [vmem:[%s2374_s7 + $0x34c] ss:$16 sps:$4 sm:$0xff]  }
  0x92   : > { %1301 = vmatpush1.bf16.msra.mxu0 %v1908_v57  ;;  %1407 = vmatpush1.bf16.msra.mxu1 %v1909_v58  ;;  %v1982_v57 = vld [vmem:[%s2374_s7 + $0x340] ss:$16 sps:$4 sm:$0xff]   ;;  %v1985_v58 = vld [vmem:[%s2374_s7 + $0x348] ss:$16 sps:$4 sm:$0xff]  }
  0x93   : > { %1302 = vmatprep.subr.bf16.mxu0 %v1910_v59  ;;  %1408 = vmatprep.subr.bf16.mxu1 %v1912_v60  ;;  %v1990_v59 = vld [vmem:[%s2374_s7 + $0x364] ss:$16 sps:$4 sm:$0xff]   ;;  %v1993_v60 = vld [vmem:[%s2374_s7 + $0x36c] ss:$16 sps:$4 sm:$0xff]  }
  0x96   : > { %1303 = vmatpush1.bf16.msra.mxu0 %v1914_v61  ;;  %1409 = vmatpush1.bf16.msra.mxu1 %v1915_v62  ;;  %v1988_v61 = vld [vmem:[%s2374_s7 + $0x360] ss:$16 sps:$4 sm:$0xff]   ;;  %v1991_v62 = vld [vmem:[%s2374_s7 + $0x368] ss:$16 sps:$4 sm:$0xff]  }
  0x97   : > { %1304 = vmatprep.subr.bf16.mxu0 %v1916_v63  ;;  %1410 = vmatprep.subr.bf16.mxu1 %v1918_v0  ;;  %v1996_v63 = vld [vmem:[%s2374_s7 + $0x384] ss:$16 sps:$4 sm:$0xff]   ;;  %v1999_v0 = vld [vmem:[%s2374_s7 + $0x38c] ss:$16 sps:$4 sm:$0xff]  }
  0x9a   : > { %1305 = vmatpush1.bf16.msra.mxu0 %v1920_v3  ;;  %1411 = vmatpush1.bf16.msra.mxu1 %v1921_v4  ;;  %v2002_v3 = vld [vmem:[%s2374_s7 + $0x3a4] ss:$16 sps:$4 sm:$0xff]   ;;  %v2005_v4 = vld [vmem:[%s2374_s7 + $0x3ac] ss:$16 sps:$4 sm:$0xff]  }
  0x9b   : > { %1327 = vmatprep.subr.bf16.mxu0 %v1924_v5  ;;  %1433 = vmatprep.subr.bf16.mxu1 %v1927_v6  ;;  %v2000_v5 = vld [vmem:[%s2374_s7 + $0x3a0] ss:$16 sps:$4 sm:$0xff]   ;;  %v2003_v6 = vld [vmem:[%s2374_s7 + $0x3a8] ss:$16 sps:$4 sm:$0xff]  }
  0x9d   : > { %1307 = vmatmul.mubr.bf16.vlgmr.msra.gmra.mrb[0].mxu0 %v476_v11  ;;  %1413 = vmatmul.mubr.bf16.vlgmr.msra.gmra.mrb[0].mxu1 %v476_v11  ;;  %v2014_v11 = vld [vmem:[%s2374_s7 + $0x3e4] ss:$16 sps:$4 sm:$0xff]  }
  0x9e   : > { %1328 = vmatpush1.bf16.msra.mxu0 %v1922_v9  ;;  %1434 = vmatpush1.bf16.msra.mxu1 %v1925_v10  ;;  %v2006_v9 = vld [vmem:[%s2374_s7 + $0x3c0] ss:$16 sps:$4 sm:$0xff]   ;;  %v2009_v10 = vld [vmem:[%s2374_s7 + $0x3c8] ss:$16 sps:$4 sm:$0xff]  }
  0x9f   : > { %1329 = vmatprep.subr.bf16.mxu0 %v1930_v12  ;;  %1435 = vmatprep.subr.bf16.mxu1 %v1933_v13  ;;  %v2017_v12 = vld [vmem:[%s2374_s7 + $0x3ec] ss:$16 sps:$4 sm:$0xff]   ;;  %v2012_v13 = vld [vmem:[%s2374_s7 + $0x3e0] ss:$16 sps:$4 sm:$0xff]  }
  0xa0   : > { %1316 = vmatprep.mubr.bf16.mxu0 %v481_v14  ;;  %1422 = vmatprep.mubr.bf16.mxu1 %v481_v14  ;;  %v2015_v14 = vld [vmem:[%s2374_s7 + $0x3e8] ss:$16 sps:$4 sm:$0xff]  }
  0xa2   : > { %1330 = vmatpush1.bf16.msra.mxu0 %v1928_v17  ;;  %1436 = vmatpush1.bf16.msra.mxu1 %v1931_v18  ;;  %v471_v17 = vld [vmem:[%s2602_s0 + $0x58] sm:$0xff] }
  0xa3   : > { %1331 = vmatprep.subr.bf16.mxu0 %v1936_v19  ;;  %1437 = vmatprep.subr.bf16.mxu1 %v1939_v20  ;;  %v475_v18 = vld [vmem:[%s2602_s0 + $0x78] sm:$0xff]  ;;  %v478_v19 = vpack.c.bf16 %v466_v16, %v462_v15 }
  0xa4   : > { %v483_v20 = vpack.c.bf16 %v475_v18, %v471_v17 }
  0xa5   : > { %1317 = vmatmul.mubr.bf16.gmra.mrb[4].mxu0 %v480_v23  ;;  %1423 = vmatmul.mubr.bf16.gmra.mrb[4].mxu1 %v480_v23 }
  0xa6   : > { %1332 = vmatpush1.bf16.msra.mxu0 %v1934_v21  ;;  %1438 = vmatpush1.bf16.msra.mxu1 %v1937_v22  ;;  %v470_v21 = vld [vmem:[%s2602_s0 + $0x50] sm:$0xff] }
  0xa7   : > { %1333 = vmatprep.subr.bf16.mxu0 %v1942_v24  ;;  %1439 = vmatprep.subr.bf16.mxu1 %v1945_v25  ;;  %v474_v22 = vld [vmem:[%s2602_s0 + $0x70] sm:$0xff]  ;;  %v614_v24 = vlaneseq }
  0xa8   : > { %1359 = vmatprep.mubr.bf16.mxu0 %v479_v40  ;;  %1465 = vmatprep.mubr.bf16.mxu1 %v479_v40  ;;  %v482_v23 = vpack.c.bf16 %v474_v22, %v470_v21 }
  0xa9   : > { %v615_v25 = vshrl.u32 %v614_v24, 7 }
  0xaa   : > { %1334 = vmatpush1.bf16.msra.mxu0 %v1940_v26  ;;  %1440 = vmatpush1.bf16.msra.mxu1 %v1943_v27 }
  0xab   : > { %1335 = vmatprep.subr.bf16.mxu0 %v1948_v28  ;;  %1441 = vmatprep.subr.bf16.mxu1 %v1951_v29  ;;  %v616_v26 = vsub.s32 0, %v615_v25  ;;  %v624_v27 = vsub.s32 2, %v615_v25  ;;  %v612_v28 = vld [vmem:[%s457_s25] sm:$0xf]  ;;  %v620_v29 = vsub.s32 1, %v615_v25 }
  0xae   : > { %1336 = vmatpush1.bf16.msra.mxu0 %v1946_v30  ;;  %1442 = vmatpush1.bf16.msra.mxu1 %v1949_v31  ;;  %v628_v30 = vsub.s32 3, %v615_v25  ;;  %v617_v31 = vrot.slane %v612_v28, %v616_v26 }
  0xaf   : > { %1337 = vmatprep.subr.bf16.mxu0 %v1954_v32  ;;  %1443 = vmatprep.subr.bf16.mxu1 %v1957_v33  ;;  %v625_v32 = vrot.slane %v612_v28, %v624_v27  ;;  %v621_v33 = vrot.slane %v612_v28, %v620_v29 }
  0xb2   : > { %1338 = vmatpush1.bf16.msra.mxu0 %v1952_v34  ;;  %1444 = vmatpush1.bf16.msra.mxu1 %v1955_v36  ;;  %v629_v34 = vrot.slane %v612_v28, %v628_v30 }
  0xb3   : > { %1339 = vmatprep.subr.bf16.mxu0 %v1960_v37  ;;  %1445 = vmatprep.subr.bf16.mxu1 %v1963_v38 }
  0xb6   : > { %1340 = vmatpush1.bf16.msra.mxu0 %v1958_v41  ;;  %1446 = vmatpush1.bf16.msra.mxu1 %v1961_v42 }
  0xb7   : > { %1341 = vmatprep.subr.bf16.mxu0 %v1966_v43  ;;  %1447 = vmatprep.subr.bf16.mxu1 %v1969_v44 }
  0xba   : > { %1342 = vmatpush1.bf16.msra.mxu0 %v1964_v45  ;;  %1448 = vmatpush1.bf16.msra.mxu1 %v1967_v46 }
  0xbb   : > { %1343 = vmatprep.subr.bf16.mxu0 %v1972_v47  ;;  %1449 = vmatprep.subr.bf16.mxu1 %v1975_v48 }
  0xbe   : > { %1344 = vmatpush1.bf16.msra.mxu0 %v1970_v49  ;;  %1450 = vmatpush1.bf16.msra.mxu1 %v1973_v50 }
  0xbf   : > { %1345 = vmatprep.subr.bf16.mxu0 %v1978_v51  ;;  %1451 = vmatprep.subr.bf16.mxu1 %v1981_v52 }
  0xc2   : > { %1346 = vmatpush1.bf16.msra.mxu0 %v1976_v53  ;;  %1452 = vmatpush1.bf16.msra.mxu1 %v1979_v54 }
  0xc3   : > { %1347 = vmatprep.subr.bf16.mxu0 %v1984_v55  ;;  %1453 = vmatprep.subr.bf16.mxu1 %v1987_v56 }
  0xc6   : > { %1348 = vmatpush1.bf16.msra.mxu0 %v1982_v57  ;;  %1454 = vmatpush1.bf16.msra.mxu1 %v1985_v58 }
  0xc7   : > { %1349 = vmatprep.subr.bf16.mxu0 %v1990_v59  ;;  %1455 = vmatprep.subr.bf16.mxu1 %v1993_v60 }
  0xca   : > { %1350 = vmatpush1.bf16.msra.mxu0 %v1988_v61  ;;  %1456 = vmatpush1.bf16.msra.mxu1 %v1991_v62 }
  0xcb   : > { %1351 = vmatprep.subr.bf16.mxu0 %v1996_v63  ;;  %1457 = vmatprep.subr.bf16.mxu1 %v1999_v0 }
  0xce   : > { %1352 = vmatpush1.bf16.msra.mxu0 %v1994_v1  ;;  %1458 = vmatpush1.bf16.msra.mxu1 %v1997_v2 }
  0xcf   : > { %1353 = vmatprep.subr.bf16.mxu0 %v2002_v3  ;;  %1459 = vmatprep.subr.bf16.mxu1 %v2005_v4 }
  0xd2   : > { %1354 = vmatpush1.bf16.msra.mxu0 %v2000_v5  ;;  %1460 = vmatpush1.bf16.msra.mxu1 %v2003_v6 }
  0xd3   : > { %1355 = vmatprep.subr.bf16.mxu0 %v2008_v7  ;;  %1461 = vmatprep.subr.bf16.mxu1 %v2011_v8 }
  0xd6   : > { %1356 = vmatpush1.bf16.msra.mxu0 %v2006_v9  ;;  %1462 = vmatpush1.bf16.msra.mxu1 %v2009_v10 }
  0xd7   : > { %1357 = vmatprep.subr.bf16.mxu0 %v2014_v11  ;;  %1463 = vmatprep.subr.bf16.mxu1 %v2017_v12 }
  0xda   : > { %1358 = vmatpush1.bf16.msra.mxu0 %v2012_v13  ;;  %1464 = vmatpush1.bf16.msra.mxu1 %v2015_v14 }
  0xdd   : > { %1360 = vmatmul.mubr.bf16.vlgmr.msra.gmra.mrb[0].mxu0 %v478_v19  ;;  %1466 = vmatmul.mubr.bf16.vlgmr.msra.gmra.mrb[0].mxu1 %v478_v19 }
  0xde   : > { %1369 = vmatprep.mubr.bf16.mxu0 %v483_v20  ;;  %1475 = vmatprep.mubr.bf16.mxu1 %v483_v20 }
  0xe5   : > { %1370 = vmatmul.mubr.bf16.gmra.mrb[4].mxu0 %v482_v23  ;;  %1476 = vmatmul.mubr.bf16.gmra.mrb[4].mxu1 %v482_v23 }
 0x1b0   : > { %v1361_v35 = vpop.f32.mrb[0].mxu0  ;;  %v1467_v36 = vpop.f32.mrb[0].mxu1 }
 0x1b1   : > { %v1770_v37 = vadd.f32 %v1361_v35, %v617_v31  ;;  %v1778_v38 = vadd.f32 %v1467_v36, %v625_v32  ;;  %v1363_v39 = vpop.f32.mrb[1].mxu0  ;;  %v1469_v40 = vpop.f32.mrb[1].mxu1 }
 0x1b2   : > { %v1771_v41 = vadd.f32 %v1363_v39, %v621_v33  ;;  %v1779_v42 = vadd.f32 %v1469_v40, %v629_v34  ;;  %v1365_v43 = vpop.f32.mrb[2].mxu0  ;;  %v1471_v44 = vpop.f32.mrb[2].mxu1 }
 0x1b3   : > { %1486 = vst [vmem:[%s2552_s27] sm:$0xff] %v1770_v37  ;;  %1488 = vst [vmem:[%s2552_s27 + $0x10] sm:$0xff] %v1778_v38  ;;  %v1772_v45 = vadd.f32 %v1365_v43, %v617_v31  ;;  %v1780_v46 = vadd.f32 %v1471_v44, %v625_v32  ;;  %v1367_v47 = vpop.f32.mrb[3].mxu0  ;;  %v1473_v48 = vpop.f32.mrb[3].mxu1 }
 0x1b4   : > { %1487 = vst [vmem:[%s2552_s27 + $0x8] sm:$0xff] %v1771_v41  ;;  %1489 = vst [vmem:[%s2552_s27 + $0x18] sm:$0xff] %v1779_v42  ;;  %v1773_v49 = vadd.f32 %v1367_v47, %v621_v33  ;;  %v1781_v50 = vadd.f32 %v1473_v48, %v629_v34 }
 0x1b5   : > { %1490 = vst [vmem:[%s2552_s27 + $0x20] sm:$0xff] %v1772_v45  ;;  %1492 = vst [vmem:[%s2552_s27 + $0x30] sm:$0xff] %v1780_v46 }
 0x1b6   : > { %1491 = vst [vmem:[%s2552_s27 + $0x28] sm:$0xff] %v1773_v49  ;;  %1493 = vst [vmem:[%s2552_s27 + $0x38] sm:$0xff] %v1781_v50 }
 0x1b8   : > { %v1371_v51 = vpop.f32.mrb[4].mxu0  ;;  %v1477_v52 = vpop.f32.mrb[4].mxu1  ;;  %1508 = sbr.rel (!%p2093_p5) target bundleno = 455 (0x1c7), region = 59 }
 0x1b9   : > { %v1774_v53 = vadd.f32 %v1371_v51, %v617_v31  ;;  %v1782_v54 = vadd.f32 %v1477_v52, %v625_v32  ;;  %v1373_v55 = vpop.f32.mrb[5].mxu0  ;;  %v1479_v56 = vpop.f32.mrb[5].mxu1 }
 0x1ba   : > { %v1775_v57 = vadd.f32 %v1373_v55, %v621_v33  ;;  %v1783_v58 = vadd.f32 %v1479_v56, %v629_v34  ;;  %v1375_v59 = vpop.f32.mrb[6].mxu0  ;;  %v1481_v60 = vpop.f32.mrb[6].mxu1  ;;  %v1524_v3 = vld [vmem:[%s2552_s27] sm:$0xff] (%p2093_p5)  ;;  %v1528_v5 = vld [vmem:[%s2552_s27 + $0x10] sm:$0xff] (%p2093_p5) }
 0x1bb   : > { %1494 = vst [vmem:[%s2552_s27 + $0x40] sm:$0xff] %v1774_v53  ;;  %1496 = vst [vmem:[%s2552_s27 + $0x50] sm:$0xff] %v1782_v54  ;;  %v1776_v61 = vadd.f32 %v1375_v59, %v617_v31  ;;  %v1784_v62 = vadd.f32 %v1481_v60, %v625_v32  ;;  %v1377_v63 = vpop.f32.mrb[7].mxu0  ;;  %v1483_v0 = vpop.f32.mrb[7].mxu1  ;;  %v1526_v4 = vld [vmem:[%s2552_s27 + $0x8] sm:$0xff] (%p2093_p5)  ;;  %v1530_v6 = vld [vmem:[%s2552_s27 + $0x18] sm:$0xff] (%p2093_p5) }
 0x1bc   : > { %1495 = vst [vmem:[%s2552_s27 + $0x48] sm:$0xff] %v1775_v57  ;;  %1497 = vst [vmem:[%s2552_s27 + $0x58] sm:$0xff] %v1783_v58  ;;  %v1777_v1 = vadd.f32 %v1377_v63, %v621_v33  ;;  %v1785_v2 = vadd.f32 %v1483_v0, %v629_v34  ;;  %v1532_v7 = vld [vmem:[%s2552_s27 + $0x20] sm:$0xff] (%p2093_p5)  ;;  %v1536_v9 = vld [vmem:[%s2552_s27 + $0x30] sm:$0xff] (%p2093_p5) }
 0x1bd   : > { %1498 = vst [vmem:[%s2552_s27 + $0x60] sm:$0xff] %v1776_v61  ;;  %1500 = vst [vmem:[%s2552_s27 + $0x70] sm:$0xff] %v1784_v62  ;;  %v1534_v8 = vld [vmem:[%s2552_s27 + $0x28] sm:$0xff] (%p2093_p5)  ;;  %v1538_v10 = vld [vmem:[%s2552_s27 + $0x38] sm:$0xff] (%p2093_p5) }
 0x1be   : > { %1499 = vst [vmem:[%s2552_s27 + $0x68] sm:$0xff] %v1777_v1  ;;  %1501 = vst [vmem:[%s2552_s27 + $0x78] sm:$0xff] %v1785_v2 }
 0x1bf   : > { %1525 = vst [vmem:[%s1511_s30] sm:$0xff] %v1524_v3  ;;  %1527 = vst [vmem:[%s1511_s30 + $0x8] sm:$0xff] %v1526_v4 }
 0x1c0   : > { %1529 = vst [vmem:[%s1511_s30 + $0x10] sm:$0xff] %v1528_v5  ;;  %1531 = vst [vmem:[%s1511_s30 + $0x18] sm:$0xff] %v1530_v6 }
 0x1c1   : > { %1533 = vst [vmem:[%s1511_s30 + $0x40] sm:$0xff] %v1532_v7  ;;  %1535 = vst [vmem:[%s1511_s30 + $0x48] sm:$0xff] %v1534_v8 }
 0x1c2   : > { %v1540_v11 = vld [vmem:[%s2552_s27 + $0x40] sm:$0xff]  ;;  %1537 = vst [vmem:[%s1511_s30 + $0x50] sm:$0xff] %v1536_v9  ;;  %1539 = vst [vmem:[%s1511_s30 + $0x58] sm:$0xff] %v1538_v10  ;;  %v1544_v13 = vld [vmem:[%s2552_s27 + $0x50] sm:$0xff] }
 0x1c3   : > { %1541 = vst [vmem:[%s1511_s30 + $0x80] sm:$0xff] %v1540_v11  ;;  %v1542_v12 = vld [vmem:[%s2552_s27 + $0x48] sm:$0xff]  ;;  %v1546_v14 = vld [vmem:[%s2552_s27 + $0x58] sm:$0xff]  ;;  %1545 = vst [vmem:[%s1511_s30 + $0x90] sm:$0xff] %v1544_v13 }
 0x1c4   : > { %1543 = vst [vmem:[%s1511_s30 + $0x88] sm:$0xff] %v1542_v12  ;;  %1547 = vst [vmem:[%s1511_s30 + $0x98] sm:$0xff] %v1546_v14  ;;  %v1548_v15 = vld [vmem:[%s2552_s27 + $0x60] sm:$0xff]  ;;  %v1552_v17 = vld [vmem:[%s2552_s27 + $0x70] sm:$0xff] }
 0x1c5   : > { %v1550_v16 = vld [vmem:[%s2552_s27 + $0x68] sm:$0xff]  ;;  %1549 = vst [vmem:[%s1511_s30 + $0xc0] sm:$0xff] %v1548_v15  ;;  %1553 = vst [vmem:[%s1511_s30 + $0xd0] sm:$0xff] %v1552_v17  ;;  %v1554_v18 = vld [vmem:[%s2552_s27 + $0x78] sm:$0xff] }
 0x1c6   : > { %1551 = vst [vmem:[%s1511_s30 + $0xc8] sm:$0xff] %v1550_v16  ;;  %1555 = vst [vmem:[%s1511_s30 + $0xd8] sm:$0xff] %v1554_v18 }
 0x1c7 PF: > { %p10_p11 = scmp.ge.s32.totalorder %s2081_s16, 4   ;;  %s2607_s12 = smov %s2036_s13 }
 0x1c8   : > { %s2608_s13 = smov %s2091_s19  ;;  %s2609_s14 = smov %s2081_s16 }
 0x1c9   :  { %12 = sbr.rel (!%p10_p11) target bundleno = 2 (0x2), region = 116 }

// kernel: caption_cnn_forward.2
= control target key start
LH: loop header
LB: loop body
LE: loop exit
PB: predicated region body
PF: predicated region fallthrough
CT: control target
= control target key end

     0   :  { %s6336_s0 = inlined_call_operand.vmem [shape: f32[32,256], index: 0, kind: input, shape index: {}]   ;;  %s6337_s1 = inlined_call_operand.vmem [shape: s32[32,1], index: 1, kind: input, shape index: {}]   ;;  %s6338_s2 = inlined_call_operand.hbm [shape: bf16[12,768,256], index: 2, kind: input, shape index: {}]   ;;  %s6339_s3 = inlined_call_operand.hbm [shape: f32[12,1,256], index: 3, kind: input, shape index: {}]   ;;  %s6340_s4 = inlined_call_operand.hbm [shape: bf16[256,512], index: 4, kind: input, shape index: {}]   ;;  %s6341_s5 = inlined_call_operand.hbm [shape: f32[1,512], index: 5, kind: input, shape index: {}]   ;;  %s6342_s6 = inlined_call_operand.vmem [shape: f32[32,512], index: 6, kind: output, shape index: {}]  }
   0x1   :  { %6349 = sst [smem:[#allocation16_spill]] %s6338_s2 }
   0x2   :  { %11 = vsyncpa [#allocation4], 0 }
   0x3   :  { %13 = vsyncpa [#allocation4 + $0x1], 0 }
   0x4   :  { %14 = vsyncpa [#allocation6], 0 }
   0x5   :  { %16 = vsyncpa [#allocation6 + $0x1], 0 }
   0x6   :  { %17 = vsyncpa [#allocation9], 0  ;;  %s5299_s21 = smov 0   ;;  %s5301_s22 = smov 0  }
   0x7   :  { %s5303_s23 = smov 0   ;;  %s5305_s24 = smov 0  }
   0x8 LB: > { %s5318_s25 = sadd.s32 4294967295, %s5250_s24   ;;  %p85_p0 = scmp.ne.s32.totalorder %s5242_s22, %s5238_s21  ;;  %s5250_s24 = sphi %s5305_s24, %s6380_s24   ;;  %s5246_s23 = sphi %s5303_s23, %s6379_s23   ;;  %s5242_s22 = sphi %s5301_s22, %s6378_s22   ;;  %s5238_s21 = sphi %s5299_s21, %s6377_s21  }
   0x9   : > { %p6343_p1 = scmp.eq.s32.totalorder %s5318_s25, 0  ;;  %p3764_p2 = scmp.ge.s32.totalorder %s5250_s24, 1 }
   0xa   : > { %p185_p3 = scmp.lt.s32.totalorder %s5250_s24, 5  ;;  %s5252_s28 = smov [#allocation7]  }
   0xb   : > { %p5327_p5 = por %p6343_p1, %p85_p0  ;;  %s203_s29 = sshll.u32 %s5252_s28, 4  ;;  %s204_s29 = int_to_ptr.vmem [resolvable:$true] %s203_s29 }
   0xc   : > { %p5331_p6 = pnand %p3764_p2, %p185_p3  ;;  %s5253_s7 = smov [#allocation8]  }
   0xd   : > { %s6350_s26 = scalar_select %p5327_p5, 1, 0 }
   0xe   : > { %s6351_s27 = scalar_select %p5331_p6, 1, 0 }
   0xf   : > { %p4496_p7 = pneg %p5331_p6  ;;  %s217_s8 = sshll.u32 %s5253_s7, 4  ;;  %s5343_s8 = int_to_ptr.vmem [resolvable:$true] %s217_s8 }
  0x10   : > { %s5088_s11 = scalar_lea.hbm %s6340_s4, 8192 }
  0x11   : > { %p5339_p8 = pnand %p4496_p7, %p6343_p1  ;;  %p5089_p9 = scmp.ne.s32.totalorder %s6340_s4, %s5088_s11 }
  0x12   : > { %p5095_p13 = scmp.lt.u32.totalorder %s5088_s11, %s6340_s4 }
  0x13   : > { %p5090_p10 = pneg %p5339_p8 }
  0x15   : > { %p5091_p11 = pnand %p5090_p10, %p5089_p9 }
  0x17   : > { %p5092_p12 = pneg %p5091_p11 }
  0x19   : > { %p5097_p0 = pnand %p5095_p13, %p5092_p12 }
  0x1b   : > { %5100 = shalt.err (!%p5097_p0)
}
  0x1c   : > { %s5101_s16 = scalar_lea.vmem %s204_s29, 8192  ;;  %p5109_p4 = scmp.lt.s32.totalorder %s204_s29, %s204_s29 }
  0x1d   : > { %p5102_p2 = scmp.ne.s32.totalorder %s204_s29, %s5101_s16  ;;  %p5110_p1 = scmp.lt.s32.totalorder %s5101_s16, %s5101_s16 }
  0x1f   : > { %p5104_p3 = pnand %p5102_p2, %p5090_p10  ;;  %p5111_p5 = por %p5110_p1, %p5109_p4 }
  0x21   : > { %p5105_p7 = pneg %p5104_p3 }
  0x23   : > { %p5112_p6 = pnand %p5111_p5, %p5105_p7 }
  0x25   : > { %5115 = shalt.err (!%p5112_p6)
}
  0x26   : > { %s5254_s17 = smov 256   ;;  %s5255_s18 = smov 16  }
  0x27   : > { %4499 = dma.hbm_to_vmem [thread:$0]  (!%p5339_p8), %s6340_s4, 8192, %s204_s29, [#allocation6], %s5254_s17, %s5254_s17, %s5255_s18  }
  0x28   : > { %s5116_s7 = scalar_lea.hbm %s6341_s5, 64 }
  0x29   : > { %p5117_p9 = scmp.ne.s32.totalorder %s6341_s5, %s5116_s7  ;;  %p5123_p5 = scmp.lt.u32.totalorder %s5116_s7, %s6341_s5 }
  0x2b   : > { %p5119_p1 = pnand %p5117_p9, %p5090_p10 }
  0x2d   : > { %p5120_p4 = pneg %p5119_p1 }
  0x2f   : > { %p5125_p6 = pnand %p5123_p5, %p5120_p4 }
  0x31   : > { %5128 = shalt.err (!%p5125_p6)
}
  0x32   : > { %s5129_s29 = scalar_lea.vmem %s5343_s8, 64  ;;  %p5137_p0 = scmp.lt.s32.totalorder %s5343_s8, %s5343_s8 }
  0x33   : > { %p5130_p11 = scmp.ne.s32.totalorder %s5343_s8, %s5129_s29  ;;  %p5138_p2 = scmp.lt.s32.totalorder %s5129_s29, %s5129_s29 }
  0x35   : > { %p5132_p12 = pnand %p5130_p11, %p5090_p10  ;;  %p5139_p3 = por %p5138_p2, %p5137_p0 }
  0x37   : > { %p5133_p13 = pneg %p5132_p12 }
  0x39   : > { %p5140_p7 = pnand %p5139_p3, %p5133_p13 }
  0x3b   : > { %5143 = shalt.err (!%p5140_p7)
}
  0x3c   : > { %4502 = dma.hbm_to_vmem [thread:$0]  (!%p5339_p8), %s6341_s5, 64, %s5343_s8, [#allocation9]  }
  0x3d   : > { %s5393_s15 = sadd.s32 1, %s5250_s24   ;;  %s72_s30 = sadd.s32 1, %s5246_s23 }
  0x3e   : > { %s69_s16 = ssub.s32 %s5250_s24, %s5393_s15  ;;  %p79_p9 = scmp.ne.s32.totalorder %s5246_s23, %s5242_s22 }
  0x3f   : > { %p70_p10 = scmp.eq.s32.totalorder %s69_s16, 0  ;;  %p80_p1 = scmp.eq.s32.totalorder %s5250_s24, 0 }
  0x40   : > { %p4512_p4 = scmp.lt.s32.totalorder %s5250_s24, 4  ;;  %s5406_s18 = sand.u32 1, %s5246_s23  }
  0x41   : > { %s5403_s17 = scalar_select %p70_p10, %s5246_s23, %s72_s30  }
  0x42   : > { %p81_p5 = por %p80_p1, %p79_p9  ;;  %s4479_s19 = smul.u32 2304, %s5406_s18 }
  0x43   : > { %s4513_s20 = smul.u32 36864, %s5250_s24  ;;  %s6354_s2 = sld [smem:[#allocation16_spill]] }
  0x44   : > { %p5410_p8 = pnand %p4512_p4, %p81_p5  ;;  %s232_s9 = scalar_lea.vmem [#allocation3], %s4479_s19 }
  0x45   : > { %s240_s10 = sshll.u32 %s232_s9, 4  ;;  %s250_s11 = sand.u32 1, %s5250_s24   ;;  %s5419_s10 = int_to_ptr.vmem [resolvable:$true] %s240_s10 }
  0x46   : > { %s229_s12 = scalar_lea.sflag [#allocation4], %s5406_s18  ;;  %p5146_p11 = pneg %p5410_p8 }
  0x49   : > { %s5417_s7 = scalar_lea.hbm %s6354_s2, %s4513_s20  ;;  %s5149_s16 = scalar_lea.hbm %s6354_s2, 147456 }
  0x4a   : > { %s5144_s29 = scalar_lea.hbm %s5417_s7, 36864  ;;  %p5150_p0 = scmp.lt.u32.totalorder %s5417_s7, %s6354_s2 }
  0x4b   : > { %p5145_p6 = scmp.ne.s32.totalorder %s5417_s7, %s5144_s29  ;;  %p5151_p2 = scmp.lt.u32.totalorder %s5149_s16, %s5144_s29 }
  0x4c   : > { %p5153_p7 = scmp.lt.u32.totalorder %s5144_s29, %s5417_s7 }
  0x4d   : > { %p5147_p12 = pnand %p5146_p11, %p5145_p6  ;;  %p5152_p3 = por %p5151_p2, %p5150_p0 }
  0x4f   : > { %p5148_p13 = pneg %p5147_p12  ;;  %p5154_p10 = por %p5153_p7, %p5152_p3 }
  0x51   : > { %p5155_p9 = pnand %p5154_p10, %p5148_p13 }
  0x53   : > { %5158 = shalt.err (!%p5155_p9)
}
  0x54   : > { %s5159_s19 = scalar_lea.vmem %s5419_s10, 36864  ;;  %s5256_s21 = smov [#allocation3]  }
  0x55   : > { %p5160_p1 = scmp.ne.s32.totalorder %s5419_s10, %s5159_s19  ;;  %s5164_s28 = sshll.u32 %s5256_s21, 4  ;;  %s5165_s28 = int_to_ptr.vmem [resolvable:$false] %s5164_s28 }
  0x56   : > { %s5166_s9 = scalar_lea.vmem %s5165_s28, 73728  ;;  %p5167_p6 = scmp.lt.s32.totalorder %s5419_s10, %s5165_s28 }
  0x57   : > { %p5162_p4 = pnand %p5160_p1, %p5146_p11  ;;  %p5168_p12 = scmp.lt.s32.totalorder %s5166_s9, %s5159_s19 }
  0x59   : > { %p5163_p5 = pneg %p5162_p4  ;;  %p5169_p0 = por %p5168_p12, %p5167_p6 }
  0x5b   : > { %p5170_p2 = pnand %p5169_p0, %p5163_p5 }
  0x5d   : > { %5173 = shalt.err (!%p5170_p2)
}
  0x5e   : > { %s5257_s29 = smov 128   ;;  %s5258_s13 = smov 8  }
  0x5f   : > { %4506 = dma.hbm_to_vmem [thread:$0]  (!%p5410_p8), %s5417_s7, 36864, %s5419_s10, %s229_s12, %s5257_s29, %s5257_s29, %s5258_s13  }
  0x60   : > { %s4481_s14 = smul.u32 6, %s5406_s18  ;;  %s5461_s9 = scalar_lea.sflag [#allocation6], %s250_s11 }
  0x61   : > { %s4398_s16 = smul.u32 96, %s5250_s24  ;;  %s5179_s10 = scalar_lea.hbm %s6339_s3, 384 }
  0x62   : > { %s254_s21 = scalar_lea.vmem [#allocation5], %s4481_s14 }
  0x63   : > { %s5455_s19 = scalar_lea.hbm %s6339_s3, %s4398_s16  ;;  %s262_s28 = sshll.u32 %s254_s21, 4  ;;  %s5457_s28 = int_to_ptr.vmem [resolvable:$true] %s262_s28 }
  0x64   : > { %s5174_s2 = scalar_lea.hbm %s5455_s19, 96  ;;  %p5180_p10 = scmp.lt.u32.totalorder %s5455_s19, %s6339_s3 }
  0x65   : > { %p5175_p13 = scmp.ne.s32.totalorder %s5455_s19, %s5174_s2  ;;  %p5181_p9 = scmp.lt.u32.totalorder %s5179_s10, %s5174_s2 }
  0x66   : > { %p5183_p4 = scmp.lt.u32.totalorder %s5174_s2, %s5455_s19 }
  0x67   : > { %p5177_p3 = pnand %p5175_p13, %p5146_p11  ;;  %p5182_p1 = por %p5181_p9, %p5180_p10 }
  0x69   : > { %p5178_p7 = pneg %p5177_p3  ;;  %p5184_p5 = por %p5183_p4, %p5182_p1 }
  0x6b   : > { %p5185_p6 = pnand %p5184_p5, %p5178_p7 }
  0x6d   : > { %5188 = shalt.err (!%p5185_p6)
}
  0x6e   : > { %s5189_s24 = scalar_lea.vmem %s5457_s28, 96  ;;  %s5259_s11 = smov [#allocation5]  }
  0x6f   : > { %p5190_p12 = scmp.ne.s32.totalorder %s5457_s28, %s5189_s24  ;;  %s5194_s13 = sshll.u32 %s5259_s11, 4  ;;  %s5195_s13 = int_to_ptr.vmem [resolvable:$false] %s5194_s13 }
  0x70   : > { %s5196_s14 = scalar_lea.vmem %s5195_s13, 192  ;;  %p5197_p13 = scmp.lt.s32.totalorder %s5457_s28, %s5195_s13 }
  0x71   : > { %p5192_p0 = pnand %p5190_p12, %p5146_p11  ;;  %p5198_p3 = scmp.lt.s32.totalorder %s5196_s14, %s5189_s24 }
  0x73   : > { %p5193_p2 = pneg %p5192_p0  ;;  %p5199_p10 = por %p5198_p3, %p5197_p13 }
  0x75   : > { %p5200_p9 = pnand %p5199_p10, %p5193_p2 }
  0x77   : > { %5203 = shalt.err (!%p5200_p9)
}
  0x78   : > { %s5260_s2 = smov 32   ;;  %s5261_s16 = smov 2  }
  0x79   : > { %4509 = dma.hbm_to_vmem [thread:$0]  (!%p5410_p8), %s5455_s19, 96, %s5457_s28, %s5461_s9, %s5260_s2, %s5260_s2, %s5261_s16  }
  0x7a   : > { %p6355_p11 = scmp.ne.s32.totalorder %s6351_s27, 0 }
  0x7c   : > { %274 = sbr.rel (%p6355_p11) target bundleno = 1578 (0x62a), region = 44 }
  0x83   : > { %s276_s30 = sand.u32 1, %s5242_s22   ;;  %p6356_p7 = scmp.ne.s32.totalorder %s6350_s26, 0 }
  0x84   : > { %s4482_s20 = smul.u32 2304, %s276_s30  ;;  %s277_s21 = scalar_lea.sflag [#allocation4], %s276_s30 }
  0x86   : > { %s5490_s18 = scalar_lea.vmem [#allocation3], %s4482_s20 }
  0x87   : > { %5221 = dma.done.wait (%p6356_p7), %s277_s21, 36864  }
  0x88   : > { %5223 = vsyncadd (%p6356_p7), %s277_s21, 4294930432  ;;  %s285_s7 = sand.u32 1, %s5318_s25   ;;  %s4483_s8 = smul.u32 6, %s276_s30 }
  0x89   : > { %s286_s19 = scalar_lea.sflag [#allocation6], %s285_s7 }
  0x8a   : > { %s5497_s28 = scalar_lea.vmem [#allocation5], %s4483_s8 }
  0x8b   : > { %5225 = dma.done.wait (%p6356_p7), %s286_s19, 96  }
  0x8c   : > { %5227 = vsyncadd (%p6356_p7), %s286_s19, 4294967200  ;;  %p6357_p8 = scmp.eq.s32.totalorder %s5318_s25, 0 }
  0x8e   : > { %5229 = dma.done.wait (%p6357_p8), [#allocation6], 8192   ;;  %p6358_p1 = pmov %p6357_p8 }
  0x90   : > { %5231 = vsyncadd (%p6358_p1), [#allocation6], 4294959104  ;;  %p6359_p4 = pmov %p6358_p1 }
  0x91   : > { %p6360_p5 = pmov %p6358_p1 }
  0x92   : > { %5233 = dma.done.wait (%p6359_p4), [#allocation9], 64  }
  0x93   : > { %5235 = vsyncadd (%p6360_p5), [#allocation9], 4294967232  ;;  %p6361_p6 = scmp.ne.s32.totalorder %s5318_s25, 0 }
  0x94   : > { %v334_v0 = vld [vmem:[%s6336_s0] sm:$0xff] (!%p6361_p6)  ;;  %v335_v1 = vld [vmem:[%s6336_s0 + $0x8] sm:$0xff] (!%p6361_p6)  ;;  %v336_v2 = vld [vmem:[%s6336_s0 + $0x10] sm:$0xff] (!%p6361_p6)  ;;  %v5262_v3 = vmov (!%p6361_p6), 0.0  }
  0x95   : > { %331 = sbr.rel (%p6361_p6) target bundleno = 156 (0x9c), region = 64  ;;  %332 = vst [vmem:[#allocation2] sm:$0xff] (!%p6361_p6), %v5262_v3  ;;  %333 = vst [vmem:[#allocation2 + $0x8] sm:$0xff] (!%p6361_p6), %v5262_v3  ;;  %v337_v4 = vld [vmem:[%s6336_s0 + $0x18] sm:$0xff] (!%p6361_p6)  ;;  %v338_v5 = vld [vmem:[%s6336_s0 + $0x20] sm:$0xff] (!%p6361_p6) }
  0x96   : > { %342 = vst [vmem:[#allocation2 + $0x10] sm:$0xff] (!%p6361_p6), %v334_v0  ;;  %343 = vst [vmem:[#allocation2 + $0x18] sm:$0xff] (!%p6361_p6), %v335_v1  ;;  %v339_v6 = vld [vmem:[%s6336_s0 + $0x28] sm:$0xff] (!%p6361_p6)  ;;  %v340_v7 = vld [vmem:[%s6336_s0 + $0x30] sm:$0xff] (!%p6361_p6) }
  0x97   : > { %344 = vst [vmem:[#allocation2 + $0x20] sm:$0xff] (!%p6361_p6), %v336_v2  ;;  %345 = vst [vmem:[#allocation2 + $0x28] sm:$0xff] (!%p6361_p6), %v337_v4  ;;  %v341_v8 = vld [vmem:[%s6336_s0 + $0x38] sm:$0xff] (!%p6361_p6) }
  0x98   : > { %346 = vst [vmem:[#allocation2 + $0x30] sm:$0xff] (!%p6361_p6), %v338_v5  ;;  %347 = vst [vmem:[#allocation2 + $0x38] sm:$0xff] (!%p6361_p6), %v339_v6 }
  0x99   : > { %348 = vst [vmem:[#allocation2 + $0x40] sm:$0xff] (!%p6361_p6), %v340_v7  ;;  %349 = vst [vmem:[#allocation2 + $0x48] sm:$0xff] (!%p6361_p6), %v341_v8 }
  0x9c PF: > { %v5540_v9 = vld [vmem:[%s6337_s1 + $0x10] sm:$0xff]  ;;  %v5545_v10 = vld [vmem:[%s6337_s1] sm:$0xff]  ;;  %v5550_v11 = vld [vmem:[%s6337_s1 + $0x18] sm:$0xff]  ;;  %v5263_v12 = vmov 0   ;;  %p4329_p12 = scmp.ne.s32.totalorder %s5318_s25, 3 }
  0x9d   : > { %4559 = vset.pattern.permute.xlu1 %v5263_v12  ;;  %4558 = vset.pattern.permute.xlu0 %v5263_v12  ;;  %vm356_vm0 = vcmp.ge.s32.totalorder %v5540_v9, 1  ;;  %vm354_vm1 = vcmp.ge.s32.totalorder %v5545_v10, 1  ;;  %vm357_vm2 = vcmp.ge.s32.totalorder %v5550_v11, 1  ;;  %v5560_v13 = vld [vmem:[%s6337_s1 + $0x8] sm:$0xff]  ;;  %v4560_v16 = vld [vmem:[%s5490_s18 + $0x104] ss:$8 sps:$4 sm:$0xff]  }
  0x9e   : > { %v453_v14 = vsel %vm356_vm0, 1, %v5263_v12  ;;  %v451_v15 = vsel %vm354_vm1, 1, %v5263_v12  ;;  %vm355_vm3 = vcmp.ge.s32.totalorder %v5560_v13, 1  ;;  %v454_v17 = vsel %vm357_vm2, 1, %v5263_v12  ;;  %v4562_v19 = vld [vmem:[%s5490_s18 + $0x100] ss:$8 sps:$4 sm:$0xff]   ;;  %1152 = vmatprep.subr.bf16.mxu0 %v4560_v16 }
  0x9f   : > { %462 = vperm.xlu1 %4559, %v453_v14   ;;  %456 = vperm.xlu0 %4558, %v451_v15   ;;  %v452_v18 = vsel %vm355_vm3, 1, %v5263_v12  ;;  %vm359_vm4 = vcmp.ge.s32.totalorder %v5560_v13, 2  ;;  %vm358_vm5 = vcmp.ge.s32.totalorder %v5545_v10, 2  ;;  %v4563_v20 = vld [vmem:[%s5490_s18 + $0x114] ss:$8 sps:$4 sm:$0xff]   ;;  %vm361_vm6 = vcmp.ge.s32.totalorder %v5550_v11, 2 }
  0xa0   : > { %1153 = vmatpush1.bf16.msra.mxu0 %v4562_v19  ;;  %v383_v21 = vsel %vm359_vm4, 1, %v5263_v12  ;;  %v382_v22 = vsel %vm358_vm5, 1, %v5263_v12  ;;  %v4565_v23 = vld [vmem:[%s5490_s18 + $0x4] ss:$8 sps:$4 sm:$0xff]   ;;  %vm360_vm7 = vcmp.ge.s32.totalorder %v5540_v9, 2  ;;  %v385_v28 = vsel %vm361_vm6, 1, %v5263_v12 }
  0xa1   : > { %1154 = vmatprep.subr.bf16.mxu0 %v4563_v20  ;;  %v4567_v24 = vld [vmem:[%s5490_s18 + $0x110] ss:$8 sps:$4 sm:$0xff]   ;;  %v4568_v25 = vld [vmem:[%s5490_s18] ss:$8 sps:$4 sm:$0xff]   ;;  %1099 = vmatprep.subr.bf16.mxu1 %v4565_v23  ;;  %v4569_v26 = vld [vmem:[%s5490_s18 + $0x124] ss:$8 sps:$4 sm:$0xff]  }
  0xa2   : > { %v4571_v27 = vld [vmem:[%s5490_s18 + $0x14] ss:$8 sps:$4 sm:$0xff]   ;;  %vm363_vm8 = vcmp.ge.s32.totalorder %v5560_v13, 4  ;;  %v4573_v29 = vld [vmem:[%s5490_s18 + $0x120] ss:$8 sps:$4 sm:$0xff]   ;;  %v384_v30 = vsel %vm360_vm7, 1, %v5263_v12  ;;  %1100 = vmatpush1.bf16.msra.mxu1 %v4568_v25 }
  0xa3   : > { %465 = vperm.xlu1 %4559, %v454_v17   ;;  %459 = vperm.xlu0 %4558, %v452_v18   ;;  %vm362_vm9 = vcmp.ge.s32.totalorder %v5545_v10, 4  ;;  %v4574_v31 = vld [vmem:[%s5490_s18 + $0x10] ss:$8 sps:$4 sm:$0xff]   ;;  %v4575_v32 = vld [vmem:[%s5490_s18 + $0x134] ss:$8 sps:$4 sm:$0xff]   ;;  %v1322_v34 = vsel %vm363_vm8, 1, %v5263_v12 }
  0xa4   : > { %1155 = vmatpush1.bf16.msra.mxu0 %v4567_v24  ;;  %1101 = vmatprep.subr.bf16.mxu1 %v4571_v27  ;;  %v4577_v33 = vld [vmem:[%s5490_s18 + $0x24] ss:$8 sps:$4 sm:$0xff]   ;;  %v1321_v35 = vsel %vm362_vm9, 1, %v5263_v12  ;;  %vm365_vm10 = vcmp.ge.s32.totalorder %v5550_v11, 4  ;;  %v4579_v36 = vld [vmem:[%s5490_s18 + $0x130] ss:$8 sps:$4 sm:$0xff]  }
  0xa5   : > { %1156 = vmatprep.subr.bf16.mxu0 %v4569_v26  ;;  %v4580_v37 = vld [vmem:[%s5490_s18 + $0x20] ss:$8 sps:$4 sm:$0xff]   ;;  %v4581_v38 = vld [vmem:[%s5490_s18 + $0x144] ss:$8 sps:$4 sm:$0xff]   ;;  %vm364_vm11 = vcmp.ge.s32.totalorder %v5540_v9, 4  ;;  %v1324_v40 = vsel %vm365_vm10, 1, %v5263_v12 }
  0xa6   : > { %1102 = vmatpush1.bf16.msra.mxu1 %v4574_v31  ;;  %v4583_v39 = vld [vmem:[%s5490_s18 + $0x34] ss:$8 sps:$4 sm:$0xff]   ;;  %vm367_vm12 = vcmp.ge.s32.totalorder %v5560_v13, 8  ;;  %v4585_v41 = vld [vmem:[%s5490_s18 + $0x140] ss:$8 sps:$4 sm:$0xff]   ;;  %v1323_v42 = vsel %vm364_vm11, 1, %v5263_v12 }
  0xa7   : > { %390 = vperm.xlu1 %4559, %v383_v21   ;;  %387 = vperm.xlu0 %4558, %v382_v22   ;;  %vm366_vm13 = vcmp.ge.s32.totalorder %v5545_v10, 8  ;;  %v4586_v43 = vld [vmem:[%s5490_s18 + $0x30] ss:$8 sps:$4 sm:$0xff]   ;;  %v4587_v44 = vld [vmem:[%s5490_s18 + $0x154] ss:$8 sps:$4 sm:$0xff]   ;;  %v2246_v46 = vsel %vm367_vm12, 1, %v5263_v12 }
  0xa8   : > { %1157 = vmatpush1.bf16.msra.mxu0 %v4573_v29  ;;  %1103 = vmatprep.subr.bf16.mxu1 %v4577_v33  ;;  %v4589_v45 = vld [vmem:[%s5490_s18 + $0x44] ss:$8 sps:$4 sm:$0xff]   ;;  %v2245_v47 = vsel %vm366_vm13, 1, %v5263_v12  ;;  %v4591_v48 = vld [vmem:[%s5490_s18 + $0x150] ss:$8 sps:$4 sm:$0xff]   ;;  %vm369_vm14 = vcmp.ge.s32.totalorder %v5550_v11, 8 }
  0xa9   : > { %1158 = vmatprep.subr.bf16.mxu0 %v4575_v32  ;;  %v4592_v49 = vld [vmem:[%s5490_s18 + $0x40] ss:$8 sps:$4 sm:$0xff]   ;;  %v4593_v50 = vld [vmem:[%s5490_s18 + $0x164] ss:$8 sps:$4 sm:$0xff]   ;;  %vm368_vm15 = vcmp.ge.s32.totalorder %v5540_v9, 8  ;;  %v2248_v53 = vsel %vm369_vm14, 1, %v5263_v12 }
  0xaa   : > { %1104 = vmatpush1.bf16.msra.mxu1 %v4580_v37  ;;  %v4595_v51 = vld [vmem:[%s5490_s18 + $0x54] ss:$8 sps:$4 sm:$0xff]   ;;  %v4597_v52 = vld [vmem:[%s5490_s18 + $0x160] ss:$8 sps:$4 sm:$0xff]   ;;  %v2247_v54 = vsel %vm368_vm15, 1, %v5263_v12  ;;  %vm475_vm0 = vcmask 1040384  }
  0xab   : > { %396 = vperm.xlu1 %4559, %v385_v28   ;;  %393 = vperm.xlu0 %4558, %v384_v30   ;;  %v4598_v55 = vld [vmem:[%s5490_s18 + $0x50] ss:$8 sps:$4 sm:$0xff]   ;;  %v4599_v56 = vld [vmem:[%s5490_s18 + $0x174] ss:$8 sps:$4 sm:$0xff]   ;;  %v4601_v57 = vld [vmem:[%s5490_s18 + $0x64] ss:$8 sps:$4 sm:$0xff]  }
  0xac   : > { %1159 = vmatpush1.bf16.msra.mxu0 %v4579_v36  ;;  %1105 = vmatprep.subr.bf16.mxu1 %v4583_v39  ;;  %v4603_v58 = vld [vmem:[%s5490_s18 + $0x170] ss:$8 sps:$4 sm:$0xff]   ;;  %v4604_v59 = vld [vmem:[%s5490_s18 + $0x60] ss:$8 sps:$4 sm:$0xff]   ;;  %v4605_v60 = vld [vmem:[%s5490_s18 + $0x184] ss:$8 sps:$4 sm:$0xff]  }
  0xad   : > { %1160 = vmatprep.subr.bf16.mxu0 %v4581_v38  ;;  %v4607_v61 = vld [vmem:[%s5490_s18 + $0x74] ss:$8 sps:$4 sm:$0xff]   ;;  %v4609_v62 = vld [vmem:[%s5490_s18 + $0x180] ss:$8 sps:$4 sm:$0xff]   ;;  %v4610_v63 = vld [vmem:[%s5490_s18 + $0x70] ss:$8 sps:$4 sm:$0xff]  }
  0xae   : > { %1106 = vmatpush1.bf16.msra.mxu1 %v4586_v43  ;;  %v4611_v0 = vld [vmem:[%s5490_s18 + $0x194] ss:$8 sps:$4 sm:$0xff]   ;;  %v4613_v1 = vld [vmem:[%s5490_s18 + $0x84] ss:$8 sps:$4 sm:$0xff]   ;;  %v4615_v2 = vld [vmem:[%s5490_s18 + $0x190] ss:$8 sps:$4 sm:$0xff]  }
  0xaf   : > { %1329 = vperm.xlu1 %4559, %v1322_v34   ;;  %1326 = vperm.xlu0 %4558, %v1321_v35   ;;  %v4616_v3 = vld [vmem:[%s5490_s18 + $0x80] ss:$8 sps:$4 sm:$0xff]   ;;  %v4617_v4 = vld [vmem:[%s5490_s18 + $0x1a4] ss:$8 sps:$4 sm:$0xff]   ;;  %v4619_v5 = vld [vmem:[%s5490_s18 + $0x94] ss:$8 sps:$4 sm:$0xff]  }
  0xb0   : > { %1161 = vmatpush1.bf16.msra.mxu0 %v4585_v41  ;;  %1107 = vmatprep.subr.bf16.mxu1 %v4589_v45  ;;  %v4621_v6 = vld [vmem:[%s5490_s18 + $0x1a0] ss:$8 sps:$4 sm:$0xff]   ;;  %v4622_v7 = vld [vmem:[%s5490_s18 + $0x90] ss:$8 sps:$4 sm:$0xff]   ;;  %v4623_v8 = vld [vmem:[%s5490_s18 + $0x1b4] ss:$8 sps:$4 sm:$0xff]  }
  0xb1   : > { %1162 = vmatprep.subr.bf16.mxu0 %v4587_v44  ;;  %v4625_v9 = vld [vmem:[%s5490_s18 + $0xa4] ss:$8 sps:$4 sm:$0xff]   ;;  %v4627_v10 = vld [vmem:[%s5490_s18 + $0x1b0] ss:$8 sps:$4 sm:$0xff]   ;;  %v4628_v11 = vld [vmem:[%s5490_s18 + $0xa0] ss:$8 sps:$4 sm:$0xff]  }
  0xb2   : > { %1108 = vmatpush1.bf16.msra.mxu1 %v4592_v49  ;;  %v4629_v12 = vld [vmem:[%s5490_s18 + $0x1c4] ss:$8 sps:$4 sm:$0xff]   ;;  %v4631_v13 = vld [vmem:[%s5490_s18 + $0xb4] ss:$8 sps:$4 sm:$0xff]   ;;  %v4633_v14 = vld [vmem:[%s5490_s18 + $0x1c0] ss:$8 sps:$4 sm:$0xff]  }
  0xb3   : > { %1335 = vperm.xlu1 %4559, %v1324_v40   ;;  %1332 = vperm.xlu0 %4558, %v1323_v42   ;;  %v4634_v15 = vld [vmem:[%s5490_s18 + $0xb0] ss:$8 sps:$4 sm:$0xff]   ;;  %v4635_v16 = vld [vmem:[%s5490_s18 + $0x1d4] ss:$8 sps:$4 sm:$0xff]   ;;  %v4637_v17 = vld [vmem:[%s5490_s18 + $0xc4] ss:$8 sps:$4 sm:$0xff]  }
  0xb4   : > { %1163 = vmatpush1.bf16.msra.mxu0 %v4591_v48  ;;  %1109 = vmatprep.subr.bf16.mxu1 %v4595_v51  ;;  %v4639_v18 = vld [vmem:[%s5490_s18 + $0x1d0] ss:$8 sps:$4 sm:$0xff]   ;;  %v4640_v19 = vld [vmem:[%s5490_s18 + $0xc0] ss:$8 sps:$4 sm:$0xff]   ;;  %v4641_v20 = vld [vmem:[%s5490_s18 + $0x1e4] ss:$8 sps:$4 sm:$0xff]  }
  0xb5   : > { %1164 = vmatprep.subr.bf16.mxu0 %v4593_v50  ;;  %v4643_v21 = vld [vmem:[%s5490_s18 + $0xd4] ss:$8 sps:$4 sm:$0xff]   ;;  %v4645_v22 = vld [vmem:[%s5490_s18 + $0x1e0] ss:$8 sps:$4 sm:$0xff]   ;;  %v4646_v23 = vld [vmem:[%s5490_s18 + $0xd0] ss:$8 sps:$4 sm:$0xff]  }
  0xb6   : > { %1110 = vmatpush1.bf16.msra.mxu1 %v4598_v55  ;;  %v4647_v24 = vld [vmem:[%s5490_s18 + $0x1f4] ss:$8 sps:$4 sm:$0xff]   ;;  %v4649_v25 = vld [vmem:[%s5490_s18 + $0xe4] ss:$8 sps:$4 sm:$0xff]   ;;  %v4651_v26 = vld [vmem:[%s5490_s18 + $0x1f0] ss:$8 sps:$4 sm:$0xff]  }
  0xb7   : > { %2253 = vperm.xlu1 %4559, %v2246_v46   ;;  %2250 = vperm.xlu0 %4558, %v2245_v47   ;;  %v4652_v27 = vld [vmem:[%s5490_s18 + $0xe0] ss:$8 sps:$4 sm:$0xff]   ;;  %v4655_v28 = vld [vmem:[%s5490_s18 + $0x204] ss:$8 sps:$4 sm:$0xff]   ;;  %v4656_v29 = vld [vmem:[%s5490_s18 + $0xf4] ss:$8 sps:$4 sm:$0xff]  }
  0xb8   : > { %1165 = vmatpush1.bf16.msra.mxu0 %v4597_v52  ;;  %1111 = vmatprep.subr.bf16.mxu1 %v4601_v57  ;;  %v4658_v30 = vld [vmem:[%s5490_s18 + $0xf0] ss:$8 sps:$4 sm:$0xff]   ;;  %v5656_v31 = vld [vmem:[#allocation2 + $0x18] sm:$0xff]  ;;  %v448_v33 = vld [vmem:[#allocation2 + $0x8] sm:$0x80]  ;;  %vm412_vm1 = vcmask 1041408  }
  0xb9   : > { %1166 = vmatprep.subr.bf16.mxu0 %v4599_v56  ;;  %v5658_v32 = vld [vmem:[#allocation2 + $0x28] sm:$0xff]  ;;  %v5660_v34 = vld [vmem:[#allocation2 + $0x10] sm:$0xff]  ;;  %v5662_v35 = vld [vmem:[#allocation2 + $0x20] sm:$0xff]  ;;  %v480_v37 = vrot.slane %v5656_v31, 7  ;;  %v479_v40 = vrot.slane %v448_v33, 7  ;;  %v417_v48 = vrot.slane %v5656_v31, 6 }
  0xba   : > { %1112 = vmatpush1.bf16.msra.mxu1 %v4604_v59  ;;  %v447_v36 = vld [vmem:[#allocation2] sm:$0x80]  ;;  %v484_v38 = vrot.slane %v5658_v32, 7  ;;  %v450_v39 = vld [vmem:[#allocation2 + $0x48] sm:$0x7f]  ;;  %v5666_v43 = vld [vmem:[#allocation2 + $0x38] sm:$0xff] }
  0xbb   : > { %2259 = vperm.xlu1 %4559, %v2248_v53   ;;  %2256 = vperm.xlu0 %4558, %v2247_v54   ;;  %v379_v41 = vld [vmem:[#allocation2 + $0x8] sm:$0xc0]  ;;  %v378_v42 = vld [vmem:[#allocation2] sm:$0xc0]  ;;  %v476_v44 = vrot.slane %v447_v36, 7  ;;  %v477_v45 = vrot.slane %v5660_v34, 7  ;;  %v481_v49 = vsel %vm475_vm0, %v479_v40, %v480_v37 }
  0xbc   : > { %1167 = vmatpush1.bf16.msra.mxu0 %v4603_v58  ;;  %1113 = vmatprep.subr.bf16.mxu1 %v4607_v61  ;;  %v482_v46 = vrot.slane %v5662_v35, 7  ;;  %v485_v47 = vsel %vm475_vm0, %v480_v37, %v484_v38  ;;  %v421_v50 = vrot.slane %v5658_v32, 6  ;;  %v381_v51 = vld [vmem:[#allocation2 + $0x48] sm:$0x3f]  ;;  %v488_v52 = vrot.slane %v5666_v43, 7 }
  0xbd   : > { %1168 = vmatprep.subr.bf16.mxu0 %v4605_v60  ;;  %v492_v53 = vrot.slane %v450_v39, 7  ;;  %v416_v56 = vrot.slane %v379_v41, 6  ;;  %v414_v57 = vrot.slane %v5660_v34, 6  ;;  %v478_v58 = vsel %vm475_vm0, %v476_v44, %v477_v45  ;;  %v4664_v36 = vld [vmem:[%s5490_s18 + $0x224] ss:$8 sps:$4 sm:$0xff]  }
  0xbe   : > { %1114 = vmatpush1.bf16.msra.mxu1 %v4610_v63  ;;  %v483_v59 = vsel %vm475_vm0, %v477_v45, %v482_v46  ;;  %v413_v60 = vrot.slane %v378_v42, 6  ;;  %v419_v61 = vrot.slane %v5662_v35, 6  ;;  %v3884_v63 = vpack.c.bf16 %v485_v47, %v481_v49  ;;  %v4662_v44 = vld [vmem:[%s5490_s18 + $0x220] ss:$8 sps:$4 sm:$0xff]   ;;  %v4670_v49 = vld [vmem:[%s5490_s18 + $0x244] ss:$8 sps:$4 sm:$0xff]  }
  0xbf   : > { %1115 = vmatprep.subr.bf16.mxu1 %v4613_v1  ;;  %v5680_v1 = vld [vmem:[#allocation2 + $0x30] sm:$0xff]  ;;  %v516_v45 = vpack.c.bf16 %v5658_v32, %v5656_v31  ;;  %vm1351_vm14 = vcmask 1043456  }
  0xc0   : > { %1169 = vmatpush1.bf16.msra.mxu0 %v4609_v62  ;;  %v449_v62 = vld [vmem:[#allocation2 + $0x40] sm:$0x7f]  ;;  %v4820_v42 = vld [vmem:[%s5490_s18 + $0x564] ss:$8 sps:$4 sm:$0xff]  }
  0xc1   : > { %1170 = vmatprep.subr.bf16.mxu0 %v4611_v0  ;;  %v422_v0 = vsel %vm412_vm1, %v417_v48, %v421_v50 }
  0xc2   : > { %1116 = vmatpush1.bf16.msra.mxu1 %v4616_v3  ;;  %v493_v3 = vsel %vm475_vm0, %v488_v52, %v492_v53  ;;  %v4676_v53 = vld [vmem:[%s5490_s18 + $0x264] ss:$8 sps:$4 sm:$0xff]  }
  0xc3   : > { %1117 = vmatprep.subr.bf16.mxu1 %v4619_v5 }
  0xc4   : > { %1171 = vmatpush1.bf16.msra.mxu0 %v4615_v2  ;;  %v489_v2 = vsel %vm475_vm0, %v484_v38, %v488_v52  ;;  %v4671_v52 = vld [vmem:[%s5490_s18 + $0x250] ss:$8 sps:$4 sm:$0xff]  }
  0xc5   : > { %1172 = vmatprep.subr.bf16.mxu0 %v4617_v4 }
  0xc6   : > { %1118 = vmatpush1.bf16.msra.mxu1 %v4622_v7  ;;  %v3887_v7 = vpack.c.bf16 %v483_v59, %v478_v58  ;;  %v4680_v58 = vld [vmem:[%s5490_s18 + $0x280] ss:$8 sps:$4 sm:$0xff]   ;;  %v4685_v59 = vld [vmem:[%s5490_s18 + $0x294] ss:$8 sps:$4 sm:$0xff]  }
  0xc7   : > { %1119 = vmatprep.subr.bf16.mxu1 %v4625_v9  ;;  %v425_v9 = vrot.slane %v5666_v43, 6 }
  0xc8   : > { %1173 = vmatpush1.bf16.msra.mxu0 %v4621_v6  ;;  %v4653_v6 = vld [vmem:[%s5490_s18 + $0x200] ss:$8 sps:$4 sm:$0xff]  }
  0xc9   : > { %1174 = vmatprep.subr.bf16.mxu0 %v4623_v8  ;;  %v418_v8 = vsel %vm412_vm1, %v416_v56, %v417_v48  ;;  %v4665_v48 = vld [vmem:[%s5490_s18 + $0x230] ss:$8 sps:$4 sm:$0xff]  }
  0xca   : > { %1120 = vmatpush1.bf16.msra.mxu1 %v4628_v11  ;;  %v380_v11 = vld [vmem:[#allocation2 + $0x40] sm:$0x3f] }
  0xcb   : > { %1121 = vmatprep.subr.bf16.mxu1 %v4631_v13  ;;  %v415_v13 = vsel %vm412_vm1, %v413_v60, %v414_v57  ;;  %v4677_v56 = vld [vmem:[%s5490_s18 + $0x270] ss:$8 sps:$4 sm:$0xff]  }
  0xcc   : > { %1175 = vmatpush1.bf16.msra.mxu0 %v4627_v10  ;;  %v429_v10 = vrot.slane %v381_v51, 6  ;;  %v4673_v51 = vld [vmem:[%s5490_s18 + $0x254] ss:$8 sps:$4 sm:$0xff]   ;;  %v4683_v60 = vld [vmem:[%s5490_s18 + $0x290] ss:$8 sps:$4 sm:$0xff]  }
  0xcd   : > { %1176 = vmatprep.subr.bf16.mxu0 %v4629_v12  ;;  %v4661_v12 = vld [vmem:[%s5490_s18 + $0x214] ss:$8 sps:$4 sm:$0xff]  }
  0xce   : > { %1122 = vmatpush1.bf16.msra.mxu1 %v4634_v15  ;;  %v4704_v15 = vld [vmem:[%s5490_s18 + $0x300] ss:$8 sps:$4 sm:$0xff]  }
  0xcf   : > { %1123 = vmatprep.subr.bf16.mxu1 %v4637_v17  ;;  %v486_v17 = vrot.slane %v5680_v1, 7 }
  0xd0   : > { %1177 = vmatpush1.bf16.msra.mxu0 %v4633_v14  ;;  %v420_v14 = vsel %vm412_vm1, %v414_v57, %v419_v61  ;;  %v4682_v57 = vld [vmem:[%s5490_s18 + $0x284] ss:$8 sps:$4 sm:$0xff]  }
  0xd1   : > { %1178 = vmatprep.subr.bf16.mxu0 %v4635_v16  ;;  %v3890_v16 = vpack.c.bf16 %v493_v3, %v489_v2  ;;  %v4694_v2 = vld [vmem:[%s5490_s18 + $0x2c4] ss:$8 sps:$4 sm:$0xff]   ;;  %v4692_v3 = vld [vmem:[%s5490_s18 + $0x2c0] ss:$8 sps:$4 sm:$0xff]  }
  0xd2   : > { %1124 = vmatpush1.bf16.msra.mxu1 %v4640_v19  ;;  %v3872_v19 = vpack.c.bf16 %v422_v0, %v418_v8  ;;  %v4689_v0 = vld [vmem:[%s5490_s18 + $0x2b0] ss:$8 sps:$4 sm:$0xff]   ;;  %v4703_v8 = vld [vmem:[%s5490_s18 + $0x2f4] ss:$8 sps:$4 sm:$0xff]  }
  0xd3   : > { %1125 = vmatprep.subr.bf16.mxu1 %v4643_v21 }
  0xd4   : > { %1179 = vmatpush1.bf16.msra.mxu0 %v4639_v18  ;;  %v490_v18 = vrot.slane %v449_v62, 7  ;;  %v4686_v62 = vld [vmem:[%s5490_s18 + $0x2a0] ss:$8 sps:$4 sm:$0xff]  }
  0xd5   : > { %1180 = vmatprep.subr.bf16.mxu0 %v4641_v20 }
  0xd6   : > { %1126 = vmatpush1.bf16.msra.mxu1 %v4646_v23  ;;  %v426_v23 = vsel %vm412_vm1, %v421_v50, %v425_v9  ;;  %v4668_v50 = vld [vmem:[%s5490_s18 + $0x240] ss:$8 sps:$4 sm:$0xff]  }
  0xd7   : > { %1127 = vmatprep.subr.bf16.mxu1 %v4649_v25  ;;  %v423_v25 = vrot.slane %v5680_v1, 6 }
  0xd8   : > { %1181 = vmatpush1.bf16.msra.mxu0 %v4645_v22  ;;  %v3875_v22 = vpack.c.bf16 %v420_v14, %v415_v13  ;;  %v5760_v13 = vld [vmem:[#allocation2 + $0x40] sm:$0xff] }
  0xd9   : > { %1182 = vmatprep.subr.bf16.mxu0 %v4647_v24  ;;  %v430_v24 = vsel %vm412_vm1, %v425_v9, %v429_v10  ;;  %v424_v39 = vsel %vm412_vm1, %v419_v61, %v423_v25  ;;  %v4688_v61 = vld [vmem:[%s5490_s18 + $0x2a4] ss:$8 sps:$4 sm:$0xff]   ;;  %v4701_v9 = vld [vmem:[%s5490_s18 + $0x2f0] ss:$8 sps:$4 sm:$0xff]   ;;  %v521_v14 = vpack.c.bf16 %v5760_v13, %v5680_v1 }
  0xda   : > { %1128 = vmatpush1.bf16.msra.mxu1 %v4652_v27  ;;  %v3878_v33 = vpack.c.bf16 %v430_v24, %v426_v23  ;;  %v5754_v10 = vld [vmem:[#allocation2 + $0x48] sm:$0xff]  ;;  %v4718_v23 = vld [vmem:[%s5490_s18 + $0x344] ss:$8 sps:$4 sm:$0xff]   ;;  %v4716_v24 = vld [vmem:[%s5490_s18 + $0x340] ss:$8 sps:$4 sm:$0xff]  }
  0xdb   : > { %1129 = vmatprep.subr.bf16.mxu1 %v4656_v29  ;;  %v487_v29 = vsel %vm475_vm0, %v482_v46, %v486_v17  ;;  %v4667_v46 = vld [vmem:[%s5490_s18 + $0x234] ss:$8 sps:$4 sm:$0xff]   ;;  %v4806_v27 = vld [vmem:[%s5490_s18 + $0x520] ss:$8 sps:$4 sm:$0xff]  }
  0xdc   : > { %1183 = vmatpush1.bf16.msra.mxu0 %v4651_v26  ;;  %v427_v26 = vrot.slane %v380_v11, 6  ;;  %v515_v11 = vpack.c.bf16 %v5662_v35, %v5660_v34 }
  0xdd   : > { %1205 = vmatprep.subr.bf16.mxu0 %v4655_v28  ;;  %v4659_v28 = vld [vmem:[%s5490_s18 + $0x210] ss:$8 sps:$4 sm:$0xff]  }
  0xde   : > { %1130 = vmatpush1.bf16.msra.mxu1 %v4658_v30  ;;  %v491_v30 = vsel %vm475_vm0, %v486_v17, %v490_v18  ;;  %v428_v40 = vsel %vm412_vm1, %v423_v25, %v427_v26  ;;  %v4709_v17 = vld [vmem:[%s5490_s18 + $0x314] ss:$8 sps:$4 sm:$0xff]   ;;  %v4707_v18 = vld [vmem:[%s5490_s18 + $0x310] ss:$8 sps:$4 sm:$0xff]  }
  0xdf   : > { %v3893_v41 = vpack.c.bf16 %v491_v30, %v487_v29  ;;  %v3881_v47 = vpack.c.bf16 %v428_v40, %v424_v39  ;;  %v4721_v25 = vld [vmem:[%s5490_s18 + $0x354] ss:$8 sps:$4 sm:$0xff]   ;;  %v4719_v26 = vld [vmem:[%s5490_s18 + $0x350] ss:$8 sps:$4 sm:$0xff]   ;;  %v4722_v29 = vld [vmem:[%s5490_s18 + $0x360] ss:$8 sps:$4 sm:$0xff]  }
  0xe0   : > { %v4727_v30 = vld [vmem:[%s5490_s18 + $0x374] ss:$8 sps:$4 sm:$0xff]   ;;  %v4731_v39 = vld [vmem:[%s5490_s18 + $0x390] ss:$8 sps:$4 sm:$0xff]   ;;  %v4736_v40 = vld [vmem:[%s5490_s18 + $0x3a4] ss:$8 sps:$4 sm:$0xff]  }
 0x11e   : > { %v463_v54 = vpop.permute.xlu1 %462  ;;  %v457_v55 = vpop.permute.xlu0 %456 }
 0x11f   : > { %vm469_vm2 = vcmp.eq.s32.totalorder %v463_v54, 1  ;;  %vm467_vm5 = vcmp.eq.s32.totalorder %v457_v55, 1  ;;  %v4674_v54 = vld [vmem:[%s5490_s18 + $0x260] ss:$8 sps:$4 sm:$0xff]   ;;  %v4679_v55 = vld [vmem:[%s5490_s18 + $0x274] ss:$8 sps:$4 sm:$0xff]  }
 0x122   : > { %v466_v4 = vpop.permute.xlu1 %465  ;;  %v460_v5 = vpop.permute.xlu0 %459 }
 0x123   : > { %vm470_vm3 = vcmp.eq.s32.totalorder %v466_v4, 1  ;;  %vm468_vm4 = vcmp.eq.s32.totalorder %v460_v5, 1  ;;  %v4697_v4 = vld [vmem:[%s5490_s18 + $0x2d4] ss:$8 sps:$4 sm:$0xff]   ;;  %v4695_v5 = vld [vmem:[%s5490_s18 + $0x2d0] ss:$8 sps:$4 sm:$0xff]  }
 0x124   : > { %vm5691_vm6 = vmpackc.low %vm470_vm3, %vm469_vm2 }
 0x125   : > { %vm3883_vm7 = vmpackc.low %vm468_vm4, %vm467_vm5 }
 0x126   : > { %3885 = vmatprep.mubr.msk.bf16.mxu0 %vm3883_vm7, %v3884_v63  ;;  %v391_v20 = vpop.permute.xlu1 %390  ;;  %v388_v21 = vpop.permute.xlu0 %387  ;;  %v4691_v63 = vld [vmem:[%s5490_s18 + $0x2b4] ss:$8 sps:$4 sm:$0xff]  }
 0x127   : > { %vm399_vm8 = vcmp.eq.s32.totalorder %v391_v20, 1  ;;  %3888 = vmatmul.mubr.msk.bf16.vlgmr.msra.gmra.mrb[0].mxu0 %vm3883_vm7, %v3887_v7  ;;  %vm398_vm9 = vcmp.eq.s32.totalorder %v388_v21, 1  ;;  %v4698_v7 = vld [vmem:[%s5490_s18 + $0x2e0] ss:$8 sps:$4 sm:$0xff]   ;;  %v4715_v21 = vld [vmem:[%s5490_s18 + $0x334] ss:$8 sps:$4 sm:$0xff]  }
 0x128   : > { %1206 = vmatpush1.bf16.msra.mxu0 %v4653_v6  ;;  %vm5699_vm10 = vmpackc.low %vm399_vm8, %vm398_vm9  ;;  %3891 = vmatprep.mubr.msk.bf16.mxu0 %vm5691_vm6, %v3890_v16  ;;  %v4700_v6 = vld [vmem:[%s5490_s18 + $0x2e4] ss:$8 sps:$4 sm:$0xff]   ;;  %v4710_v20 = vld [vmem:[%s5490_s18 + $0x320] ss:$8 sps:$4 sm:$0xff]  }
 0x129   : > { %3873 = vmatprep.mubr.msk.bf16.mxu1 %vm5699_vm10, %v3872_v19  ;;  %1207 = vmatprep.subr.bf16.mxu0 %v4661_v12  ;;  %v522_v12 = vpack.c.bf16 %v5754_v10, %v5666_v43  ;;  %v4706_v16 = vld [vmem:[%s5490_s18 + $0x304] ss:$8 sps:$4 sm:$0xff]  }
 0x12a   : > { %v397_v37 = vpop.permute.xlu1 %396  ;;  %3876 = vmatmul.mubr.msk.bf16.vlgmr.msra.gmra.mrb[0].mxu1 %vm5699_vm10, %v3875_v22  ;;  %v394_v38 = vpop.permute.xlu0 %393  ;;  %2019 = vmatprep.subr.bf16.mxu1 %v4706_v16  ;;  %v4712_v19 = vld [vmem:[%s5490_s18 + $0x324] ss:$8 sps:$4 sm:$0xff]   ;;  %v4713_v22 = vld [vmem:[%s5490_s18 + $0x330] ss:$8 sps:$4 sm:$0xff]  }
 0x12b   : > { %vm401_vm11 = vcmp.eq.s32.totalorder %v397_v37, 1  ;;  %vm400_vm12 = vcmp.eq.s32.totalorder %v394_v38, 1  ;;  %2020 = vmatpush1.bf16.msra.mxu1 %v4704_v15  ;;  %v4728_v37 = vld [vmem:[%s5490_s18 + $0x380] ss:$8 sps:$4 sm:$0xff]   ;;  %v4733_v38 = vld [vmem:[%s5490_s18 + $0x394] ss:$8 sps:$4 sm:$0xff]  }
 0x12c   : > { %1208 = vmatpush1.bf16.msra.mxu0 %v4659_v28  ;;  %vm5715_vm13 = vmpackc.low %vm401_vm11, %vm400_vm12  ;;  %2021 = vmatprep.subr.bf16.mxu1 %v4709_v17  ;;  %v4724_v28 = vld [vmem:[%s5490_s18 + $0x364] ss:$8 sps:$4 sm:$0xff]  }
 0x12d   : > { %3879 = vmatprep.mubr.msk.bf16.mxu1 %vm5715_vm13, %v3878_v33  ;;  %1209 = vmatprep.subr.bf16.mxu0 %v4664_v36  ;;  %v4725_v33 = vld [vmem:[%s5490_s18 + $0x370] ss:$8 sps:$4 sm:$0xff]   ;;  %v4730_v36 = vld [vmem:[%s5490_s18 + $0x384] ss:$8 sps:$4 sm:$0xff]  }
 0x12f   : > { %3894 = vmatmul.mubr.msk.bf16.gmra.mrb[4].mxu0 %vm5691_vm6, %v3893_v41  ;;  %2022 = vmatpush1.bf16.msra.mxu1 %v4707_v18  ;;  %v4734_v41 = vld [vmem:[%s5490_s18 + $0x3a0] ss:$8 sps:$4 sm:$0xff]  }
 0x130   : > { %1210 = vmatpush1.bf16.msra.mxu0 %v4662_v44  ;;  %1237 = vmatprep.mubr.bf16.mxu0 %v516_v45  ;;  %v4739_v44 = vld [vmem:[%s5490_s18 + $0x3b4] ss:$8 sps:$4 sm:$0xff]   ;;  %v4737_v45 = vld [vmem:[%s5490_s18 + $0x3b0] ss:$8 sps:$4 sm:$0xff]  }
 0x131   : > { %1211 = vmatprep.subr.bf16.mxu0 %v4667_v46  ;;  %2023 = vmatprep.subr.bf16.mxu1 %v4712_v19  ;;  %v4742_v46 = vld [vmem:[%s5490_s18 + $0x3c4] ss:$8 sps:$4 sm:$0xff]  }
 0x132   : > { %3882 = vmatmul.mubr.msk.bf16.gmra.mrb[4].mxu1 %vm5715_vm13, %v3881_v47  ;;  %v4740_v47 = vld [vmem:[%s5490_s18 + $0x3c0] ss:$8 sps:$4 sm:$0xff]  }
 0x133   : > { %2024 = vmatpush1.bf16.msra.mxu1 %v4710_v20 }
 0x134   : > { %1212 = vmatpush1.bf16.msra.mxu0 %v4665_v48  ;;  %2025 = vmatprep.subr.bf16.mxu1 %v4715_v21  ;;  %v4745_v48 = vld [vmem:[%s5490_s18 + $0x3d4] ss:$8 sps:$4 sm:$0xff]  }
 0x135   : > { %1213 = vmatprep.subr.bf16.mxu0 %v4670_v49  ;;  %v4743_v49 = vld [vmem:[%s5490_s18 + $0x3d0] ss:$8 sps:$4 sm:$0xff]  }
 0x137   : > { %2026 = vmatpush1.bf16.msra.mxu1 %v4713_v22 }
 0x138   : > { %1214 = vmatpush1.bf16.msra.mxu0 %v4668_v50  ;;  %2027 = vmatprep.subr.bf16.mxu1 %v4718_v23  ;;  %v4748_v50 = vld [vmem:[%s5490_s18 + $0x3e4] ss:$8 sps:$4 sm:$0xff]  }
 0x139   : > { %1215 = vmatprep.subr.bf16.mxu0 %v4673_v51  ;;  %v4746_v51 = vld [vmem:[%s5490_s18 + $0x3e0] ss:$8 sps:$4 sm:$0xff]  }
 0x13b   : > { %2028 = vmatpush1.bf16.msra.mxu1 %v4716_v24 }
 0x13c   : > { %1216 = vmatpush1.bf16.msra.mxu0 %v4671_v52  ;;  %2029 = vmatprep.subr.bf16.mxu1 %v4721_v25  ;;  %v4751_v52 = vld [vmem:[%s5490_s18 + $0x3f4] ss:$8 sps:$4 sm:$0xff]  }
 0x13d   : > { %1217 = vmatprep.subr.bf16.mxu0 %v4676_v53  ;;  %v4749_v53 = vld [vmem:[%s5490_s18 + $0x3f0] ss:$8 sps:$4 sm:$0xff]   ;;  %v1317_v25 = vld [vmem:[#allocation2] sm:$0xf0] }
 0x13f   : > { %2030 = vmatpush1.bf16.msra.mxu1 %v4719_v26 }
 0x140   : > { %1218 = vmatpush1.bf16.msra.mxu0 %v4674_v54  ;;  %2031 = vmatprep.subr.bf16.mxu1 %v4724_v28  ;;  %v4754_v54 = vld [vmem:[%s5490_s18 + $0x404] ss:$8 sps:$4 sm:$0xff]  }
 0x141   : > { %1219 = vmatprep.subr.bf16.mxu0 %v4679_v55 }
 0x143   : > { %2032 = vmatpush1.bf16.msra.mxu1 %v4722_v29 }
 0x144   : > { %1220 = vmatpush1.bf16.msra.mxu0 %v4677_v56  ;;  %2033 = vmatprep.subr.bf16.mxu1 %v4727_v30  ;;  %v1318_v30 = vld [vmem:[#allocation2 + $0x8] sm:$0xf0] }
 0x145   : > { %1221 = vmatprep.subr.bf16.mxu0 %v4682_v57 }
 0x147   : > { %2034 = vmatpush1.bf16.msra.mxu1 %v4725_v33 }
 0x148   : > { %1222 = vmatpush1.bf16.msra.mxu0 %v4680_v58  ;;  %2035 = vmatprep.subr.bf16.mxu1 %v4730_v36 }
 0x149   : > { %1223 = vmatprep.subr.bf16.mxu0 %v4685_v59 }
 0x14b   : > { %2036 = vmatpush1.bf16.msra.mxu1 %v4728_v37 }
 0x14c   : > { %1224 = vmatpush1.bf16.msra.mxu0 %v4683_v60  ;;  %2037 = vmatprep.subr.bf16.mxu1 %v4733_v38 }
 0x14d   : > { %1225 = vmatprep.subr.bf16.mxu0 %v4688_v61 }
 0x14f   : > { %2038 = vmatpush1.bf16.msra.mxu1 %v4731_v39 }
 0x150   : > { %1226 = vmatpush1.bf16.msra.mxu0 %v4686_v62  ;;  %2039 = vmatprep.subr.bf16.mxu1 %v4736_v40 }
 0x151   : > { %1227 = vmatprep.subr.bf16.mxu0 %v4691_v63  ;;  %v1259_v63 = vlaneseq }
 0x153   : > { %2040 = vmatpush1.bf16.msra.mxu1 %v4734_v41  ;;  %v1352_v41 = vrot.slane %v1317_v25, 4 }
 0x154   : > { %1228 = vmatpush1.bf16.msra.mxu0 %v4689_v0  ;;  %2041 = vmatprep.subr.bf16.mxu1 %v4739_v44  ;;  %v5797_v0 = vshrl.u32 %v1259_v63, 7 }
 0x155   : > { %1229 = vmatprep.subr.bf16.mxu0 %v4694_v2 }
 0x156   : > { %6368 = vst [vmem:[#allocation14_spill] sm:$0xff] %v5797_v0  ;;  %v5800_v2 = vsub.s32 0, %v5797_v0 }
 0x157   : > { %2042 = vmatpush1.bf16.msra.mxu1 %v4737_v45 }
 0x158   : > { %1230 = vmatpush1.bf16.msra.mxu0 %v4692_v3  ;;  %2043 = vmatprep.subr.bf16.mxu1 %v4742_v46  ;;  %v510_v3 = vld [vmem:[%s5497_s28] sm:$0x3]  ;;  %v1355_v46 = vrot.slane %v1318_v30, 4 }
 0x159   : > { %1231 = vmatprep.subr.bf16.mxu0 %v4697_v4  ;;  %v5804_v4 = vsub.s32 1, %v5797_v0  ;;  %v4946_v0 = vld [vmem:[%s5490_s18 + $0x714] ss:$8 sps:$4 sm:$0xff]  }
 0x15b   : > { %2044 = vmatpush1.bf16.msra.mxu1 %v4740_v47  ;;  %6369 = vst [vmem:[#allocation15_spill] sm:$0xff] %v5804_v4  ;;  %v1327_v47 = vpop.permute.xlu0 %1326 }
 0x15c   : > { %1232 = vmatpush1.bf16.msra.mxu0 %v4695_v5  ;;  %2045 = vmatprep.subr.bf16.mxu1 %v4745_v48  ;;  %v1262_v5 = vrot.slane %v510_v3, %v5800_v2  ;;  %vm1337_vm0 = vcmp.eq.s32.totalorder %v1327_v47, 1 }
 0x15d   : > { %1233 = vmatprep.subr.bf16.mxu0 %v4700_v6 }
 0x15f   : > { %2046 = vmatpush1.bf16.msra.mxu1 %v4743_v49 }
 0x160   : > { %1234 = vmatpush1.bf16.msra.mxu0 %v4698_v7  ;;  %2047 = vmatprep.subr.bf16.mxu1 %v4748_v50  ;;  %v1266_v7 = vrot.slane %v510_v3, %v5804_v4 }
 0x161   : > { %1235 = vmatprep.subr.bf16.mxu0 %v4703_v8 }
 0x163   : > { %2048 = vmatpush1.bf16.msra.mxu1 %v4746_v51 }
 0x164   : > { %1236 = vmatpush1.bf16.msra.mxu0 %v4701_v9  ;;  %2049 = vmatprep.subr.bf16.mxu1 %v4751_v52 }
 0x167   : > { %1238 = vmatmul.mubr.bf16.vlgmr.msra.gmra.mrb[0].mxu0 %v515_v11  ;;  %2050 = vmatpush1.bf16.msra.mxu1 %v4749_v53 }
 0x168   : > { %1247 = vmatprep.mubr.bf16.mxu0 %v522_v12  ;;  %2072 = vmatprep.subr.bf16.mxu1 %v4754_v54 }
 0x16f   : > { %1248 = vmatmul.mubr.bf16.gmra.mrb[4].mxu0 %v521_v14 }
 0x1fd   : > { %v1133_v55 = vpop.f32.mrb[0].mxu1 }
 0x1fe   : > { %v1135_v56 = vpop.f32.mrb[1].mxu1 }
 0x1ff   : > { %v1137_v57 = vpop.f32.mrb[2].mxu1 }
 0x200   : > { %v1139_v58 = vpop.f32.mrb[3].mxu1 }
 0x205   : > { %v1143_v59 = vpop.f32.mrb[4].mxu1 }
 0x206   : > { %v1145_v60 = vpop.f32.mrb[5].mxu1 }
 0x207   : > { %v1147_v61 = vpop.f32.mrb[6].mxu1 }
 0x208   : > { %v1149_v62 = vpop.f32.mrb[7].mxu1 }
 0x23a   : > { %v1239_v6 = vpop.f32.mrb[0].mxu0 }
 0x23b   : > { %v4431_v8 = vadd.f32 %v1239_v6, %v1133_v55  ;;  %v1241_v9 = vpop.f32.mrb[1].mxu0 }
 0x23c   : > { %v4432_v11 = vadd.f32 %v1241_v9, %v1135_v56  ;;  %v1243_v12 = vpop.f32.mrb[2].mxu0 }
 0x23d   : > { %v1269_v14 = vadd.f32 %v4431_v8, %v1262_v5  ;;  %v4433_v15 = vadd.f32 %v1243_v12, %v1137_v57  ;;  %v1245_v16 = vpop.f32.mrb[3].mxu0 }
 0x23e   : > { %v1270_v17 = vadd.f32 %v4432_v11, %v1266_v7  ;;  %v4434_v18 = vadd.f32 %v1245_v16, %v1139_v58  ;;  %v4760_v16 = vld [vmem:[%s5490_s18 + $0x424] ss:$8 sps:$4 sm:$0xff]  }
 0x23f   : > { %v1277_v19 = vadd.f32 %v1269_v14, %v5660_v34  ;;  %v1271_v20 = vadd.f32 %v4433_v15, %v1262_v5  ;;  %v4755_v15 = vld [vmem:[%s5490_s18 + $0x410] ss:$8 sps:$4 sm:$0xff]  }
 0x240   : > { %v1278_v21 = vadd.f32 %v1270_v17, %v5656_v31  ;;  %v1272_v22 = vadd.f32 %v4434_v18, %v1266_v7  ;;  %v1387_v18 = vld [vmem:[#allocation2 + $0x8] sm:$0xc0] }
 0x241   : > { %v1285_v23 = vmul.f32 0.70710677, %v1277_v19  ;;  %v1279_v24 = vadd.f32 %v1271_v20, %v5662_v35  ;;  %v4758_v20 = vld [vmem:[%s5490_s18 + $0x420] ss:$8 sps:$4 sm:$0xff]  }
 0x242   : > { %v1286_v26 = vmul.f32 0.70710677, %v1278_v21  ;;  %v1280_v28 = vadd.f32 %v1272_v22, %v5658_v32  ;;  %v1249_v29 = vpop.f32.mrb[4].mxu0  ;;  %v1330_v32 = vpop.permute.xlu1 %1329  ;;  %v4763_v21 = vld [vmem:[%s5490_s18 + $0x434] ss:$8 sps:$4 sm:$0xff]   ;;  %v1397_v22 = vrot.slane %v1387_v18, 6 }
 0x243   : > { %v5812_v33 = vmax.f32 %v1285_v23, 0.0  ;;  %v1287_v36 = vmul.f32 0.70710677, %v1279_v24  ;;  %v4435_v37 = vadd.f32 %v1249_v29, %v1143_v59  ;;  %v1251_v38 = vpop.f32.mrb[5].mxu0  ;;  %vm1338_vm15 = vcmp.eq.s32.totalorder %v1330_v32, 1  ;;  %v1333_v24 = vpop.permute.xlu0 %1332 }
 0x244   : > { %v5814_v39 = vmax.f32 %v1286_v26, 0.0  ;;  %v1288_v34 = vmul.f32 0.70710677, %v1280_v28  ;;  %v4436_v40 = vadd.f32 %v1251_v38, %v1145_v60  ;;  %v1253_v31 = vpop.f32.mrb[6].mxu0  ;;  %vm5835_vm2 = vmpackc.low %vm1338_vm15, %vm1337_vm0  ;;  %v4761_v29 = vld [vmem:[%s5490_s18 + $0x430] ss:$8 sps:$4 sm:$0xff]  }
 0x245   : > { %v5816_v44 = vmax.f32 %v1287_v36, 0.0  ;;  %v4437_v35 = vadd.f32 %v1253_v31, %v1147_v61  ;;  %v1255_v45 = vpop.f32.mrb[7].mxu0  ;;  %v1273_v52 = vadd.f32 %v4435_v37, %v1262_v5  ;;  %v1353_v54 = vrot.slane %v5812_v33, 4  ;;  %v4848_v38 = vld [vmem:[%s5490_s18 + $0x600] ss:$8 sps:$4 sm:$0xff]  }
 0x246   : > { %v5818_v48 = vmax.f32 %v1288_v34, 0.0  ;;  %v1274_v49 = vadd.f32 %v4436_v40, %v1266_v7  ;;  %v4438_v50 = vadd.f32 %v1255_v45, %v1149_v62  ;;  %v1356_v51 = vrot.slane %v5814_v39, 4  ;;  %v1336_v23 = vpop.permute.xlu1 %1335  ;;  %v4766_v31 = vld [vmem:[%s5490_s18 + $0x444] ss:$8 sps:$4 sm:$0xff]   ;;  %v4853_v45 = vld [vmem:[%s5490_s18 + $0x614] ss:$8 sps:$4 sm:$0xff]  }
 0x247   : > { %v1275_v53 = vadd.f32 %v4437_v35, %v1262_v5  ;;  %v1358_v55 = vrot.slane %v5816_v44, 4  ;;  %v1281_v3 = vadd.f32 %v1273_v52, %v5680_v1  ;;  %v1398_v40 = vrot.slane %v5814_v39, 6  ;;  %v4784_v18 = vld [vmem:[%s5490_s18 + $0x4a4] ss:$8 sps:$4 sm:$0xff]  }
 0x248   : > { %v1276_v56 = vadd.f32 %v4438_v50, %v1266_v7  ;;  %v1360_v57 = vrot.slane %v5818_v48, 4  ;;  %v1282_v60 = vadd.f32 %v1274_v49, %v5666_v43  ;;  %v1357_v62 = vsel %vm1351_vm14, %v1355_v46, %v1356_v51  ;;  %v4752_v7 = vld [vmem:[%s5490_s18 + $0x400] ss:$8 sps:$4 sm:$0xff]  }
 0x249   : > { %v1283_v58 = vadd.f32 %v1275_v53, %v5760_v13  ;;  %v1359_v59 = vsel %vm1351_vm14, %v1353_v54, %v1358_v55  ;;  %v1354_v13 = vsel %vm1351_vm14, %v1352_v41, %v1353_v54  ;;  %v1289_v14 = vmul.f32 0.70710677, %v1281_v3  ;;  %v4850_v41 = vld [vmem:[%s5490_s18 + $0x604] ss:$8 sps:$4 sm:$0xff]   ;;  %v4775_v3 = vld [vmem:[%s5490_s18 + $0x474] ss:$8 sps:$4 sm:$0xff]  }
 0x24a   : > { %v1284_v61 = vadd.f32 %v1276_v56, %v5754_v10  ;;  %v1361_v63 = vsel %vm1351_vm14, %v1356_v51, %v1360_v57  ;;  %v4092_v9 = vpack.c.bf16 %v1359_v59, %v1354_v13  ;;  %v4757_v10 = vld [vmem:[%s5490_s18 + $0x414] ss:$8 sps:$4 sm:$0xff]   ;;  %v1290_v1 = vmul.f32 0.70710677, %v1282_v60  ;;  %2912 = vmatprep.subr.bf16.mxu0 %v4850_v41  ;;  %v4764_v51 = vld [vmem:[%s5490_s18 + $0x440] ss:$8 sps:$4 sm:$0xff]  }
 0x24b   : > { %v1291_v5 = vmul.f32 0.70710677, %v1283_v58  ;;  %v4089_v6 = vpack.c.bf16 %v1361_v63, %v1357_v62  ;;  %v5854_v19 = vmax.f32 %v1289_v14, 0.0  ;;  %v1402_v28 = vrot.slane %v5818_v48, 6  ;;  %2913 = vmatpush1.bf16.msra.mxu0 %v4848_v38  ;;  %v4769_v56 = vld [vmem:[%s5490_s18 + $0x454] ss:$8 sps:$4 sm:$0xff]  }
 0x24c   : > { %v1292_v43 = vmul.f32 0.70710677, %v1284_v61  ;;  %v5852_v17 = vmax.f32 %v1290_v1, 0.0  ;;  %vm1340_vm3 = vcmp.eq.s32.totalorder %v1336_v23, 1  ;;  %vm1339_vm4 = vcmp.eq.s32.totalorder %v1333_v24, 1  ;;  %2914 = vmatprep.subr.bf16.mxu0 %v4853_v45 }
 0x24d   : > { %v5840_v11 = vmax.f32 %v1291_v5, 0.0  ;;  %4090 = vmatprep.mubr.msk.bf16.mxu1 %vm5835_vm2, %v4089_v6  ;;  %v1362_v36 = vrot.slane %v5854_v19, 4  ;;  %v1403_v47 = vsel %vm412_vm1, %v1398_v40, %v1402_v28  ;;  %vm5877_vm5 = vmpackc.low %vm1340_vm3, %vm1339_vm4  ;;  %v1399_v54 = vsel %vm412_vm1, %v1397_v22, %v1398_v40  ;;  %v4856_v58 = vld [vmem:[%s5490_s18 + $0x624] ss:$8 sps:$4 sm:$0xff]   ;;  %v4767_v59 = vld [vmem:[%s5490_s18 + $0x450] ss:$8 sps:$4 sm:$0xff]  }
 0x24e   : > { %v5844_v12 = vmax.f32 %v1292_v43, 0.0  ;;  %4093 = vmatmul.mubr.msk.bf16.vlgmr.msra.gmra.mrb[8].mxu1 %vm5835_vm2, %v4092_v9  ;;  %v1364_v25 = vrot.slane %v5852_v17, 4  ;;  %v4772_v60 = vld [vmem:[%s5490_s18 + $0x464] ss:$8 sps:$4 sm:$0xff]   ;;  %v4854_v61 = vld [vmem:[%s5490_s18 + $0x620] ss:$8 sps:$4 sm:$0xff]  }
 0x24f   : > { %1307 = vst [vmem:[#allocation2 + $0x40] sm:$0xff] %v5840_v11  ;;  %2073 = vmatpush1.bf16.msra.mxu1 %v4752_v7  ;;  %v1363_v50 = vsel %vm1351_vm14, %v1358_v55, %v1362_v36  ;;  %v4101_v55 = vpack.c.bf16 %v1403_v47, %v1399_v54  ;;  %v4862_v62 = vld [vmem:[%s5490_s18 + $0x634] ss:$8 sps:$4 sm:$0xff]   ;;  %v4770_v63 = vld [vmem:[%s5490_s18 + $0x460] ss:$8 sps:$4 sm:$0xff]   ;;  %v1395_v54 = vrot.slane %v5812_v33, 6 }
 0x250   : > { %1308 = vst [vmem:[#allocation2 + $0x48] sm:$0xff] %v5844_v12  ;;  %2074 = vmatprep.subr.bf16.mxu1 %v4757_v10  ;;  %v1365_v46 = vsel %vm1351_vm14, %v1360_v57, %v1364_v25  ;;  %v4851_v57 = vld [vmem:[%s5490_s18 + $0x610] ss:$8 sps:$4 sm:$0xff]   ;;  %v4868_v6 = vld [vmem:[%s5490_s18 + $0x644] ss:$8 sps:$4 sm:$0xff]  }
 0x251   : > { %2915 = vmatpush1.bf16.msra.mxu0 %v4851_v57  ;;  %v4860_v5 = vld [vmem:[%s5490_s18 + $0x630] ss:$8 sps:$4 sm:$0xff]   ;;  %v4778_v13 = vld [vmem:[%s5490_s18 + $0x484] ss:$8 sps:$4 sm:$0xff]   ;;  %v4866_v43 = vld [vmem:[%s5490_s18 + $0x640] ss:$8 sps:$4 sm:$0xff]  }
 0x252   : > { %2916 = vmatprep.subr.bf16.mxu0 %v4856_v58  ;;  %v4773_v7 = vld [vmem:[%s5490_s18 + $0x470] ss:$8 sps:$4 sm:$0xff]   ;;  %v4874_v9 = vld [vmem:[%s5490_s18 + $0x654] ss:$8 sps:$4 sm:$0xff]   ;;  %v4776_v10 = vld [vmem:[%s5490_s18 + $0x480] ss:$8 sps:$4 sm:$0xff]  }
 0x253   : > { %2075 = vmatpush1.bf16.msra.mxu1 %v4755_v15  ;;  %v4781_v1 = vld [vmem:[%s5490_s18 + $0x494] ss:$8 sps:$4 sm:$0xff]   ;;  %v4872_v14 = vld [vmem:[%s5490_s18 + $0x650] ss:$8 sps:$4 sm:$0xff]   ;;  %v4880_v15 = vld [vmem:[%s5490_s18 + $0x664] ss:$8 sps:$4 sm:$0xff]  }
 0x254   : > { %2076 = vmatprep.subr.bf16.mxu1 %v4760_v16  ;;  %v4779_v16 = vld [vmem:[%s5490_s18 + $0x490] ss:$8 sps:$4 sm:$0xff]   ;;  %v4782_v22 = vld [vmem:[%s5490_s18 + $0x4a0] ss:$8 sps:$4 sm:$0xff]   ;;  %v4787_v23 = vld [vmem:[%s5490_s18 + $0x4b4] ss:$8 sps:$4 sm:$0xff]  }
 0x255   : > { %2917 = vmatpush1.bf16.msra.mxu0 %v4854_v61  ;;  %v4884_v24 = vld [vmem:[%s5490_s18 + $0x670] ss:$8 sps:$4 sm:$0xff]   ;;  %v4793_v38 = vld [vmem:[%s5490_s18 + $0x4d4] ss:$8 sps:$4 sm:$0xff]   ;;  %v4904_v40 = vld [vmem:[%s5490_s18 + $0x6a4] ss:$8 sps:$4 sm:$0xff]  }
 0x256   : > { %v1319_v26 = vld [vmem:[#allocation2 + $0x40] sm:$0xf]  ;;  %2918 = vmatprep.subr.bf16.mxu0 %v4862_v62  ;;  %v4796_v41 = vld [vmem:[%s5490_s18 + $0x4e4] ss:$8 sps:$4 sm:$0xff]   ;;  %v4794_v45 = vld [vmem:[%s5490_s18 + $0x4e0] ss:$8 sps:$4 sm:$0xff]  }
 0x257   : > { %v1320_v30 = vld [vmem:[#allocation2 + $0x48] sm:$0xf]  ;;  %v1366_v37 = vrot.slane %v1319_v26, 4  ;;  %2077 = vmatpush1.bf16.msra.mxu1 %v4758_v20  ;;  %v4878_v20 = vld [vmem:[%s5490_s18 + $0x660] ss:$8 sps:$4 sm:$0xff]   ;;  %v1406_v57 = vrot.slane %v5852_v17, 6 }
 0x258   : > { %v1368_v34 = vrot.slane %v1320_v30, 4  ;;  %2078 = vmatprep.subr.bf16.mxu1 %v4763_v21  ;;  %v4886_v21 = vld [vmem:[%s5490_s18 + $0x674] ss:$8 sps:$4 sm:$0xff]   ;;  %v4785_v26 = vld [vmem:[%s5490_s18 + $0x4b0] ss:$8 sps:$4 sm:$0xff]  }
 0x259   : > { %v1367_v35 = vsel %vm1351_vm14, %v1362_v36, %v1366_v37  ;;  %2919 = vmatpush1.bf16.msra.mxu0 %v4860_v5  ;;  %v4890_v30 = vld [vmem:[%s5490_s18 + $0x680] ss:$8 sps:$4 sm:$0xff]   ;;  %v4898_v36 = vld [vmem:[%s5490_s18 + $0x694] ss:$8 sps:$4 sm:$0xff]  }
 0x25a   : > { %v1369_v32 = vsel %vm1351_vm14, %v1364_v25, %v1368_v34  ;;  %v4098_v53 = vpack.c.bf16 %v1367_v35, %v1363_v50  ;;  %2920 = vmatprep.subr.bf16.mxu0 %v4868_v6  ;;  %v4892_v25 = vld [vmem:[%s5490_s18 + $0x684] ss:$8 sps:$4 sm:$0xff]   ;;  %v4788_v37 = vld [vmem:[%s5490_s18 + $0x4c0] ss:$8 sps:$4 sm:$0xff]   ;;  %v4896_v34 = vld [vmem:[%s5490_s18 + $0x690] ss:$8 sps:$4 sm:$0xff]  }
 0x25b   : > { %v4095_v49 = vpack.c.bf16 %v1369_v32, %v1365_v46  ;;  %2079 = vmatpush1.bf16.msra.mxu1 %v4761_v29  ;;  %v4790_v29 = vld [vmem:[%s5490_s18 + $0x4c4] ss:$8 sps:$4 sm:$0xff]   ;;  %v4902_v35 = vld [vmem:[%s5490_s18 + $0x6a0] ss:$8 sps:$4 sm:$0xff]   ;;  %v1389_v46 = vld [vmem:[#allocation2 + $0x48] sm:$0x3f] }
 0x25c   : > { %2080 = vmatprep.subr.bf16.mxu1 %v4766_v31  ;;  %v4791_v31 = vld [vmem:[%s5490_s18 + $0x4d0] ss:$8 sps:$4 sm:$0xff]   ;;  %v4799_v32 = vld [vmem:[%s5490_s18 + $0x4f4] ss:$8 sps:$4 sm:$0xff]   ;;  %v1410_v50 = vrot.slane %v1389_v46, 6 }
 0x25d   : > { %4096 = vmatprep.mubr.msk.bf16.mxu1 %vm5877_vm5, %v4095_v49  ;;  %2921 = vmatpush1.bf16.msra.mxu0 %v4866_v43  ;;  %v1386_v47 = vld [vmem:[#allocation2] sm:$0xc0]  ;;  %v1400_v49 = vrot.slane %v5816_v44, 6  ;;  %v4800_v61 = vld [vmem:[%s5490_s18 + $0x500] ss:$8 sps:$4 sm:$0xff]  }
 0x25e   : > { %4099 = vmatmul.mubr.msk.bf16.gmra.mrb[12].mxu1 %vm5877_vm5, %v4098_v53  ;;  %2922 = vmatprep.subr.bf16.mxu0 %v4874_v9  ;;  %v1394_v53 = vrot.slane %v1386_v47, 6  ;;  %v1411_v58 = vsel %vm412_vm1, %v1406_v57, %v1410_v50  ;;  %v4808_v43 = vld [vmem:[%s5490_s18 + $0x524] ss:$8 sps:$4 sm:$0xff]   ;;  %v4842_v46 = vld [vmem:[%s5490_s18 + $0x5e0] ss:$8 sps:$4 sm:$0xff]  }
 0x25f   : > { %4102 = vmatprep.mubr.msk.bf16.mxu1 %vm5699_vm10, %v4101_v55  ;;  %2081 = vmatpush1.bf16.msra.mxu1 %v4764_v51  ;;  %v4797_v51 = vld [vmem:[%s5490_s18 + $0x4f0] ss:$8 sps:$4 sm:$0xff]   ;;  %v1401_v55 = vsel %vm412_vm1, %v1395_v54, %v1400_v49  ;;  %v5985_v50 = vld [vmem:[%s5490_s18 + $0x800] ss:$8 sps:$4 sm:$0xff]  }
 0x260   : > { %2082 = vmatprep.subr.bf16.mxu1 %v4769_v56  ;;  %v4802_v56 = vld [vmem:[%s5490_s18 + $0x504] ss:$8 sps:$4 sm:$0xff]   ;;  %v4845_v47 = vld [vmem:[%s5490_s18 + $0x5f0] ss:$8 sps:$4 sm:$0xff]  }
 0x261   : > { %2923 = vmatpush1.bf16.msra.mxu0 %v4872_v14  ;;  %v1435_v14 = vpack.c.bf16 %v5818_v48, %v5814_v39 }
 0x262   : > { %2924 = vmatprep.subr.bf16.mxu0 %v4880_v15  ;;  %v4809_v15 = vld [vmem:[%s5490_s18 + $0x530] ss:$8 sps:$4 sm:$0xff]  }
 0x263   : > { %2083 = vmatpush1.bf16.msra.mxu1 %v4767_v59  ;;  %v1388_v59 = vld [vmem:[#allocation2 + $0x40] sm:$0x3f] }
 0x264   : > { %2084 = vmatprep.subr.bf16.mxu1 %v4772_v60  ;;  %v1396_v60 = vsel %vm412_vm1, %v1394_v53, %v1395_v54  ;;  %v1408_v6 = vrot.slane %v1388_v59, 6  ;;  %v5991_v53 = vld [vmem:[%s5490_s18 + $0x814] ss:$8 sps:$4 sm:$0xff]   ;;  %v1441_v54 = vpack.c.bf16 %v5844_v12, %v5852_v17 }
 0x265   : > { %2925 = vmatpush1.bf16.msra.mxu0 %v4878_v20  ;;  %v4104_v62 = vpack.c.bf16 %v1401_v55, %v1396_v60  ;;  %v4817_v20 = vld [vmem:[%s5490_s18 + $0x554] ss:$8 sps:$4 sm:$0xff]   ;;  %v6005_v55 = vld [vmem:[%s5490_s18 + $0x820] ss:$8 sps:$4 sm:$0xff]   ;;  %v6015_v60 = vld [vmem:[%s5490_s18 + $0x830] ss:$8 sps:$4 sm:$0xff]  }
 0x266   : > { %2926 = vmatprep.subr.bf16.mxu0 %v4886_v21  ;;  %v4815_v21 = vld [vmem:[%s5490_s18 + $0x550] ss:$8 sps:$4 sm:$0xff]   ;;  %v6011_v59 = vld [vmem:[%s5490_s18 + $0x834] ss:$8 sps:$4 sm:$0xff]  }
 0x267   : > { %2085 = vmatpush1.bf16.msra.mxu1 %v4770_v63  ;;  %v1407_v63 = vsel %vm412_vm1, %v1402_v28, %v1406_v57  ;;  %v6001_v57 = vld [vmem:[%s5490_s18 + $0x824] ss:$8 sps:$4 sm:$0xff]  }
 0x268   : > { %2086 = vmatprep.subr.bf16.mxu1 %v4775_v3  ;;  %v4805_v3 = vld [vmem:[%s5490_s18 + $0x514] ss:$8 sps:$4 sm:$0xff]   ;;  %v4107_v5 = vpack.c.bf16 %v1411_v58, %v1407_v63  ;;  %v1440_v58 = vpack.c.bf16 %v5840_v11, %v5854_v19 }
 0x269   : > { %2927 = vmatpush1.bf16.msra.mxu0 %v4884_v24  ;;  %v4821_v24 = vld [vmem:[%s5490_s18 + $0x570] ss:$8 sps:$4 sm:$0xff]   ;;  %v6027_v63 = vld [vmem:[%s5490_s18 + $0x854] ss:$8 sps:$4 sm:$0xff]  }
 0x26a   : > { %2928 = vmatprep.subr.bf16.mxu0 %v4892_v25  ;;  %v4826_v25 = vld [vmem:[%s5490_s18 + $0x584] ss:$8 sps:$4 sm:$0xff]  }
 0x26b   : > { %2087 = vmatpush1.bf16.msra.mxu1 %v4773_v7  ;;  %v4803_v7 = vld [vmem:[%s5490_s18 + $0x510] ss:$8 sps:$4 sm:$0xff]  }
 0x26c   : > { %2088 = vmatprep.subr.bf16.mxu1 %v4778_v13  ;;  %v1404_v13 = vrot.slane %v5854_v19, 6 }
 0x26d   : > { %2929 = vmatpush1.bf16.msra.mxu0 %v4890_v30  ;;  %v4827_v30 = vld [vmem:[%s5490_s18 + $0x590] ss:$8 sps:$4 sm:$0xff]  }
 0x26e   : > { %2930 = vmatprep.subr.bf16.mxu0 %v4898_v36  ;;  %v1409_v28 = vsel %vm412_vm1, %v1404_v13, %v1408_v6  ;;  %v1405_v9 = vsel %vm412_vm1, %v1400_v49, %v1404_v13  ;;  %v4832_v36 = vld [vmem:[%s5490_s18 + $0x5a4] ss:$8 sps:$4 sm:$0xff]   ;;  %v6039_v6 = vld [vmem:[%s5490_s18 + $0x860] ss:$8 sps:$4 sm:$0xff]   ;;  %v6047_v13 = vld [vmem:[%s5490_s18 + $0x870] ss:$8 sps:$4 sm:$0xff]  }
 0x26f   : > { %2089 = vmatpush1.bf16.msra.mxu1 %v4776_v10  ;;  %v4110_v10 = vpack.c.bf16 %v1409_v28, %v1405_v9  ;;  %v5982_v49 = vld [vmem:[%s5490_s18 + $0x804] ss:$8 sps:$4 sm:$0xff]   ;;  %v6055_v28 = vld [vmem:[%s5490_s18 + $0x880] ss:$8 sps:$4 sm:$0xff]   ;;  %v4910_v9 = vld [vmem:[%s5490_s18 + $0x6b4] ss:$8 sps:$4 sm:$0xff]  }
 0x270   : > { %2090 = vmatprep.subr.bf16.mxu1 %v4781_v1  ;;  %v4811_v1 = vld [vmem:[%s5490_s18 + $0x534] ss:$8 sps:$4 sm:$0xff]  }
 0x271   : > { %2931 = vmatpush1.bf16.msra.mxu0 %v4896_v34  ;;  %v4833_v34 = vld [vmem:[%s5490_s18 + $0x5b0] ss:$8 sps:$4 sm:$0xff]  }
 0x272   : > { %2932 = vmatprep.subr.bf16.mxu0 %v4904_v40  ;;  %v4838_v40 = vld [vmem:[%s5490_s18 + $0x5c4] ss:$8 sps:$4 sm:$0xff]  }
 0x273   : > { %2091 = vmatpush1.bf16.msra.mxu1 %v4779_v16  ;;  %v4814_v16 = vld [vmem:[%s5490_s18 + $0x544] ss:$8 sps:$4 sm:$0xff]  }
 0x274   : > { %2092 = vmatprep.subr.bf16.mxu1 %v4784_v18  ;;  %v4812_v18 = vld [vmem:[%s5490_s18 + $0x540] ss:$8 sps:$4 sm:$0xff]  }
 0x275   : > { %2933 = vmatpush1.bf16.msra.mxu0 %v4902_v35  ;;  %v4839_v35 = vld [vmem:[%s5490_s18 + $0x5d0] ss:$8 sps:$4 sm:$0xff]  }
 0x276   : > { %2934 = vmatprep.subr.bf16.mxu0 %v4910_v9 }
 0x277   : > { %2093 = vmatpush1.bf16.msra.mxu1 %v4782_v22  ;;  %v4818_v22 = vld [vmem:[%s5490_s18 + $0x560] ss:$8 sps:$4 sm:$0xff]  }
 0x278   : > { %2094 = vmatprep.subr.bf16.mxu1 %v4787_v23  ;;  %v4823_v23 = vld [vmem:[%s5490_s18 + $0x574] ss:$8 sps:$4 sm:$0xff]  }
 0x27b   : > { %2095 = vmatpush1.bf16.msra.mxu1 %v4785_v26  ;;  %v4824_v26 = vld [vmem:[%s5490_s18 + $0x580] ss:$8 sps:$4 sm:$0xff]  }
 0x27c   : > { %2096 = vmatprep.subr.bf16.mxu1 %v4790_v29  ;;  %v4829_v29 = vld [vmem:[%s5490_s18 + $0x594] ss:$8 sps:$4 sm:$0xff]  }
 0x27f   : > { %2097 = vmatpush1.bf16.msra.mxu1 %v4788_v37  ;;  %v4830_v37 = vld [vmem:[%s5490_s18 + $0x5a0] ss:$8 sps:$4 sm:$0xff]  }
 0x280   : > { %2098 = vmatprep.subr.bf16.mxu1 %v4793_v38  ;;  %v4835_v38 = vld [vmem:[%s5490_s18 + $0x5b4] ss:$8 sps:$4 sm:$0xff]  }
 0x283   : > { %2099 = vmatpush1.bf16.msra.mxu1 %v4791_v31  ;;  %v4836_v31 = vld [vmem:[%s5490_s18 + $0x5c0] ss:$8 sps:$4 sm:$0xff]  }
 0x284   : > { %2100 = vmatprep.subr.bf16.mxu1 %v4796_v41  ;;  %v4841_v41 = vld [vmem:[%s5490_s18 + $0x5d4] ss:$8 sps:$4 sm:$0xff]  }
 0x287   : > { %2101 = vmatpush1.bf16.msra.mxu1 %v4794_v45  ;;  %v4844_v45 = vld [vmem:[%s5490_s18 + $0x5e4] ss:$8 sps:$4 sm:$0xff]  }
 0x288   : > { %2102 = vmatprep.subr.bf16.mxu1 %v4799_v32  ;;  %v4847_v32 = vld [vmem:[%s5490_s18 + $0x5f4] ss:$8 sps:$4 sm:$0xff]  }
 0x28b   : > { %2103 = vmatpush1.bf16.msra.mxu1 %v4797_v51  ;;  %v1434_v51 = vpack.c.bf16 %v5816_v44, %v5812_v33 }
 0x28c   : > { %2125 = vmatprep.subr.bf16.mxu1 %v4802_v56  ;;  %v5997_v56 = vld [vmem:[%s5490_s18 + $0x810] ss:$8 sps:$4 sm:$0xff]  }
 0x28e   : > { %4105 = vmatmul.mubr.msk.bf16.vlgmr.msra.gmra.mrb[8].mxu1 %vm5699_vm10, %v4104_v62  ;;  %v6023_v62 = vld [vmem:[%s5490_s18 + $0x840] ss:$8 sps:$4 sm:$0xff]  }
 0x28f   : > { %4108 = vmatprep.mubr.msk.bf16.mxu1 %vm5715_vm13, %v4107_v5  ;;  %2126 = vmatpush1.bf16.msra.mxu1 %v4800_v61  ;;  %v6019_v61 = vld [vmem:[%s5490_s18 + $0x844] ss:$8 sps:$4 sm:$0xff]  }
 0x290   : > { %2127 = vmatprep.subr.bf16.mxu1 %v4805_v3  ;;  %v6031_v3 = vld [vmem:[%s5490_s18 + $0x850] ss:$8 sps:$4 sm:$0xff]   ;;  %v6035_v5 = vld [vmem:[%s5490_s18 + $0x864] ss:$8 sps:$4 sm:$0xff]  }
 0x293   : > { %2128 = vmatpush1.bf16.msra.mxu1 %v4803_v7  ;;  %v6043_v7 = vld [vmem:[%s5490_s18 + $0x874] ss:$8 sps:$4 sm:$0xff]  }
 0x294   : > { %2129 = vmatprep.subr.bf16.mxu1 %v4808_v43  ;;  %v6051_v43 = vld [vmem:[%s5490_s18 + $0x884] ss:$8 sps:$4 sm:$0xff]  }
 0x296   : > { %4111 = vmatmul.mubr.msk.bf16.gmra.mrb[12].mxu1 %vm5715_vm13, %v4110_v10  ;;  %v6062_v10 = vld [vmem:[%s5490_s18 + $0x894] ss:$8 sps:$4 sm:$0xff]  }
 0x297   : > { %2130 = vmatpush1.bf16.msra.mxu1 %v4806_v27  ;;  %2157 = vmatprep.mubr.bf16.mxu1 %v1435_v14  ;;  %v4908_v27 = vld [vmem:[%s5490_s18 + $0x6b0] ss:$8 sps:$4 sm:$0xff]   ;;  %v4916_v14 = vld [vmem:[%s5490_s18 + $0x6c4] ss:$8 sps:$4 sm:$0xff]  }
 0x298   : > { %2131 = vmatprep.subr.bf16.mxu1 %v4811_v1  ;;  %2935 = vmatpush1.bf16.msra.mxu0 %v4908_v27  ;;  %v6065_v1 = vld [vmem:[%s5490_s18 + $0x890] ss:$8 sps:$4 sm:$0xff]  }
 0x299   : > { %2936 = vmatprep.subr.bf16.mxu0 %v4916_v14  ;;  %v2254_v14 = vpop.permute.xlu1 %2253 }
 0x29a   : > { %vm2262_vm1 = vcmp.eq.s32.totalorder %v2254_v14, 1 }
 0x29b   : > { %2132 = vmatpush1.bf16.msra.mxu1 %v4809_v15  ;;  %v4914_v15 = vld [vmem:[%s5490_s18 + $0x6c0] ss:$8 sps:$4 sm:$0xff]  }
 0x29c   : > { %2133 = vmatprep.subr.bf16.mxu1 %v4814_v16  ;;  %2937 = vmatpush1.bf16.msra.mxu0 %v4914_v15  ;;  %v6072_v16 = vld [vmem:[%s5490_s18 + $0x8a4] ss:$8 sps:$4 sm:$0xff]  }
 0x29f   : > { %2134 = vmatpush1.bf16.msra.mxu1 %v4812_v18  ;;  %v6075_v18 = vld [vmem:[%s5490_s18 + $0x8a0] ss:$8 sps:$4 sm:$0xff]  }
 0x2a0   : > { %2135 = vmatprep.subr.bf16.mxu1 %v4817_v20  ;;  %v4922_v20 = vld [vmem:[%s5490_s18 + $0x6d4] ss:$8 sps:$4 sm:$0xff]  }
 0x2a1   : > { %2938 = vmatprep.subr.bf16.mxu0 %v4922_v20 }
 0x2a3   : > { %2136 = vmatpush1.bf16.msra.mxu1 %v4815_v21  ;;  %v4920_v21 = vld [vmem:[%s5490_s18 + $0x6d0] ss:$8 sps:$4 sm:$0xff]  }
 0x2a4   : > { %2137 = vmatprep.subr.bf16.mxu1 %v4820_v42  ;;  %2939 = vmatpush1.bf16.msra.mxu0 %v4920_v21  ;;  %v6082_v42 = vld [vmem:[%s5490_s18 + $0x8b4] ss:$8 sps:$4 sm:$0xff]   ;;  %v2251_v21 = vpop.permute.xlu0 %2250 }
 0x2a5   : > { %vm2261_vm6 = vcmp.eq.s32.totalorder %v2251_v21, 1 }
 0x2a6   : > { %vm4305_vm7 = vmpackc.low %vm2262_vm1, %vm2261_vm6 }
 0x2a7   : > { %2138 = vmatpush1.bf16.msra.mxu1 %v4818_v22  ;;  %v6085_v22 = vld [vmem:[%s5490_s18 + $0x8b0] ss:$8 sps:$4 sm:$0xff]  }
 0x2a8   : > { %2139 = vmatprep.subr.bf16.mxu1 %v4823_v23  ;;  %v4928_v23 = vld [vmem:[%s5490_s18 + $0x6e4] ss:$8 sps:$4 sm:$0xff]  }
 0x2a9   : > { %2940 = vmatprep.subr.bf16.mxu0 %v4928_v23 }
 0x2ab   : > { %2140 = vmatpush1.bf16.msra.mxu1 %v4821_v24  ;;  %v4926_v24 = vld [vmem:[%s5490_s18 + $0x6e0] ss:$8 sps:$4 sm:$0xff]  }
 0x2ac   : > { %2141 = vmatprep.subr.bf16.mxu1 %v4826_v25  ;;  %2941 = vmatpush1.bf16.msra.mxu0 %v4926_v24  ;;  %v6092_v25 = vld [vmem:[%s5490_s18 + $0x8c4] ss:$8 sps:$4 sm:$0xff]  }
 0x2af   : > { %2142 = vmatpush1.bf16.msra.mxu1 %v4824_v26  ;;  %v6095_v26 = vld [vmem:[%s5490_s18 + $0x8c0] ss:$8 sps:$4 sm:$0xff]  }
 0x2b0   : > { %2143 = vmatprep.subr.bf16.mxu1 %v4829_v29  ;;  %v4934_v29 = vld [vmem:[%s5490_s18 + $0x6f4] ss:$8 sps:$4 sm:$0xff]  }
 0x2b1   : > { %2942 = vmatprep.subr.bf16.mxu0 %v4934_v29 }
 0x2b3   : > { %2144 = vmatpush1.bf16.msra.mxu1 %v4827_v30  ;;  %v4932_v30 = vld [vmem:[%s5490_s18 + $0x6f0] ss:$8 sps:$4 sm:$0xff]  }
 0x2b4   : > { %2145 = vmatprep.subr.bf16.mxu1 %v4832_v36  ;;  %2943 = vmatpush1.bf16.msra.mxu0 %v4932_v30  ;;  %v6102_v36 = vld [vmem:[%s5490_s18 + $0x8d4] ss:$8 sps:$4 sm:$0xff]  }
 0x2b7   : > { %2146 = vmatpush1.bf16.msra.mxu1 %v4830_v37  ;;  %v6105_v37 = vld [vmem:[%s5490_s18 + $0x8d0] ss:$8 sps:$4 sm:$0xff]  }
 0x2b8   : > { %2147 = vmatprep.subr.bf16.mxu1 %v4835_v38  ;;  %v4940_v38 = vld [vmem:[%s5490_s18 + $0x704] ss:$8 sps:$4 sm:$0xff]  }
 0x2b9   : > { %2965 = vmatprep.subr.bf16.mxu0 %v4940_v38 }
 0x2bb   : > { %2148 = vmatpush1.bf16.msra.mxu1 %v4833_v34  ;;  %v6110_v34 = vld [vmem:[%s5490_s18 + $0x8e4] ss:$8 sps:$4 sm:$0xff]  }
 0x2bc   : > { %2149 = vmatprep.subr.bf16.mxu1 %v4838_v40  ;;  %v6114_v40 = vld [vmem:[%s5490_s18 + $0x8e0] ss:$8 sps:$4 sm:$0xff]  }
 0x2bf   : > { %2150 = vmatpush1.bf16.msra.mxu1 %v4836_v31  ;;  %v6118_v31 = vld [vmem:[%s5490_s18 + $0x8f4] ss:$8 sps:$4 sm:$0xff]  }
 0x2c0   : > { %2151 = vmatprep.subr.bf16.mxu1 %v4841_v41  ;;  %v6122_v41 = vld [vmem:[%s5490_s18 + $0x8f0] ss:$8 sps:$4 sm:$0xff]  }
 0x2c3   : > { %2152 = vmatpush1.bf16.msra.mxu1 %v4839_v35  ;;  %v3895_v35 = vld [vmem:[%s5497_s28 + $0x2] sm:$0x3] }
 0x2c4   : > { %2153 = vmatprep.subr.bf16.mxu1 %v4844_v45  ;;  %v2182_v45 = vrot.slane %v3895_v35, %v5800_v2 }
 0x2c7   : > { %2154 = vmatpush1.bf16.msra.mxu1 %v4842_v46  ;;  %v2186_v46 = vrot.slane %v3895_v35, %v5804_v4  ;;  %v2238_v35 = vld [vmem:[#allocation2 + $0x8] sm:$0xff] }
 0x2c8   : > { %2155 = vmatprep.subr.bf16.mxu1 %v4847_v32 }
 0x2cb   : > { %2156 = vmatpush1.bf16.msra.mxu1 %v4845_v47 }
 0x2cc   : > { %4399 = vmatprep.subr.bf16.mxu1 %v5982_v49 }
 0x2ce   : > { %2158 = vmatmul.mubr.bf16.vlgmr.msra.gmra.mrb[8].mxu1 %v1434_v51 }
 0x2cf   : > { %2167 = vmatprep.mubr.bf16.mxu1 %v1441_v54  ;;  %4415 = vmatpush1.bf16.msra.mxu1 %v5985_v50 }
 0x2d0   : > { %4400 = vmatprep.subr.bf16.mxu1 %v5991_v53 }
 0x2d3   : > { %4416 = vmatpush1.bf16.msra.mxu1 %v5997_v56 }
 0x2d4   : > { %4401 = vmatprep.subr.bf16.mxu1 %v6001_v57 }
 0x2d6   : > { %2168 = vmatmul.mubr.bf16.gmra.mrb[12].mxu1 %v1440_v58 }
 0x2d7   : > { %4417 = vmatpush1.bf16.msra.mxu1 %v6005_v55 }
 0x2d8   : > { %4402 = vmatprep.subr.bf16.mxu1 %v6011_v59 }
 0x2db   : > { %4418 = vmatpush1.bf16.msra.mxu1 %v6015_v60 }
 0x2dc   : > { %4403 = vmatprep.subr.bf16.mxu1 %v6019_v61 }
 0x2df   : > { %4419 = vmatpush1.bf16.msra.mxu1 %v6023_v62 }
 0x2e0   : > { %4404 = vmatprep.subr.bf16.mxu1 %v6027_v63 }
 0x2e3   : > { %4420 = vmatpush1.bf16.msra.mxu1 %v6031_v3 }
 0x2e4   : > { %4405 = vmatprep.subr.bf16.mxu1 %v6035_v5 }
 0x2e7   : > { %4421 = vmatpush1.bf16.msra.mxu1 %v6039_v6 }
 0x2e8   : > { %4406 = vmatprep.subr.bf16.mxu1 %v6043_v7 }
 0x2eb   : > { %4422 = vmatpush1.bf16.msra.mxu1 %v6047_v13 }
 0x2ec   : > { %4407 = vmatprep.subr.bf16.mxu1 %v6051_v43 }
 0x2ef   : > { %4423 = vmatpush1.bf16.msra.mxu1 %v6055_v28 }
 0x2f0   : > { %4408 = vmatprep.subr.bf16.mxu1 %v6062_v10 }
 0x2f3   : > { %4424 = vmatpush1.bf16.msra.mxu1 %v6065_v1 }
 0x2f4   : > { %4409 = vmatprep.subr.bf16.mxu1 %v6072_v16 }
 0x2f7   : > { %4425 = vmatpush1.bf16.msra.mxu1 %v6075_v18 }
 0x2f8   : > { %4410 = vmatprep.subr.bf16.mxu1 %v6082_v42 }
 0x2fb   : > { %4426 = vmatpush1.bf16.msra.mxu1 %v6085_v22 }
 0x2fc   : > { %4411 = vmatprep.subr.bf16.mxu1 %v6092_v25 }
 0x2ff   : > { %4427 = vmatpush1.bf16.msra.mxu1 %v6095_v26 }
 0x300   : > { %4412 = vmatprep.subr.bf16.mxu1 %v6102_v36 }
 0x303   : > { %4428 = vmatpush1.bf16.msra.mxu1 %v6105_v37 }
 0x304   : > { %4413 = vmatprep.subr.bf16.mxu1 %v6110_v34 }
 0x307   : > { %4429 = vmatpush1.bf16.msra.mxu1 %v6114_v40 }
 0x308   : > { %4414 = vmatprep.subr.bf16.mxu1 %v6118_v31 }
 0x30b   : > { %4430 = vmatpush1.bf16.msra.mxu1 %v6122_v41 }
 0x3a1   : > { %v2159_v32 = vpop.f32.mrb[8].mxu1 }
 0x3a2   : > { %v2189_v47 = vadd.f32 %v2182_v45, %v2159_v32  ;;  %v2161_v51 = vpop.f32.mrb[9].mxu1 }
 0x3a3   : > { %v2190_v54 = vadd.f32 %v2186_v46, %v2161_v51  ;;  %v2163_v58 = vpop.f32.mrb[10].mxu1  ;;  %v2237_v51 = vld [vmem:[#allocation2] sm:$0xff] }
 0x3a4   : > { %v2197_v9 = vadd.f32 %v2189_v47, %v5812_v33  ;;  %v2165_v27 = vpop.f32.mrb[11].mxu1  ;;  %v2191_v24 = vadd.f32 %v2182_v45, %v2163_v58 }
 0x3a5   : > { %v2198_v15 = vadd.f32 %v2190_v54, %v5814_v39  ;;  %v2192_v20 = vadd.f32 %v2186_v46, %v2165_v27 }
 0x3a6   : > { %v2205_v23 = vmul.f32 0.70710677, %v2197_v9  ;;  %v2199_v39 = vadd.f32 %v2191_v24, %v5816_v44  ;;  %v2274_v44 = vld [vmem:[#allocation2 + $0x8] sm:$0xf0] }
 0x3a7   : > { %v2206_v29 = vmul.f32 0.70710677, %v2198_v15  ;;  %v2200_v30 = vadd.f32 %v2192_v20, %v5818_v48  ;;  %v4938_v20 = vld [vmem:[%s5490_s18 + $0x700] ss:$8 sps:$4 sm:$0xff]  }
 0x3a8   : > { %v6132_v38 = vmax.f32 %v2205_v23, 0.0 }
 0x3a9   : > { %v6134_v32 = vmax.f32 %v2206_v29, 0.0  ;;  %v2208_v33 = vmul.f32 0.70710677, %v2200_v30  ;;  %v2169_v47 = vpop.f32.mrb[12].mxu1 }
 0x3aa   : > { %v2193_v54 = vadd.f32 %v2182_v45, %v2169_v47  ;;  %v2171_v9 = vpop.f32.mrb[13].mxu1  ;;  %v4309_v30 = vpack.c.bf16 %v6132_v38, %v2237_v51  ;;  %v2260_v47 = vpop.permute.xlu1 %2259 }
 0x3ab   : > { %v6137_v58 = vmax.f32 %v2208_v33, 0.0  ;;  %v2194_v27 = vadd.f32 %v2186_v46, %v2171_v9  ;;  %v2173_v48 = vpop.f32.mrb[14].mxu1  ;;  %v4306_v15 = vpack.c.bf16 %v6134_v32, %v2238_v35  ;;  %v2257_v9 = vpop.permute.xlu0 %2256  ;;  %v2207_v35 = vmul.f32 0.70710677, %v2199_v39 }
 0x3ac   : > { %v2201_v21 = vadd.f32 %v2193_v54, %v5854_v19  ;;  %v2195_v23 = vadd.f32 %v2182_v45, %v2173_v48  ;;  %v2175_v29 = vpop.f32.mrb[15].mxu1  ;;  %v4944_v54 = vld [vmem:[%s5490_s18 + $0x710] ss:$8 sps:$4 sm:$0xff]   ;;  %v2290_v48 = vrot.slane %v2274_v44, 4  ;;  %v2291_v39 = vrot.slane %v6134_v32, 4 }
 0x3ad   : > { %v2202_v24 = vadd.f32 %v2194_v27, %v5852_v17  ;;  %v2196_v33 = vadd.f32 %v2186_v46, %v2175_v29  ;;  %4307 = vmatprep.mubr.msk.bf16.mxu0 %vm4305_vm7, %v4306_v15  ;;  %v2295_v19 = vrot.slane %v6137_v58, 4  ;;  %v4952_v27 = vld [vmem:[%s5490_s18 + $0x724] ss:$8 sps:$4 sm:$0xff]   ;;  %vm2264_vm8 = vcmp.eq.s32.totalorder %v2260_v47, 1  ;;  %v4955_v44 = vld [vmem:[%s5490_s18 + $0x734] ss:$8 sps:$4 sm:$0xff]  }
 0x3ae   : > { %v2209_v4 = vmul.f32 0.70710677, %v2201_v21  ;;  %v2203_v14 = vadd.f32 %v2195_v23, %v5840_v11  ;;  %4310 = vmatmul.mubr.msk.bf16.vlgmr.msra.gmra.mrb[8].mxu0 %vm4305_vm7, %v4309_v30  ;;  %vm2263_vm9 = vcmp.eq.s32.totalorder %v2257_v9, 1  ;;  %v6156_v21 = vmax.f32 %v2207_v35, 0.0  ;;  %v4950_v23 = vld [vmem:[%s5490_s18 + $0x720] ss:$8 sps:$4 sm:$0xff]  }
 0x3af   : > { %v2210_v45 = vmul.f32 0.70710677, %v2202_v24  ;;  %v2204_v51 = vadd.f32 %v2196_v33, %v5844_v12  ;;  %2966 = vmatpush1.bf16.msra.mxu0 %v4938_v20  ;;  %vm4311_vm10 = vmpackc.low %vm2264_vm8, %vm2263_vm9  ;;  %v2292_v30 = vsel %vm1351_vm14, %v2290_v48, %v2291_v39  ;;  %v4953_v9 = vld [vmem:[%s5490_s18 + $0x730] ss:$8 sps:$4 sm:$0xff]   ;;  %v4958_v35 = vld [vmem:[%s5490_s18 + $0x744] ss:$8 sps:$4 sm:$0xff]   ;;  %v2328_v8 = vpack.c.bf16 %v6137_v58, %v6134_v32 }
 0x3b0   : > { %v6150_v17 = vmax.f32 %v2209_v4, 0.0  ;;  %v2211_v46 = vmul.f32 0.70710677, %v2203_v14  ;;  %2967 = vmatprep.subr.bf16.mxu0 %v4946_v0  ;;  %v2296_v4 = vsel %vm1351_vm14, %v2291_v39, %v2295_v19  ;;  %v4956_v14 = vld [vmem:[%s5490_s18 + $0x740] ss:$8 sps:$4 sm:$0xff]   ;;  %v2327_v52 = vpack.c.bf16 %v6156_v21, %v6132_v38 }
 0x3b1   : > { %v6154_v11 = vmax.f32 %v2210_v45, 0.0  ;;  %v2212_v15 = vmul.f32 0.70710677, %v2204_v51  ;;  %v4318_v24 = vpack.c.bf16 %v2296_v4, %v2292_v30  ;;  %v4961_v45 = vld [vmem:[%s5490_s18 + $0x754] ss:$8 sps:$4 sm:$0xff]  }
 0x3b2   : > { %v6158_v12 = vmax.f32 %v2211_v46, 0.0  ;;  %v4315_v29 = vpack.c.bf16 %v6150_v17, %v6156_v21  ;;  %v4959_v51 = vld [vmem:[%s5490_s18 + $0x750] ss:$8 sps:$4 sm:$0xff]   ;;  %v4962_v48 = vld [vmem:[%s5490_s18 + $0x760] ss:$8 sps:$4 sm:$0xff]  }
 0x3b3   : > { %v6163_v20 = vmax.f32 %v2212_v15, 0.0  ;;  %2968 = vmatpush1.bf16.msra.mxu0 %v4944_v54  ;;  %v4312_v0 = vpack.c.bf16 %v6154_v11, %v6137_v58  ;;  %v4964_v54 = vld [vmem:[%s5490_s18 + $0x764] ss:$8 sps:$4 sm:$0xff]   ;;  %v4967_v46 = vld [vmem:[%s5490_s18 + $0x774] ss:$8 sps:$4 sm:$0xff]  }
 0x3b4   : > { %2227 = vst [vmem:[#allocation2 + $0x40] sm:$0xff] %v6158_v12  ;;  %2969 = vmatprep.subr.bf16.mxu0 %v4952_v27  ;;  %v2333_v47 = vpack.c.bf16 %v6158_v12, %v6150_v17  ;;  %v4965_v27 = vld [vmem:[%s5490_s18 + $0x770] ss:$8 sps:$4 sm:$0xff]   ;;  %v4970_v39 = vld [vmem:[%s5490_s18 + $0x784] ss:$8 sps:$4 sm:$0xff]  }
 0x3b5   : > { %2228 = vst [vmem:[#allocation2 + $0x48] sm:$0xff] %v6163_v20  ;;  %4313 = vmatprep.mubr.msk.bf16.mxu0 %vm4311_vm10, %v4312_v0  ;;  %v2334_v33 = vpack.c.bf16 %v6163_v20, %v6154_v11  ;;  %v4968_v15 = vld [vmem:[%s5490_s18 + $0x780] ss:$8 sps:$4 sm:$0xff]   ;;  %v4973_v4 = vld [vmem:[%s5490_s18 + $0x794] ss:$8 sps:$4 sm:$0xff]  }
 0x3b6   : > { %4316 = vmatmul.mubr.msk.bf16.gmra.mrb[12].mxu0 %vm4311_vm10, %v4315_v29  ;;  %v4971_v0 = vld [vmem:[%s5490_s18 + $0x790] ss:$8 sps:$4 sm:$0xff]   ;;  %v4974_v29 = vld [vmem:[%s5490_s18 + $0x7a0] ss:$8 sps:$4 sm:$0xff]   ;;  %v4979_v30 = vld [vmem:[%s5490_s18 + $0x7b4] ss:$8 sps:$4 sm:$0xff]  }
 0x3b7   : > { %2970 = vmatpush1.bf16.msra.mxu0 %v4950_v23  ;;  %4319 = vmatprep.mubr.msk.bf16.mxu0 %vm5835_vm2, %v4318_v24  ;;  %v4976_v23 = vld [vmem:[%s5490_s18 + $0x7a4] ss:$8 sps:$4 sm:$0xff]  }
 0x3b8   : > { %3060 = vmatprep.mubr.bf16.mxu1 %v2334_v33  ;;  %2971 = vmatprep.subr.bf16.mxu0 %v4955_v44  ;;  %v4977_v44 = vld [vmem:[%s5490_s18 + $0x7b0] ss:$8 sps:$4 sm:$0xff]   ;;  %v4982_v24 = vld [vmem:[%s5490_s18 + $0x7c4] ss:$8 sps:$4 sm:$0xff]   ;;  %v4980_v33 = vld [vmem:[%s5490_s18 + $0x7c0] ss:$8 sps:$4 sm:$0xff]  }
 0x3b9   : > { %3061 = vmatmul.mubr.bf16.vlgmr.msra.gmra.mrb[16].mxu1 %v2333_v47  ;;  %v4985_v47 = vld [vmem:[%s5490_s18 + $0x7d4] ss:$8 sps:$4 sm:$0xff]  }
 0x3bb   : > { %2972 = vmatpush1.bf16.msra.mxu0 %v4953_v9  ;;  %v4983_v9 = vld [vmem:[%s5490_s18 + $0x7d0] ss:$8 sps:$4 sm:$0xff]  }
 0x3bc   : > { %2973 = vmatprep.subr.bf16.mxu0 %v4958_v35  ;;  %v4988_v35 = vld [vmem:[%s5490_s18 + $0x7e4] ss:$8 sps:$4 sm:$0xff]  }
 0x3bf   : > { %2974 = vmatpush1.bf16.msra.mxu0 %v4956_v14  ;;  %v4986_v14 = vld [vmem:[%s5490_s18 + $0x7e0] ss:$8 sps:$4 sm:$0xff]  }
 0x3c0   : > { %2975 = vmatprep.subr.bf16.mxu0 %v4961_v45  ;;  %v2276_v45 = vld [vmem:[#allocation2 + $0x48] sm:$0xf] }
 0x3c3   : > { %2976 = vmatpush1.bf16.msra.mxu0 %v4959_v51  ;;  %v4991_v51 = vld [vmem:[%s5490_s18 + $0x7f4] ss:$8 sps:$4 sm:$0xff]  }
 0x3c4   : > { %2977 = vmatprep.subr.bf16.mxu0 %v4964_v54  ;;  %v2273_v54 = vld [vmem:[#allocation2] sm:$0xf0] }
 0x3c7   : > { %2978 = vmatpush1.bf16.msra.mxu0 %v4962_v48  ;;  %v2293_v48 = vrot.slane %v6156_v21, 4 }
 0x3c8   : > { %2979 = vmatprep.subr.bf16.mxu0 %v4967_v46  ;;  %v2303_v46 = vrot.slane %v2276_v45, 4 }
 0x3cb   : > { %2980 = vmatpush1.bf16.msra.mxu0 %v4965_v27  ;;  %v4989_v27 = vld [vmem:[%s5490_s18 + $0x7f0] ss:$8 sps:$4 sm:$0xff]  }
 0x3cc   : > { %2981 = vmatprep.subr.bf16.mxu0 %v4970_v39  ;;  %v2287_v39 = vrot.slane %v2273_v54, 4 }
 0x3cf   : > { %2982 = vmatpush1.bf16.msra.mxu0 %v4968_v15  ;;  %v2288_v15 = vrot.slane %v6132_v38, 4 }
 0x3d0   : > { %2983 = vmatprep.subr.bf16.mxu0 %v4973_v4  ;;  %v2299_v4 = vrot.slane %v6154_v11, 4 }
 0x3d3   : > { %2984 = vmatpush1.bf16.msra.mxu0 %v4971_v0  ;;  %v2294_v0 = vsel %vm1351_vm14, %v2288_v15, %v2293_v48 }
 0x3d4   : > { %2985 = vmatprep.subr.bf16.mxu0 %v4976_v23  ;;  %v2304_v23 = vsel %vm1351_vm14, %v2299_v4, %v2303_v46 }
 0x3d7   : > { %2986 = vmatpush1.bf16.msra.mxu0 %v4974_v29  ;;  %v2275_v29 = vld [vmem:[#allocation2 + $0x40] sm:$0xf] }
 0x3d8   : > { %2987 = vmatprep.subr.bf16.mxu0 %v4979_v30  ;;  %v2289_v30 = vsel %vm1351_vm14, %v2287_v39, %v2288_v15 }
 0x3db   : > { %2988 = vmatpush1.bf16.msra.mxu0 %v4977_v44  ;;  %v4321_v44 = vpack.c.bf16 %v2294_v0, %v2289_v30 }
 0x3dc   : > { %2989 = vmatprep.subr.bf16.mxu0 %v4982_v24  ;;  %v2300_v24 = vsel %vm1351_vm14, %v2295_v19, %v2299_v4 }
 0x3df   : > { %2990 = vmatpush1.bf16.msra.mxu0 %v4980_v33  ;;  %v4324_v33 = vpack.c.bf16 %v2304_v23, %v2300_v24 }
 0x3e0   : > { %2991 = vmatprep.subr.bf16.mxu0 %v4985_v47  ;;  %v2301_v47 = vrot.slane %v2275_v29, 4 }
 0x3e3   : > { %2992 = vmatpush1.bf16.msra.mxu0 %v4983_v9  ;;  %v2297_v9 = vrot.slane %v6150_v17, 4 }
 0x3e4   : > { %2993 = vmatprep.subr.bf16.mxu0 %v4988_v35 }
 0x3e5   : > { %v2298_v19 = vsel %vm1351_vm14, %v2293_v48, %v2297_v9 }
 0x3e7   : > { %2994 = vmatpush1.bf16.msra.mxu0 %v4986_v14 }
 0x3e8   : > { %2995 = vmatprep.subr.bf16.mxu0 %v4991_v51 }
 0x3eb   : > { %2996 = vmatpush1.bf16.msra.mxu0 %v4989_v27 }
 0x3ec   : > { %3018 = vmatprep.subr.bf16.mxu0 %v5982_v49  ;;  %v2302_v49 = vsel %vm1351_vm14, %v2297_v9, %v2301_v47  ;;  %v4997_v47 = vld [vmem:[#allocation7 + $0x8] ss:$16 sps:$4 sm:$0xff] (!%p4329_p12)   ;;  %v5000_v9 = vld [vmem:[#allocation7 + $0x2c] ss:$16 sps:$4 sm:$0xff] (!%p4329_p12)  }
 0x3ed   : > { %v4327_v35 = vpack.c.bf16 %v2302_v49, %v2298_v19  ;;  %v5002_v49 = vld [vmem:[#allocation7 + $0x20] ss:$16 sps:$4 sm:$0xff] (!%p4329_p12)   ;;  %v5003_v19 = vld [vmem:[#allocation7 + $0x28] ss:$16 sps:$4 sm:$0xff] (!%p4329_p12)  }
 0x3ee   : > { %4322 = vmatmul.mubr.msk.bf16.vlgmr.msra.gmra.mrb[8].mxu0 %vm5835_vm2, %v4321_v44 }
 0x3ef   : > { %4325 = vmatprep.mubr.msk.bf16.mxu0 %vm5877_vm5, %v4324_v33  ;;  %3019 = vmatpush1.bf16.msra.mxu0 %v5985_v50 }
 0x3f0   : > { %3020 = vmatprep.subr.bf16.mxu0 %v5991_v53 }
 0x3f3   : > { %3021 = vmatpush1.bf16.msra.mxu0 %v5997_v56 }
 0x3f4   : > { %3022 = vmatprep.subr.bf16.mxu0 %v6001_v57 }
 0x3f6   : > { %4328 = vmatmul.mubr.msk.bf16.gmra.mrb[12].mxu0 %vm5877_vm5, %v4327_v35  ;;  %v5004_v35 = vld [vmem:[#allocation7 + $0x44] ss:$16 sps:$4 sm:$0xff] (!%p4329_p12)  }
 0x3f7   : > { %3023 = vmatpush1.bf16.msra.mxu0 %v6005_v55  ;;  %3050 = vmatprep.mubr.bf16.mxu0 %v2328_v8  ;;  %v4112_v55 = vld [vmem:[%s5497_s28 + $0x4] sm:$0x3] }
 0x3f8   : > { %3024 = vmatprep.subr.bf16.mxu0 %v6011_v59  ;;  %v3075_v59 = vrot.slane %v4112_v55, %v5800_v2  ;;  %v5006_v8 = vld [vmem:[#allocation7 + $0x4c] ss:$16 sps:$4 sm:$0xff] (!%p4329_p12)  }
 0x3fb   : > { %3025 = vmatpush1.bf16.msra.mxu0 %v6015_v60 }
 0x3fc   : > { %3026 = vmatprep.subr.bf16.mxu0 %v6019_v61  ;;  %v6374_v61 = vld [vmem:[#allocation15_spill] sm:$0xff] }
 0x3ff   : > { %3027 = vmatpush1.bf16.msra.mxu0 %v6023_v62  ;;  %v3079_v62 = vrot.slane %v4112_v55, %v6374_v61  ;;  %v5015_v55 = vld [vmem:[#allocation7 + $0x68] ss:$16 sps:$4 sm:$0xff] (!%p4329_p12)   ;;  %v5020_v61 = vld [vmem:[#allocation7 + $0x80] ss:$16 sps:$4 sm:$0xff] (!%p4329_p12)  }
 0x400   : > { %3028 = vmatprep.subr.bf16.mxu0 %v6027_v63 }
 0x403   : > { %3029 = vmatpush1.bf16.msra.mxu0 %v6031_v3 }
 0x404   : > { %3030 = vmatprep.subr.bf16.mxu0 %v6035_v5 }
 0x407   : > { %3031 = vmatpush1.bf16.msra.mxu0 %v6039_v6 }
 0x408   : > { %3032 = vmatprep.subr.bf16.mxu0 %v6043_v7 }
 0x40b   : > { %3033 = vmatpush1.bf16.msra.mxu0 %v6047_v13 }
 0x40c   : > { %3034 = vmatprep.subr.bf16.mxu0 %v6051_v43 }
 0x40f   : > { %3035 = vmatpush1.bf16.msra.mxu0 %v6055_v28 }
 0x410   : > { %3036 = vmatprep.subr.bf16.mxu0 %v6062_v10 }
 0x413   : > { %3037 = vmatpush1.bf16.msra.mxu0 %v6065_v1 }
 0x414   : > { %3038 = vmatprep.subr.bf16.mxu0 %v6072_v16 }
 0x417   : > { %3039 = vmatpush1.bf16.msra.mxu0 %v6075_v18 }
 0x418   : > { %3040 = vmatprep.subr.bf16.mxu0 %v6082_v42 }
 0x41b   : > { %3041 = vmatpush1.bf16.msra.mxu0 %v6085_v22 }
 0x41c   : > { %3042 = vmatprep.subr.bf16.mxu0 %v6092_v25 }
 0x41f   : > { %3043 = vmatpush1.bf16.msra.mxu0 %v6095_v26 }
 0x420   : > { %3044 = vmatprep.subr.bf16.mxu0 %v6102_v36 }
 0x423   : > { %3045 = vmatpush1.bf16.msra.mxu0 %v6105_v37 }
 0x424   : > { %3046 = vmatprep.subr.bf16.mxu0 %v6110_v34 }
 0x427   : > { %3047 = vmatpush1.bf16.msra.mxu0 %v6114_v40 }
 0x428   : > { %3048 = vmatprep.subr.bf16.mxu0 %v6118_v31 }
 0x42b   : > { %3049 = vmatpush1.bf16.msra.mxu0 %v6122_v41 }
 0x42e   : > { %3051 = vmatmul.mubr.bf16.vlgmr.msra.gmra.mrb[8].mxu0 %v2327_v52  ;;  %v5008_v52 = vld [vmem:[#allocation7 + $0x40] ss:$16 sps:$4 sm:$0xff] (!%p4329_p12)  }
 0x48c   : > { %v3062_v50 = vpop.f32.mrb[16].mxu1 }
 0x48d   : > { %v3064_v53 = vpop.f32.mrb[17].mxu1 }
 0x48e   : > { %v3066_v56 = vpop.f32.mrb[18].mxu1 }
 0x48f   : > { %v3068_v57 = vpop.f32.mrb[19].mxu1 }
 0x4c9   : > { %v3009_v60 = vpop.f32.mrb[12].mxu0 }
 0x4ca   : > { %v4439_v63 = vadd.f32 %v3062_v50, %v3009_v60  ;;  %v3011_v3 = vpop.f32.mrb[13].mxu0  ;;  %v5009_v50 = vld [vmem:[#allocation7 + $0x48] ss:$16 sps:$4 sm:$0xff] (!%p4329_p12)   ;;  %v5018_v60 = vld [vmem:[#allocation7 + $0x8c] ss:$16 sps:$4 sm:$0xff] (!%p4329_p12)  }
 0x4cb   : > { %v4440_v5 = vadd.f32 %v3064_v53, %v3011_v3  ;;  %v3013_v6 = vpop.f32.mrb[14].mxu0  ;;  %v5010_v53 = vld [vmem:[#allocation7 + $0x64] ss:$16 sps:$4 sm:$0xff] (!%p4329_p12)   ;;  %v5024_v3 = vld [vmem:[#allocation7 + $0xac] ss:$16 sps:$4 sm:$0xff] (!%p4329_p12)  }
 0x4cc   : > { %v3086_v7 = vadd.f32 %v4439_v63, %v3075_v59  ;;  %v4441_v13 = vadd.f32 %v3066_v56, %v3013_v6  ;;  %v3015_v43 = vpop.f32.mrb[15].mxu0  ;;  %v5012_v56 = vld [vmem:[#allocation7 + $0x6c] ss:$16 sps:$4 sm:$0xff] (!%p4329_p12)   ;;  %v5022_v63 = vld [vmem:[#allocation7 + $0xa4] ss:$16 sps:$4 sm:$0xff] (!%p4329_p12)  }
 0x4cd   : > { %v3087_v28 = vadd.f32 %v4440_v5, %v3079_v62  ;;  %v4442_v10 = vadd.f32 %v3068_v57, %v3015_v43  ;;  %v5014_v57 = vld [vmem:[#allocation7 + $0x60] ss:$16 sps:$4 sm:$0xff] (!%p4329_p12)   ;;  %v5027_v6 = vld [vmem:[#allocation7 + $0xa8] ss:$16 sps:$4 sm:$0xff] (!%p4329_p12)  }
 0x4ce   : > { %v3094_v1 = vadd.f32 %v3086_v7, %v6150_v17  ;;  %v3088_v16 = vadd.f32 %v4441_v13, %v3075_v59  ;;  %v5026_v5 = vld [vmem:[#allocation7 + $0xa0] ss:$16 sps:$4 sm:$0xff] (!%p4329_p12)   ;;  %v5028_v7 = vld [vmem:[#allocation7 + $0xc4] ss:$16 sps:$4 sm:$0xff] (!%p4329_p12)   ;;  %v5030_v13 = vld [vmem:[#allocation7 + $0xcc] ss:$16 sps:$4 sm:$0xff] (!%p4329_p12)  }
 0x4cf   : > { %v3095_v18 = vadd.f32 %v3087_v28, %v6154_v11  ;;  %v3089_v42 = vadd.f32 %v4442_v10, %v3079_v62  ;;  %v5032_v43 = vld [vmem:[#allocation7 + $0xc0] ss:$16 sps:$4 sm:$0xff] (!%p4329_p12)   ;;  %v5033_v28 = vld [vmem:[#allocation7 + $0xc8] ss:$16 sps:$4 sm:$0xff] (!%p4329_p12)   ;;  %v5034_v10 = vld [vmem:[#allocation7 + $0xe4] ss:$16 sps:$4 sm:$0xff] (!%p4329_p12)  }
 0x4d0   : > { %v3102_v22 = vmul.f32 0.70710677, %v3094_v1  ;;  %v3096_v25 = vadd.f32 %v3088_v16, %v6158_v12  ;;  %v5036_v1 = vld [vmem:[#allocation7 + $0xec] ss:$16 sps:$4 sm:$0xff] (!%p4329_p12)   ;;  %v5038_v16 = vld [vmem:[#allocation7 + $0xe0] ss:$16 sps:$4 sm:$0xff] (!%p4329_p12)  }
 0x4d1   : > { %v3103_v26 = vmul.f32 0.70710677, %v3095_v18  ;;  %v3097_v36 = vadd.f32 %v3089_v42, %v6163_v20  ;;  %v5039_v18 = vld [vmem:[#allocation7 + $0xe8] ss:$16 sps:$4 sm:$0xff] (!%p4329_p12)   ;;  %v5040_v42 = vld [vmem:[#allocation7 + $0x104] ss:$16 sps:$4 sm:$0xff] (!%p4329_p12)  }
 0x4d2   : > { %v3110_v37 = vmax.f32 %v3102_v22, 0.0  ;;  %v3104_v34 = vmul.f32 0.70710677, %v3096_v25  ;;  %v5042_v22 = vld [vmem:[#allocation7 + $0x10c] ss:$16 sps:$4 sm:$0xff] (!%p4329_p12)  }
 0x4d3   : > { %v3111_v40 = vmax.f32 %v3103_v26, 0.0  ;;  %v3105_v31 = vmul.f32 0.70710677, %v3097_v36  ;;  %v5044_v25 = vld [vmem:[#allocation7 + $0x100] ss:$16 sps:$4 sm:$0xff] (!%p4329_p12)  }
 0x4d4   : > { %3118 = vst [vmem:[#allocation2 + $0x30] sm:$0xff] %v3110_v37  ;;  %v3112_v41 = vmax.f32 %v3104_v34, 0.0  ;;  %v5045_v26 = vld [vmem:[#allocation7 + $0x108] ss:$16 sps:$4 sm:$0xff] (!%p4329_p12)   ;;  %v5046_v36 = vld [vmem:[#allocation7 + $0x124] ss:$16 sps:$4 sm:$0xff] (!%p4329_p12)  }
 0x4d5   : > { %3119 = vst [vmem:[#allocation2 + $0x38] sm:$0xff] %v3111_v40  ;;  %v3113_v14 = vmax.f32 %v3105_v31, 0.0  ;;  %v5048_v37 = vld [vmem:[#allocation7 + $0x12c] ss:$16 sps:$4 sm:$0xff] (!%p4329_p12)   ;;  %v5050_v34 = vld [vmem:[#allocation7 + $0x120] ss:$16 sps:$4 sm:$0xff] (!%p4329_p12)  }
 0x4d6   : > { %3120 = vst [vmem:[#allocation2 + $0x40] sm:$0xff] %v3112_v41  ;;  %v5051_v40 = vld [vmem:[#allocation7 + $0x128] ss:$16 sps:$4 sm:$0xff] (!%p4329_p12)   ;;  %v5052_v31 = vld [vmem:[#allocation7 + $0x144] ss:$16 sps:$4 sm:$0xff] (!%p4329_p12)  }
 0x4d7   : > { %3121 = vst [vmem:[#allocation2 + $0x48] sm:$0xff] %v3113_v14  ;;  %v5054_v41 = vld [vmem:[#allocation7 + $0x14c] ss:$16 sps:$4 sm:$0xff] (!%p4329_p12)   ;;  %v5056_v14 = vld [vmem:[#allocation7 + $0x140] ss:$16 sps:$4 sm:$0xff] (!%p4329_p12)  }
 0x501   : > { %v3052_v17 = vpop.f32.mrb[8].mxu0 }
 0x502   : > { %v3082_v45 = vadd.f32 %v3075_v59, %v3052_v17  ;;  %v3054_v11 = vpop.f32.mrb[9].mxu0  ;;  %v5057_v17 = vld [vmem:[#allocation7 + $0x148] ss:$16 sps:$4 sm:$0xff] (!%p4329_p12)  }
 0x503   : > { %v3083_v51 = vadd.f32 %v3079_v62, %v3054_v11  ;;  %v3056_v54 = vpop.f32.mrb[10].mxu0  ;;  %v5060_v11 = vld [vmem:[#allocation7 + $0x16c] ss:$16 sps:$4 sm:$0xff] (!%p4329_p12)  }
 0x504   : > { %v3090_v12 = vadd.f32 %v3082_v45, %v6132_v38  ;;  %v3084_v48 = vadd.f32 %v3075_v59, %v3056_v54  ;;  %v3058_v46 = vpop.f32.mrb[11].mxu0  ;;  %v4992_v38 = vld [vmem:[#allocation7 + $0x4] ss:$16 sps:$4 sm:$0xff] (!%p4329_p12)  }
 0x505   : > { %v3091_v20 = vadd.f32 %v3083_v51, %v6134_v32  ;;  %v3085_v27 = vadd.f32 %v3079_v62, %v3058_v46  ;;  %v4994_v32 = vld [vmem:[#allocation7 + $0xc] ss:$16 sps:$4 sm:$0xff] (!%p4329_p12)   ;;  %3544 = vmatprep.subr.bf16.mxu0 (!%p4329_p12), %v4992_v38  ;;  %v5016_v59 = vld [vmem:[#allocation7 + $0x84] ss:$16 sps:$4 sm:$0xff] (!%p4329_p12)   ;;  %v5021_v62 = vld [vmem:[#allocation7 + $0x88] ss:$16 sps:$4 sm:$0xff] (!%p4329_p12)  }
 0x506   : > { %v3098_v39 = vmul.f32 0.70710677, %v3090_v12  ;;  %v3092_v15 = vadd.f32 %v3084_v48, %v6156_v21  ;;  %v4996_v21 = vld [vmem:[#allocation7] ss:$16 sps:$4 sm:$0xff] (!%p4329_p12)   ;;  %3597 = vmatprep.subr.bf16.mxu1 (!%p4329_p12), %v4994_v32  ;;  %v5058_v45 = vld [vmem:[#allocation7 + $0x164] ss:$16 sps:$4 sm:$0xff] (!%p4329_p12)  }
 0x507   : > { %v3099_v4 = vmul.f32 0.70710677, %v3091_v20  ;;  %v3093_v0 = vadd.f32 %v3085_v27, %v6137_v58  ;;  %3125 = sbr.rel (%p4329_p12) target bundleno = 1578 (0x62a), region = 68  ;;  %v4998_v58 = vld [vmem:[#allocation7 + $0x24] ss:$16 sps:$4 sm:$0xff] (!%p4329_p12)   ;;  %3545 = vmatpush1.bf16.msra.mxu0 (!%p4329_p12), %v4996_v21  ;;  %3598 = vmatpush1.bf16.msra.mxu1 (!%p4329_p12), %v4997_v47 }
 0x508   : > { %v3106_v23 = vmax.f32 %v3098_v39, 0.0  ;;  %v3100_v29 = vmul.f32 0.70710677, %v3092_v15  ;;  %3546 = vmatprep.subr.bf16.mxu0 (!%p4329_p12), %v4998_v58  ;;  %3599 = vmatprep.subr.bf16.mxu1 (!%p4329_p12), %v5000_v9  ;;  %v5062_v12 = vld [vmem:[#allocation7 + $0x160] ss:$16 sps:$4 sm:$0xff] (!%p4329_p12)  }
 0x509   : > { %v3107_v30 = vmax.f32 %v3099_v4, 0.0  ;;  %v3101_v44 = vmul.f32 0.70710677, %v3093_v0  ;;  %v5063_v48 = vld [vmem:[#allocation7 + $0x168] ss:$16 sps:$4 sm:$0xff] (!%p4329_p12)  }
 0x50a   : > { %3114 = vst [vmem:[#allocation2 + $0x10] sm:$0xff] %v3106_v23  ;;  %v3108_v24 = vmax.f32 %v3100_v29, 0.0  ;;  %v5064_v20 = vld [vmem:[#allocation7 + $0x184] ss:$16 sps:$4 sm:$0xff] (!%p4329_p12)   ;;  %v5066_v27 = vld [vmem:[#allocation7 + $0x18c] ss:$16 sps:$4 sm:$0xff] (!%p4329_p12)  }
 0x50b   : > { %3115 = vst [vmem:[#allocation2 + $0x18] sm:$0xff] %v3107_v30  ;;  %v3109_v33 = vmax.f32 %v3101_v44, 0.0  ;;  %3547 = vmatpush1.bf16.msra.mxu0 (!%p4329_p12), %v5002_v49  ;;  %3600 = vmatpush1.bf16.msra.mxu1 (!%p4329_p12), %v5003_v19  ;;  %v5068_v39 = vld [vmem:[#allocation7 + $0x180] ss:$16 sps:$4 sm:$0xff] (!%p4329_p12)   ;;  %v5069_v15 = vld [vmem:[#allocation7 + $0x188] ss:$16 sps:$4 sm:$0xff] (!%p4329_p12)  }
 0x50c   : > { %3116 = vst [vmem:[#allocation2 + $0x20] sm:$0xff] %v3108_v24  ;;  %3548 = vmatprep.subr.bf16.mxu0 (!%p4329_p12), %v5004_v35  ;;  %3601 = vmatprep.subr.bf16.mxu1 (!%p4329_p12), %v5006_v8  ;;  %v5070_v4 = vld [vmem:[#allocation7 + $0x1a4] ss:$16 sps:$4 sm:$0xff] (!%p4329_p12)   ;;  %v5072_v0 = vld [vmem:[#allocation7 + $0x1ac] ss:$16 sps:$4 sm:$0xff] (!%p4329_p12)  }
 0x50d   : > { %3117 = vst [vmem:[#allocation2 + $0x28] sm:$0xff] %v3109_v33  ;;  %v5074_v23 = vld [vmem:[#allocation7 + $0x1a0] ss:$16 sps:$4 sm:$0xff] (!%p4329_p12)   ;;  %v5075_v29 = vld [vmem:[#allocation7 + $0x1a8] ss:$16 sps:$4 sm:$0xff] (!%p4329_p12)  }
 0x50e   : > { %v5076_v30 = vld [vmem:[#allocation7 + $0x1c4] ss:$16 sps:$4 sm:$0xff]   ;;  %v5078_v44 = vld [vmem:[#allocation7 + $0x1cc] ss:$16 sps:$4 sm:$0xff]   ;;  %v5080_v24 = vld [vmem:[#allocation7 + $0x1c0] ss:$16 sps:$4 sm:$0xff]  }
 0x50f   : > { %3549 = vmatpush1.bf16.msra.mxu0 %v5008_v52  ;;  %3602 = vmatpush1.bf16.msra.mxu1 %v5009_v50  ;;  %v5081_v33 = vld [vmem:[#allocation7 + $0x1c8] ss:$16 sps:$4 sm:$0xff]   ;;  %v5082_v38 = vld [vmem:[#allocation7 + $0x1e4] ss:$16 sps:$4 sm:$0xff]   ;;  %v5084_v32 = vld [vmem:[#allocation7 + $0x1ec] ss:$16 sps:$4 sm:$0xff]  }
 0x510   : > { %3550 = vmatprep.subr.bf16.mxu0 %v5010_v53  ;;  %3603 = vmatprep.subr.bf16.mxu1 %v5012_v56  ;;  %v5086_v21 = vld [vmem:[#allocation7 + $0x1e0] ss:$16 sps:$4 sm:$0xff]   ;;  %v5087_v47 = vld [vmem:[#allocation7 + $0x1e8] ss:$16 sps:$4 sm:$0xff]  }
 0x511   : > { %v3126_v58 = vld [vmem:[#allocation2 + $0x10] sm:$0xff]  ;;  %v3131_v49 = vld [vmem:[#allocation2 + $0x38] sm:$0xff]  ;;  %v3133_v19 = vld [vmem:[#allocation2 + $0x48] sm:$0xff] }
 0x512   : > { %v3127_v51 = vld [vmem:[#allocation2 + $0x18] sm:$0xff]  ;;  %v3137_v8 = vpack.c.bf16 %v3133_v19, %v3131_v49  ;;  %v3130_v52 = vld [vmem:[#allocation2 + $0x30] sm:$0xff]  ;;  %v3132_v50 = vld [vmem:[#allocation2 + $0x40] sm:$0xff] }
 0x513   : > { %3551 = vmatpush1.bf16.msra.mxu0 %v5014_v57  ;;  %3604 = vmatpush1.bf16.msra.mxu1 %v5015_v55  ;;  %v3128_v9 = vld [vmem:[#allocation2 + $0x20] sm:$0xff]  ;;  %v3136_v53 = vpack.c.bf16 %v3132_v50, %v3130_v52  ;;  %v3202_v55 = vld [vmem:[#allocation8] sm:$0xf] }
 0x514   : > { %3552 = vmatprep.subr.bf16.mxu0 %v5016_v59  ;;  %3605 = vmatprep.subr.bf16.mxu1 %v5018_v60  ;;  %v3129_v54 = vld [vmem:[#allocation2 + $0x28] sm:$0xff]  ;;  %v3134_v35 = vpack.c.bf16 %v3128_v9, %v3126_v58  ;;  %v6375_v56 = vld [vmem:[#allocation14_spill] sm:$0xff]  ;;  %v3207_v60 = vrot.slane %v3202_v55, %v5800_v2 }
 0x515   : > { %v3135_v46 = vpack.c.bf16 %v3129_v54, %v3127_v51  ;;  %v3214_v57 = vsub.s32 2, %v6375_v56  ;;  %v3218_v59 = vsub.s32 3, %v6375_v56 }
 0x517   : > { %3553 = vmatpush1.bf16.msra.mxu0 %v5020_v61  ;;  %3606 = vmatpush1.bf16.msra.mxu1 %v5021_v62  ;;  %v3215_v61 = vrot.slane %v3202_v55, %v3214_v57  ;;  %v6376_v62 = vld [vmem:[#allocation15_spill] sm:$0xff] }
 0x518   : > { %3554 = vmatprep.subr.bf16.mxu0 %v5022_v63  ;;  %3607 = vmatprep.subr.bf16.mxu1 %v5024_v3  ;;  %v3211_v63 = vrot.slane %v3202_v55, %v6376_v62  ;;  %v3219_v3 = vrot.slane %v3202_v55, %v3218_v59 }
 0x519   : > { %3576 = vmatprep.mubr.bf16.mxu0 %v3135_v46  ;;  %3629 = vmatprep.mubr.bf16.mxu1 %v3135_v46 }
 0x51b   : > { %3555 = vmatpush1.bf16.msra.mxu0 %v5026_v5  ;;  %3608 = vmatpush1.bf16.msra.mxu1 %v5027_v6 }
 0x51c   : > { %3556 = vmatprep.subr.bf16.mxu0 %v5028_v7  ;;  %3609 = vmatprep.subr.bf16.mxu1 %v5030_v13 }
 0x51f   : > { %3557 = vmatpush1.bf16.msra.mxu0 %v5032_v43  ;;  %3610 = vmatpush1.bf16.msra.mxu1 %v5033_v28 }
 0x520   : > { %3558 = vmatprep.subr.bf16.mxu0 %v5034_v10  ;;  %3611 = vmatprep.subr.bf16.mxu1 %v5036_v1 }
 0x523   : > { %3559 = vmatpush1.bf16.msra.mxu0 %v5038_v16  ;;  %3612 = vmatpush1.bf16.msra.mxu1 %v5039_v18 }
 0x524   : > { %3560 = vmatprep.subr.bf16.mxu0 %v5040_v42  ;;  %3613 = vmatprep.subr.bf16.mxu1 %v5042_v22 }
 0x527   : > { %3561 = vmatpush1.bf16.msra.mxu0 %v5044_v25  ;;  %3614 = vmatpush1.bf16.msra.mxu1 %v5045_v26 }
 0x528   : > { %3562 = vmatprep.subr.bf16.mxu0 %v5046_v36  ;;  %3615 = vmatprep.subr.bf16.mxu1 %v5048_v37 }
 0x52b   : > { %3563 = vmatpush1.bf16.msra.mxu0 %v5050_v34  ;;  %3616 = vmatpush1.bf16.msra.mxu1 %v5051_v40 }
 0x52c   : > { %3564 = vmatprep.subr.bf16.mxu0 %v5052_v31  ;;  %3617 = vmatprep.subr.bf16.mxu1 %v5054_v41 }
 0x52f   : > { %3565 = vmatpush1.bf16.msra.mxu0 %v5056_v14  ;;  %3618 = vmatpush1.bf16.msra.mxu1 %v5057_v17 }
 0x530   : > { %3566 = vmatprep.subr.bf16.mxu0 %v5058_v45  ;;  %3619 = vmatprep.subr.bf16.mxu1 %v5060_v11 }
 0x533   : > { %3567 = vmatpush1.bf16.msra.mxu0 %v5062_v12  ;;  %3620 = vmatpush1.bf16.msra.mxu1 %v5063_v48 }
 0x534   : > { %3568 = vmatprep.subr.bf16.mxu0 %v5064_v20  ;;  %3621 = vmatprep.subr.bf16.mxu1 %v5066_v27 }
 0x537   : > { %3569 = vmatpush1.bf16.msra.mxu0 %v5068_v39  ;;  %3622 = vmatpush1.bf16.msra.mxu1 %v5069_v15 }
 0x538   : > { %3570 = vmatprep.subr.bf16.mxu0 %v5070_v4  ;;  %3623 = vmatprep.subr.bf16.mxu1 %v5072_v0 }
 0x53b   : > { %3571 = vmatpush1.bf16.msra.mxu0 %v5074_v23  ;;  %3624 = vmatpush1.bf16.msra.mxu1 %v5075_v29 }
 0x53c   : > { %3572 = vmatprep.subr.bf16.mxu0 %v5076_v30  ;;  %3625 = vmatprep.subr.bf16.mxu1 %v5078_v44 }
 0x53f   : > { %3573 = vmatpush1.bf16.msra.mxu0 %v5080_v24  ;;  %3626 = vmatpush1.bf16.msra.mxu1 %v5081_v33 }
 0x540   : > { %3574 = vmatprep.subr.bf16.mxu0 %v5082_v38  ;;  %3627 = vmatprep.subr.bf16.mxu1 %v5084_v32 }
 0x543   : > { %3575 = vmatpush1.bf16.msra.mxu0 %v5086_v21  ;;  %3628 = vmatpush1.bf16.msra.mxu1 %v5087_v47 }
 0x546   : > { %3577 = vmatmul.mubr.bf16.vlgmr.msra.gmra.mrb[0].mxu0 %v3134_v35  ;;  %3630 = vmatmul.mubr.bf16.vlgmr.msra.gmra.mrb[0].mxu1 %v3134_v35 }
 0x547   : > { %3586 = vmatprep.mubr.bf16.mxu0 %v3137_v8  ;;  %3639 = vmatprep.mubr.bf16.mxu1 %v3137_v8 }
 0x54e   : > { %3587 = vmatmul.mubr.bf16.gmra.mrb[4].mxu0 %v3136_v53  ;;  %3640 = vmatmul.mubr.bf16.gmra.mrb[4].mxu1 %v3136_v53 }
 0x619   : > { %v3578_v5 = vpop.f32.mrb[0].mxu0  ;;  %v3631_v6 = vpop.f32.mrb[0].mxu1 }
 0x61a   : > { %v3579_v7 = vadd.f32 %v3578_v5, %v3207_v60  ;;  %v3632_v13 = vadd.f32 %v3631_v6, %v3215_v61  ;;  %v3580_v43 = vpop.f32.mrb[1].mxu0  ;;  %v3633_v28 = vpop.f32.mrb[1].mxu1 }
 0x61b   : > { %v3581_v10 = vadd.f32 %v3580_v43, %v3211_v63  ;;  %v3634_v1 = vadd.f32 %v3633_v28, %v3219_v3  ;;  %v3582_v16 = vpop.f32.mrb[2].mxu0  ;;  %v3635_v18 = vpop.f32.mrb[2].mxu1 }
 0x61c   : > { %v3650_v42 = vmax.f32 %v3579_v7, 0.0  ;;  %v3652_v22 = vmax.f32 %v3632_v13, 0.0  ;;  %v3583_v25 = vadd.f32 %v3582_v16, %v3207_v60  ;;  %v3636_v26 = vadd.f32 %v3635_v18, %v3215_v61  ;;  %v3584_v36 = vpop.f32.mrb[3].mxu0  ;;  %v3637_v2 = vpop.f32.mrb[3].mxu1 }
 0x61d   : > { %v3651_v37 = vmax.f32 %v3581_v10, 0.0  ;;  %v3653_v34 = vmax.f32 %v3634_v1, 0.0  ;;  %v3585_v40 = vadd.f32 %v3584_v36, %v3211_v63  ;;  %v3638_v31 = vadd.f32 %v3637_v2, %v3219_v3 }
 0x61e   : > { %3666 = vst [vmem:[%s6342_s6] sm:$0xff] %v3650_v42  ;;  %3668 = vst [vmem:[%s6342_s6 + $0x10] sm:$0xff] %v3652_v22  ;;  %v3654_v41 = vmax.f32 %v3583_v25, 0.0  ;;  %v3656_v14 = vmax.f32 %v3636_v26, 0.0 }
 0x61f   : > { %3667 = vst [vmem:[%s6342_s6 + $0x8] sm:$0xff] %v3651_v37  ;;  %3669 = vst [vmem:[%s6342_s6 + $0x18] sm:$0xff] %v3653_v34  ;;  %v3655_v17 = vmax.f32 %v3585_v40, 0.0  ;;  %v3657_v45 = vmax.f32 %v3638_v31, 0.0 }
 0x620   : > { %3670 = vst [vmem:[%s6342_s6 + $0x20] sm:$0xff] %v3654_v41  ;;  %3672 = vst [vmem:[%s6342_s6 + $0x30] sm:$0xff] %v3656_v14 }
 0x621   : > { %3671 = vst [vmem:[%s6342_s6 + $0x28] sm:$0xff] %v3655_v17  ;;  %3673 = vst [vmem:[%s6342_s6 + $0x38] sm:$0xff] %v3657_v45  ;;  %v3588_v11 = vpop.f32.mrb[4].mxu0  ;;  %v3641_v51 = vpop.f32.mrb[4].mxu1 }
 0x622   : > { %v3589_v54 = vadd.f32 %v3588_v11, %v3207_v60  ;;  %v3642_v12 = vadd.f32 %v3641_v51, %v3215_v61  ;;  %v3590_v48 = vpop.f32.mrb[5].mxu0  ;;  %v3643_v46 = vpop.f32.mrb[5].mxu1 }
 0x623   : > { %v3591_v20 = vadd.f32 %v3590_v48, %v3211_v63  ;;  %v3644_v27 = vadd.f32 %v3643_v46, %v3219_v3  ;;  %v3592_v39 = vpop.f32.mrb[6].mxu0  ;;  %v3645_v15 = vpop.f32.mrb[6].mxu1 }
 0x624   : > { %v3658_v4 = vmax.f32 %v3589_v54, 0.0  ;;  %v3660_v0 = vmax.f32 %v3642_v12, 0.0  ;;  %v3593_v23 = vadd.f32 %v3592_v39, %v3207_v60  ;;  %v3646_v29 = vadd.f32 %v3645_v15, %v3215_v61  ;;  %v3594_v30 = vpop.f32.mrb[7].mxu0  ;;  %v3647_v44 = vpop.f32.mrb[7].mxu1 }
 0x625   : > { %v3659_v24 = vmax.f32 %v3591_v20, 0.0  ;;  %v3661_v33 = vmax.f32 %v3644_v27, 0.0  ;;  %v3595_v38 = vadd.f32 %v3594_v30, %v3211_v63  ;;  %v3648_v32 = vadd.f32 %v3647_v44, %v3219_v3 }
 0x626   : > { %3674 = vst [vmem:[%s6342_s6 + $0x40] sm:$0xff] %v3658_v4  ;;  %3676 = vst [vmem:[%s6342_s6 + $0x50] sm:$0xff] %v3660_v0  ;;  %v3662_v21 = vmax.f32 %v3593_v23, 0.0  ;;  %v3664_v47 = vmax.f32 %v3646_v29, 0.0 }
 0x627   : > { %3675 = vst [vmem:[%s6342_s6 + $0x48] sm:$0xff] %v3659_v24  ;;  %3677 = vst [vmem:[%s6342_s6 + $0x58] sm:$0xff] %v3661_v33  ;;  %v3663_v58 = vmax.f32 %v3595_v38, 0.0  ;;  %v3665_v9 = vmax.f32 %v3648_v32, 0.0 }
 0x628   : > { %3678 = vst [vmem:[%s6342_s6 + $0x60] sm:$0xff] %v3662_v21  ;;  %3680 = vst [vmem:[%s6342_s6 + $0x70] sm:$0xff] %v3664_v47 }
 0x629   : > { %3679 = vst [vmem:[%s6342_s6 + $0x68] sm:$0xff] %v3663_v58  ;;  %3681 = vst [vmem:[%s6342_s6 + $0x78] sm:$0xff] %v3665_v9 }
 0x62a PF: > { %p20_p0 = scmp.ge.s32.totalorder %s5393_s15, 6   ;;  %s6377_s21 = smov %s5242_s22 }
 0x62b   : > { %s6378_s22 = smov %s5246_s23  ;;  %s6379_s23 = smov %s5403_s17 }
 0x62c   : > { %s6380_s24 = smov %s5393_s15  ;;  %22 = sbr.rel (!%p20_p0) target bundleno = 8 (0x8), region = 113 }
 0x633   :  { %3693 = vsyncpa [#allocation4], 1 }
 0x634   :  { %3695 = vsyncpa [#allocation4 + $0x1], 1 }
 0x635   :  { %3696 = vsyncpa [#allocation6], 1 }
 0x636   :  { %3698 = vsyncpa [#allocation6 + $0x1], 1 }
 0x637   :  { %3699 = vsyncpa [#allocation9], 1 }

</bundles_post_ra>
